<compile_context>
chip_gen: v7x
topology: tpu7x:2x2x1
jax: 0.10.0
libtpu: 0.0.40
codegen_flags: <defaults>
</compile_context>

<pallas_src>
import jax
import jax.numpy as jnp
import numpy as np
from jax.experimental import pallas as pl
from jax.experimental.pallas import tpu as pltpu

BERT_SIZE = 768
KG_SIZE = 256
EMB_SIZE = BERT_SIZE + KG_SIZE  # 1024


def _round_up(x, m):
    return ((x + m - 1) // m) * m


def _pad_axis1(x, n_pad):
    if x.shape[1] == n_pad:
        return x
    return jnp.pad(x, ((0, 0), (0, n_pad - x.shape[1]), (0, 0)))


# ----------------------------------------------------------------------------
# Pallas kernel: per (batch, candidate-tile) grid step
#   g        = kg  @ W[768:]                      (shared by both branches)
#   cand_fin = relu(cand @ W[:768] + g + bias)
#   ctx_fin  = relu(ctx_lin       + g + bias)     (ctx_lin precomputed per batch row)
#   scores   = sum(ctx_fin * cand_fin, axis=-1)   (lane-dense (1, TN) store)
# ----------------------------------------------------------------------------
def _score_kernel(ctxl_ref, cand_ref, kg_ref, wt_ref, wb_ref, b_ref, o_ref):
    tn = cand_ref.shape[0]
    bias = b_ref[...]                     # (1, 768)   f32, VMEM-resident
    ctx_lin = ctxl_ref[...]               # (1, 768)   f32, ctx @ W[:768] for this batch row

    # Shared KG projection kg @ W[768:], reused by context & candidate branches.
    g = jnp.dot(kg_ref[...], wb_ref[...], preferred_element_type=jnp.float32)      # (TN, 768)

    # Candidate 768-part matmul (no concat / no stacked copy — separate dot per review).
    hd = jnp.dot(cand_ref[...], wt_ref[...], preferred_element_type=jnp.float32)   # (TN, 768)

    # encode_concat == relu(dropout(Linear(concat(x, kg)))), dropout = identity. f32 epilogue.
    cand_fin = jnp.maximum(hd + g + bias, 0.0)            # candidate_final_embedding
    ctx_fin = jnp.maximum(ctx_lin + g + bias, 0.0)         # context_final_embedding (broadcast row)

    # Row-wise dot product scores, written lane-dense as (1, TN).
    o_ref[...] = jnp.sum(ctx_fin * cand_fin, axis=-1).reshape(1, tn)


def _choose_candidate_tile(b, n):
    """Pick the candidate-tile size TN and padded candidate count n_pad."""
    n8 = _round_up(n, 8)
    if n8 <= 512:
        # Single tile along n (TN == n_pad keeps the lane layout legal for any n);
        # megacore parallelism comes from the batch axis when b >= 2.
        return n8, n8
    # Large n: big (multiple-of-128) tiles amortize the ~0.35 us per-step overhead.
    tn = 512
    if b == 1:
        # Keep the grid >= 2 so both v7x TensorCores get work.
        tn = min(512, _round_up(pl.cdiv(n8, 2), 128))
    n_pad = _round_up(n8, tn)
    return tn, n_pad


def fused_rerank_scores(context_emb, candidate_emb, kg_emb, w, bias):
    """context_emb: (b, 768); candidate_emb: (b, n, 768); kg_emb: (b, n, 256);
    w: (1024, 768); bias: (768,)  ->  scores (b, n) f32."""
    b, n, _ = candidate_emb.shape
    TN, n_pad = _choose_candidate_tile(b, n)
    n_tiles = n_pad // TN

    w_top = w[:BERT_SIZE, :].astype(jnp.bfloat16)      # (768, 768)
    w_bot = w[BERT_SIZE:, :].astype(jnp.bfloat16)      # (256, 768)
    bias2d = bias.reshape(1, BERT_SIZE).astype(jnp.float32)

    # Context 768-part projected ONCE per batch row (tiny preamble matmul, bf16-in/f32-acc);
    # the (b*n)-fold jnp.repeat and the in-kernel redundant 768x768 matmul are gone.
    ctx_lin = jnp.dot(context_emb.astype(jnp.bfloat16), w_top,
                      preferred_element_type=jnp.float32).reshape(b, 1, BERT_SIZE)

    cand_b = _pad_axis1(candidate_emb.astype(jnp.bfloat16), n_pad)   # (b, n_pad, 768)
    kg_b = _pad_axis1(kg_emb.astype(jnp.bfloat16), n_pad)            # (b, n_pad, 256)

    # Deduplicated cost: per candidate row one 768x768 and one 256x768 matmul.
    flops = 2 * b * n_pad * BERT_SIZE * (BERT_SIZE + KG_SIZE)
    bytes_accessed = (
        b * n_pad * (BERT_SIZE + KG_SIZE) * 2          # bf16 candidate + kg activations in
        + b * BERT_SIZE * 4                            # f32 ctx_lin in (once per batch row)
        + (BERT_SIZE + KG_SIZE) * BERT_SIZE * 2        # bf16 weights (resident, counted once)
        + BERT_SIZE * 4                                # f32 bias
        + b * n_pad * 4                                # f32 scores out
    )

    def run(single_buffer_resident):
        def resident_spec(shape):
            # Constant index_map => grid-resident; the second pipeline buffer is dead weight.
            if single_buffer_resident:
                return pl.BlockSpec(shape, lambda i, j: (0, 0),
                                    pipeline_mode=pl.Buffered(1))
            return pl.BlockSpec(shape, lambda i, j: (0, 0))

        call = pl.pallas_call(
            _score_kernel,
            out_shape=jax.ShapeDtypeStruct((b, 1, n_pad), jnp.float32),
            grid=(b, n_tiles),
            in_specs=[
                pl.BlockSpec((None, 1, BERT_SIZE), lambda i, j: (i, 0, 0)),    # ctx_lin (broadcast over j)
                pl.BlockSpec((None, TN, BERT_SIZE), lambda i, j: (i, j, 0)),   # candidate 768-part
                pl.BlockSpec((None, TN, KG_SIZE), lambda i, j: (i, j, 0)),     # kg 256-part
                resident_spec((BERT_SIZE, BERT_SIZE)),                         # W[:768]  (resident)
                resident_spec((KG_SIZE, BERT_SIZE)),                           # W[768:]  (resident)
                resident_spec((1, BERT_SIZE)),                                 # bias     (resident)
            ],
            out_specs=pl.BlockSpec((None, 1, TN), lambda i, j: (i, 0, j)),     # lane-dense scores
            compiler_params=pltpu.CompilerParams(
                dimension_semantics=("parallel", "parallel"),
                vmem_limit_bytes=32 * 1024 * 1024,
            ),
            cost_estimate=pl.CostEstimate(
                flops=flops, transcendentals=0, bytes_accessed=bytes_accessed),
        )
        return call(ctx_lin, cand_b, kg_b, w_top, w_bot, bias2d)

    try:
        out = run(True)
    except Exception:
        # TODO(synk): fallback to default double-buffered resident operands if this JAX
        #             build rejects pipeline_mode=pl.Buffered(1); costs ~1.5 MiB VMEM only.
        out = run(False)
    return out[:, 0, :n]


# ----------------------------------------------------------------------------
# Plain-JAX glue (encoder substitutes, KG lookup)
# ----------------------------------------------------------------------------
def bert_like_encoder(token_ids, tok_emb):
    # Mimics BertModel(ids)[0].mean(1): (rows, S) -> (rows, 768)
    tok = jnp.take(tok_emb, token_ids, axis=0)         # (rows, S, 768)
    return tok.mean(axis=1)                             # (rows, 768)


def kg_lookup(kg_idx, entity_emb):
    # kg_idx >= 0  -> entity_embeddings[kg_idx]
    # kg_idx <  0  -> mean(entity_embeddings, dim=0)   (the "not covered" fallback)
    mean_emb = entity_emb.mean(axis=0)                               # (256,)
    covered = (kg_idx >= 0)[..., None]                               # (b, n, 1)
    emb = jnp.take(entity_emb, jnp.clip(kg_idx, 0, None), axis=0)    # (b, n, 256)
    return jnp.where(covered, emb, mean_emb)


def reranker_forward(params, context_ids, candidate_ids, kg_idx):
    b, n, s = candidate_ids.shape

    # KG embeddings (the mesh2cui / cui2idx python-dict walk is precomputed into kg_idx)
    kg_emb = kg_lookup(kg_idx, params["entity_emb"])                               # (b, n, 256)

    # encode_context -> (b, 768)   (no jnp.repeat: the kernel broadcasts per batch row)
    context_emb = bert_like_encoder(context_ids, params["ctx_tok_emb"])            # (b, 768)

    # encode_candidate on (b*n, s) -> (b, n, 768)
    candidate_emb = bert_like_encoder(
        candidate_ids.reshape(b * n, s), params["cand_tok_emb"]).reshape(b, n, BERT_SIZE)

    # Fused Pallas hot path: split-weight Linear(1024->768)+ReLU on both, row-wise dot.
    return fused_rerank_scores(
        context_emb, candidate_emb, kg_emb, params["linear_w"], params["linear_b"])


# ----------------------------------------------------------------------------
# Pure-JAX references for verification
# ----------------------------------------------------------------------------
def reranker_forward_ref_bf16(params, context_ids, candidate_ids, kg_idx):
    """Same math as the Pallas kernel (bf16 matmul operands, f32 accumulate/elementwise)."""
    b, n, s = candidate_ids.shape
    kg_rows = kg_lookup(kg_idx, params["entity_emb"]).reshape(b * n, KG_SIZE)
    ctx = bert_like_encoder(context_ids, params["ctx_tok_emb"])
    ctx_rows = jnp.repeat(ctx[:, None, :], n, axis=1).reshape(b * n, BERT_SIZE)
    cand_rows = bert_like_encoder(candidate_ids.reshape(b * n, s), params["cand_tok_emb"])
    wt = params["linear_w"][:BERT_SIZE, :].astype(jnp.bfloat16)
    wb = params["linear_w"][BERT_SIZE:, :].astype(jnp.bfloat16)
    bias = params["linear_b"].astype(jnp.float32)
    g = jnp.dot(kg_rows.astype(jnp.bfloat16), wb, preferred_element_type=jnp.float32)
    hc = jnp.maximum(
        jnp.dot(ctx_rows.astype(jnp.bfloat16), wt, preferred_element_type=jnp.float32) + g + bias, 0.0)
    hd = jnp.maximum(
        jnp.dot(cand_rows.astype(jnp.bfloat16), wt, preferred_element_type=jnp.float32) + g + bias, 0.0)
    return jnp.sum(hc * hd, axis=-1).reshape(b, n)


def reranker_forward_ref_f32(params, context_ids, candidate_ids, kg_idx):
    """Original-module semantics (f32 concat + Linear + ReLU + row-dot), loose check."""
    b, n, s = candidate_ids.shape
    kg_emb = kg_lookup(kg_idx, params["entity_emb"])
    ctx = bert_like_encoder(context_ids, params["ctx_tok_emb"])
    ctx = jnp.repeat(ctx[:, None, :], n, axis=1)
    cc = jnp.concatenate([ctx, kg_emb], axis=2).reshape(b * n, EMB_SIZE)
    cand = bert_like_encoder(candidate_ids.reshape(b * n, s), params["cand_tok_emb"])
    cd = jnp.concatenate([cand.reshape(b, n, BERT_SIZE), kg_emb], axis=-1).reshape(b * n, EMB_SIZE)
    hc = jnp.maximum(cc @ params["linear_w"] + params["linear_b"], 0.0)
    hd = jnp.maximum(cd @ params["linear_w"] + params["linear_b"], 0.0)
    return jnp.sum(hc * hd, axis=-1).reshape(b, n)


# ----------------------------------------------------------------------------
# Deterministic parameter init + driver
# ----------------------------------------------------------------------------
def init_params(key, vocab=100, n_entities=64):
    k = jax.random.split(key, 5)
    return {
        # BiEncoderModule.linear: torch Linear(1024, 768) -> stored transposed (in, out)
        "linear_w": jax.random.normal(k[0], (EMB_SIZE, BERT_SIZE), jnp.float32) * 0.02,
        "linear_b": jax.random.normal(k[1], (BERT_SIZE,), jnp.float32) * 0.02,
        # encoder substitutes (token embedding tables, hidden = 768)
        "ctx_tok_emb": jax.random.normal(k[2], (vocab, BERT_SIZE), jnp.float32) * 0.1,
        "cand_tok_emb": jax.random.normal(k[3], (vocab, BERT_SIZE), jnp.float32) * 0.1,
        # KG_Encoder entity embeddings (TransE table), emb_size = 256
        "entity_emb": jax.random.normal(k[4], (n_entities, KG_SIZE), jnp.float32) * 0.1,
    }


if __name__ == "__main__":
    key = jax.random.PRNGKey(0)
    pkey, dkey = jax.random.split(key)
    params = init_params(pkey)

    b, n, s = 2, 4, 8
    vocab, n_entities = 100, 64
    k1, k2, k3 = jax.random.split(dkey, 3)
    context_ids = jax.random.randint(k1, (b, s), 0, vocab, dtype=jnp.int32)
    candidate_ids = jax.random.randint(k2, (b, n, s), 0, vocab, dtype=jnp.int32)
    # kg_idx: -1 means "mesh not covered" -> mean entity embedding fallback
    kg_idx = jax.random.randint(k3, (b, n), -1, n_entities, dtype=jnp.int32)

    scores = reranker_forward(params, context_ids, candidate_ids, kg_idx)
    scores = jax.block_until_ready(scores)
    assert scores.shape == (b, n)

    # Tight check against a bf16-operand reference matching the kernel numerics.
    ref_bf16 = jax.block_until_ready(
        reranker_forward_ref_bf16(params, context_ids, candidate_ids, kg_idx))
    np.testing.assert_allclose(np.asarray(scores), np.asarray(ref_bf16), rtol=1e-4, atol=1e-5)

    # Loose check against the full-f32 original-module math (bf16 input rounding only).
    ref_f32 = jax.block_until_ready(
        reranker_forward_ref_f32(params, context_ids, candidate_ids, kg_idx))
    np.testing.assert_allclose(np.asarray(scores), np.asarray(ref_f32), rtol=2e-2, atol=2e-3)

    print("KERNEL_OK")
</pallas_src>

<mosaic_0001>
module attributes {stable_mosaic.version = 11 : i64} {
  func.func @_score_kernel(%arg0: i32, %arg1: i32, %arg2: memref<1x1x768xf32, #tpu.memory_space<vmem>>, %arg3: memref<1x8x768xbf16, #tpu.memory_space<vmem>>, %arg4: memref<1x8x256xbf16, #tpu.memory_space<vmem>>, %arg5: memref<768x768xbf16, #tpu.memory_space<vmem>>, %arg6: memref<256x768xbf16, #tpu.memory_space<vmem>>, %arg7: memref<1x768xf32, #tpu.memory_space<vmem>>, %arg8: memref<1x1x8xf32, #tpu.memory_space<vmem>>) attributes {dimension_semantics = [#tpu.dimension_semantics<parallel>, #tpu.dimension_semantics<parallel>], iteration_bounds = array<i64: 2, 1>, scalar_prefetch = 0 : i64, scratch_operands = 0 : i64, tpu.core_type = #tpu.core_type<tc>, window_params = [{transform_indices = @transform_0, window_bounds = array<i64: 1, 1, 768>}, {transform_indices = @transform_1, window_bounds = array<i64: 1, 8, 768>}, {transform_indices = @transform_2, window_bounds = array<i64: 1, 8, 256>}, {pipeline_mode = #tpu.pipeline_mode<synchronous>, transform_indices = @transform_3, window_bounds = array<i64: 768, 768>}, {pipeline_mode = #tpu.pipeline_mode<synchronous>, transform_indices = @transform_4, window_bounds = array<i64: 256, 768>}, {pipeline_mode = #tpu.pipeline_mode<synchronous>, transform_indices = @transform_5, window_bounds = array<i64: 1, 768>}, {transform_indices = @transform_6, window_bounds = array<i64: 1, 1, 8>}]} {
    %c0 = arith.constant 0 : index
    %c0_0 = arith.constant 0 : index
    %0 = vector.load %arg7[%c0, %c0_0] : memref<1x768xf32, #tpu.memory_space<vmem>>, vector<1x768xf32>
    %c0_1 = arith.constant 0 : index
    %c0_2 = arith.constant 0 : index
    %c0_3 = arith.constant 0 : index
    %1 = vector.load %arg2[%c0_1, %c0_2, %c0_3] : memref<1x1x768xf32, #tpu.memory_space<vmem>>, vector<1x1x768xf32>
    %2 = vector.shape_cast %1 : vector<1x1x768xf32> to vector<1x768xf32>
    %c0_4 = arith.constant 0 : index
    %c0_5 = arith.constant 0 : index
    %c0_6 = arith.constant 0 : index
    %3 = vector.load %arg4[%c0_4, %c0_5, %c0_6] : memref<1x8x256xbf16, #tpu.memory_space<vmem>>, vector<1x8x256xbf16>
    %4 = vector.shape_cast %3 : vector<1x8x256xbf16> to vector<8x256xbf16>
    %c0_7 = arith.constant 0 : index
    %c0_8 = arith.constant 0 : index
    %5 = vector.load %arg6[%c0_7, %c0_8] : memref<256x768xbf16, #tpu.memory_space<vmem>>, vector<256x768xbf16>
    %cst = arith.constant dense<0.000000e+00> : vector<8x768xf32>
    %6 = tpu.matmul %4, %5, %cst {dimension_numbers = #tpu.dot_dimension_numbers<[1], [0], [0], [1], [0, 0, 1, 1], [], []>} : vector<8x256xbf16>, vector<256x768xbf16>, vector<8x768xf32> -> vector<8x768xf32>
    %c0_9 = arith.constant 0 : index
    %c0_10 = arith.constant 0 : index
    %c0_11 = arith.constant 0 : index
    %7 = vector.load %arg3[%c0_9, %c0_10, %c0_11] : memref<1x8x768xbf16, #tpu.memory_space<vmem>>, vector<1x8x768xbf16>
    %8 = vector.shape_cast %7 : vector<1x8x768xbf16> to vector<8x768xbf16>
    %c0_12 = arith.constant 0 : index
    %c0_13 = arith.constant 0 : index
    %9 = vector.load %arg5[%c0_12, %c0_13] : memref<768x768xbf16, #tpu.memory_space<vmem>>, vector<768x768xbf16>
    %cst_14 = arith.constant dense<0.000000e+00> : vector<8x768xf32>
    %10 = tpu.matmul %8, %9, %cst_14 {dimension_numbers = #tpu.dot_dimension_numbers<[1], [0], [0], [1], [0, 0, 1, 1], [], []>} : vector<8x768xbf16>, vector<768x768xbf16>, vector<8x768xf32> -> vector<8x768xf32>
    %11 = arith.addf %10, %6 : vector<8x768xf32>
    %12 = vector.broadcast %0 : vector<1x768xf32> to vector<8x768xf32>
    %13 = arith.addf %11, %12 : vector<8x768xf32>
    %cst_15 = arith.constant 0.000000e+00 : f32
    %14 = vector.broadcast %cst_15 : f32 to vector<8x768xf32>
    %15 = arith.maximumf %13, %14 : vector<8x768xf32>
    %16 = vector.broadcast %2 : vector<1x768xf32> to vector<8x768xf32>
    %17 = arith.addf %16, %6 : vector<8x768xf32>
    %18 = vector.broadcast %0 : vector<1x768xf32> to vector<8x768xf32>
    %19 = arith.addf %17, %18 : vector<8x768xf32>
    %cst_16 = arith.constant 0.000000e+00 : f32
    %20 = vector.broadcast %cst_16 : f32 to vector<8x768xf32>
    %21 = arith.maximumf %19, %20 : vector<8x768xf32>
    %22 = arith.mulf %21, %15 : vector<8x768xf32>
    %cst_17 = arith.constant dense<0.000000e+00> : vector<8xf32>
    %23 = vector.multi_reduction <add>, %22, %cst_17 [1] : vector<8x768xf32> to vector<8xf32>
    %24 = vector.shape_cast %23 : vector<8xf32> to vector<1x8xf32>
    %c0_18 = arith.constant 0 : index
    %c0_19 = arith.constant 0 : index
    %c0_20 = arith.constant 0 : index
    %25 = vector.load %arg8[%c0_18, %c0_19, %c0_20] : memref<1x1x8xf32, #tpu.memory_space<vmem>>, vector<1x1x8xf32>
    %26 = vector.shape_cast %25 : vector<1x1x8xf32> to vector<1x8xf32>
    %27 = vector.shape_cast %24 : vector<1x8xf32> to vector<1x1x8xf32>
    tpu.vector_store %arg8[%c0_18, %c0_19, %c0_20], %27 {strides = array<i32>} : memref<1x1x8xf32, #tpu.memory_space<vmem>>, vector<1x1x8xf32>,
    return
  }
  func.func @transform_0(%arg0: i32, %arg1: i32) -> (i32, i32, i32) {
    %c0_i32 = arith.constant 0 : i32
    %c0_i32_0 = arith.constant 0 : i32
    %c0_i32_1 = arith.constant 0 : i32
    return %arg0, %c0_i32, %c0_i32_0 : i32, i32, i32
  }
  func.func @transform_1(%arg0: i32, %arg1: i32) -> (i32, i32, i32) {
    %c0_i32 = arith.constant 0 : i32
    %c0_i32_0 = arith.constant 0 : i32
    return %arg0, %arg1, %c0_i32 : i32, i32, i32
  }
  func.func @transform_2(%arg0: i32, %arg1: i32) -> (i32, i32, i32) {
    %c0_i32 = arith.constant 0 : i32
    %c0_i32_0 = arith.constant 0 : i32
    return %arg0, %arg1, %c0_i32 : i32, i32, i32
  }
  func.func @transform_3(%arg0: i32, %arg1: i32) -> (i32, i32) {
    %c0_i32 = arith.constant 0 : i32
    %c0_i32_0 = arith.constant 0 : i32
    %c0_i32_1 = arith.constant 0 : i32
    return %c0_i32, %c0_i32_0 : i32, i32
  }
  func.func @transform_4(%arg0: i32, %arg1: i32) -> (i32, i32) {
    %c0_i32 = arith.constant 0 : i32
    %c0_i32_0 = arith.constant 0 : i32
    %c0_i32_1 = arith.constant 0 : i32
    return %c0_i32, %c0_i32_0 : i32, i32
  }
  func.func @transform_5(%arg0: i32, %arg1: i32) -> (i32, i32) {
    %c0_i32 = arith.constant 0 : i32
    %c0_i32_0 = arith.constant 0 : i32
    %c0_i32_1 = arith.constant 0 : i32
    return %c0_i32, %c0_i32_0 : i32, i32
  }
  func.func @transform_6(%arg0: i32, %arg1: i32) -> (i32, i32, i32) {
    %c0_i32 = arith.constant 0 : i32
    %c0_i32_0 = arith.constant 0 : i32
    return %arg0, %c0_i32, %arg1 : i32, i32, i32
  }
}

module attributes {stable_mosaic.version = 11 : i64} {
  func.func @_score_kernel(%arg0: i32, %arg1: i32, %arg2: memref<1x1x768xf32, #tpu.memory_space<vmem>>, %arg3: memref<1x8x768xbf16, #tpu.memory_space<vmem>>, %arg4: memref<1x8x256xbf16, #tpu.memory_space<vmem>>, %arg5: memref<768x768xbf16, #tpu.memory_space<vmem>>, %arg6: memref<256x768xbf16, #tpu.memory_space<vmem>>, %arg7: memref<1x768xf32, #tpu.memory_space<vmem>>, %arg8: memref<1x1x8xf32, #tpu.memory_space<vmem>>) attributes {dimension_semantics = [#tpu.dimension_semantics<parallel>, #tpu.dimension_semantics<parallel>], iteration_bounds = array<i64: 2, 1>, scalar_prefetch = 0 : i64, scratch_operands = 0 : i64, tpu.core_type = #tpu.core_type<tc>, window_params = [{transform_indices = @transform_0, window_bounds = array<i64: 1, 1, 768>}, {transform_indices = @transform_1, window_bounds = array<i64: 1, 8, 768>}, {transform_indices = @transform_2, window_bounds = array<i64: 1, 8, 256>}, {pipeline_mode = #tpu.pipeline_mode<synchronous>, transform_indices = @transform_3, window_bounds = array<i64: 768, 768>}, {pipeline_mode = #tpu.pipeline_mode<synchronous>, transform_indices = @transform_4, window_bounds = array<i64: 256, 768>}, {pipeline_mode = #tpu.pipeline_mode<synchronous>, transform_indices = @transform_5, window_bounds = array<i64: 1, 768>}, {transform_indices = @transform_6, window_bounds = array<i64: 1, 1, 8>}]} {
    %c0 = arith.constant 0 : index
    %c0_0 = arith.constant 0 : index
    %0 = vector.load %arg7[%c0, %c0_0] : memref<1x768xf32, #tpu.memory_space<vmem>>, vector<1x768xf32>
    %c0_1 = arith.constant 0 : index
    %c0_2 = arith.constant 0 : index
    %c0_3 = arith.constant 0 : index
    %1 = vector.load %arg2[%c0_1, %c0_2, %c0_3] : memref<1x1x768xf32, #tpu.memory_space<vmem>>, vector<1x1x768xf32>
    %2 = vector.shape_cast %1 : vector<1x1x768xf32> to vector<1x768xf32>
    %c0_4 = arith.constant 0 : index
    %c0_5 = arith.constant 0 : index
    %c0_6 = arith.constant 0 : index
    %3 = vector.load %arg4[%c0_4, %c0_5, %c0_6] : memref<1x8x256xbf16, #tpu.memory_space<vmem>>, vector<1x8x256xbf16>
    %4 = vector.shape_cast %3 : vector<1x8x256xbf16> to vector<8x256xbf16>
    %c0_7 = arith.constant 0 : index
    %c0_8 = arith.constant 0 : index
    %5 = vector.load %arg6[%c0_7, %c0_8] : memref<256x768xbf16, #tpu.memory_space<vmem>>, vector<256x768xbf16>
    %cst = arith.constant dense<0.000000e+00> : vector<8x768xf32>
    %6 = tpu.matmul %4, %5, %cst {dimension_numbers = #tpu.dot_dimension_numbers<[1], [0], [0], [1], [0, 0, 1, 1], [], []>} : vector<8x256xbf16>, vector<256x768xbf16>, vector<8x768xf32> -> vector<8x768xf32>
    %c0_9 = arith.constant 0 : index
    %c0_10 = arith.constant 0 : index
    %c0_11 = arith.constant 0 : index
    %7 = vector.load %arg3[%c0_9, %c0_10, %c0_11] : memref<1x8x768xbf16, #tpu.memory_space<vmem>>, vector<1x8x768xbf16>
    %8 = vector.shape_cast %7 : vector<1x8x768xbf16> to vector<8x768xbf16>
    %c0_12 = arith.constant 0 : index
    %c0_13 = arith.constant 0 : index
    %9 = vector.load %arg5[%c0_12, %c0_13] : memref<768x768xbf16, #tpu.memory_space<vmem>>, vector<768x768xbf16>
    %cst_14 = arith.constant dense<0.000000e+00> : vector<8x768xf32>
    %10 = tpu.matmul %8, %9, %cst_14 {dimension_numbers = #tpu.dot_dimension_numbers<[1], [0], [0], [1], [0, 0, 1, 1], [], []>} : vector<8x768xbf16>, vector<768x768xbf16>, vector<8x768xf32> -> vector<8x768xf32>
    %11 = arith.addf %10, %6 : vector<8x768xf32>
    %12 = vector.broadcast %0 : vector<1x768xf32> to vector<8x768xf32>
    %13 = arith.addf %11, %12 : vector<8x768xf32>
    %cst_15 = arith.constant 0.000000e+00 : f32
    %14 = vector.broadcast %cst_15 : f32 to vector<8x768xf32>
    %15 = arith.maximumf %13, %14 : vector<8x768xf32>
    %16 = vector.broadcast %2 : vector<1x768xf32> to vector<8x768xf32>
    %17 = arith.addf %16, %6 : vector<8x768xf32>
    %18 = vector.broadcast %0 : vector<1x768xf32> to vector<8x768xf32>
    %19 = arith.addf %17, %18 : vector<8x768xf32>
    %cst_16 = arith.constant 0.000000e+00 : f32
    %20 = vector.broadcast %cst_16 : f32 to vector<8x768xf32>
    %21 = arith.maximumf %19, %20 : vector<8x768xf32>
    %22 = arith.mulf %21, %15 : vector<8x768xf32>
    %cst_17 = arith.constant dense<0.000000e+00> : vector<8xf32>
    %23 = vector.multi_reduction <add>, %22, %cst_17 [1] : vector<8x768xf32> to vector<8xf32>
    %24 = vector.shape_cast %23 : vector<8xf32> to vector<1x8xf32>
    %c0_18 = arith.constant 0 : index
    %c0_19 = arith.constant 0 : index
    %c0_20 = arith.constant 0 : index
    %25 = vector.load %arg8[%c0_18, %c0_19, %c0_20] : memref<1x1x8xf32, #tpu.memory_space<vmem>>, vector<1x1x8xf32>
    %26 = vector.shape_cast %25 : vector<1x1x8xf32> to vector<1x8xf32>
    %27 = vector.shape_cast %24 : vector<1x8xf32> to vector<1x1x8xf32>
    tpu.vector_store %arg8[%c0_18, %c0_19, %c0_20], %27 {strides = array<i32>} : memref<1x1x8xf32, #tpu.memory_space<vmem>>, vector<1x1x8xf32>,
    return
  }
  func.func @transform_0(%arg0: i32, %arg1: i32) -> (i32, i32, i32) {
    %c0_i32 = arith.constant 0 : i32
    %c0_i32_0 = arith.constant 0 : i32
    %c0_i32_1 = arith.constant 0 : i32
    return %arg0, %c0_i32, %c0_i32_0 : i32, i32, i32
  }
  func.func @transform_1(%arg0: i32, %arg1: i32) -> (i32, i32, i32) {
    %c0_i32 = arith.constant 0 : i32
    %c0_i32_0 = arith.constant 0 : i32
    return %arg0, %arg1, %c0_i32 : i32, i32, i32
  }
  func.func @transform_2(%arg0: i32, %arg1: i32) -> (i32, i32, i32) {
    %c0_i32 = arith.constant 0 : i32
    %c0_i32_0 = arith.constant 0 : i32
    return %arg0, %arg1, %c0_i32 : i32, i32, i32
  }
  func.func @transform_3(%arg0: i32, %arg1: i32) -> (i32, i32) {
    %c0_i32 = arith.constant 0 : i32
    %c0_i32_0 = arith.constant 0 : i32
    %c0_i32_1 = arith.constant 0 : i32
    return %c0_i32, %c0_i32_0 : i32, i32
  }
  func.func @transform_4(%arg0: i32, %arg1: i32) -> (i32, i32) {
    %c0_i32 = arith.constant 0 : i32
    %c0_i32_0 = arith.constant 0 : i32
    %c0_i32_1 = arith.constant 0 : i32
    return %c0_i32, %c0_i32_0 : i32, i32
  }
  func.func @transform_5(%arg0: i32, %arg1: i32) -> (i32, i32) {
    %c0_i32 = arith.constant 0 : i32
    %c0_i32_0 = arith.constant 0 : i32
    %c0_i32_1 = arith.constant 0 : i32
    return %c0_i32, %c0_i32_0 : i32, i32
  }
  func.func @transform_6(%arg0: i32, %arg1: i32) -> (i32, i32, i32) {
    %c0_i32 = arith.constant 0 : i32
    %c0_i32_0 = arith.constant 0 : i32
    return %arg0, %c0_i32, %arg1 : i32, i32, i32
  }
}

</mosaic_0001>

<bundles_post_ra>
// kernel: tpu_custom_call.1
= control target key start
LH: loop header
LB: loop body
LE: loop exit
PB: predicated region body
PF: predicated region fallthrough
CT: control target
= control target key end

     0   :  { %s5393_s0 = inlined_call_operand.hbm [shape: f32[2,1,768], index: 0, kind: input, shape index: {}]   ;;  %s5394_s1 = inlined_call_operand.hbm [shape: bf16[2,8,768], index: 1, kind: input, shape index: {}]   ;;  %s5395_s2 = inlined_call_operand.hbm [shape: bf16[2,8,256], index: 2, kind: input, shape index: {}]   ;;  %s5396_s3 = inlined_call_operand.hbm [shape: bf16[768,768], index: 3, kind: input, shape index: {}]   ;;  %s5397_s4 = inlined_call_operand.hbm [shape: bf16[256,768], index: 4, kind: input, shape index: {}]   ;;  %s5398_s5 = inlined_call_operand.hbm [shape: f32[1,768], index: 5, kind: input, shape index: {}]   ;;  %s5399_s6 = inlined_call_operand.hbm [shape: f32[2,1,8], index: 6, kind: output, shape index: {}]  }
   0x1   :  { %5421 = sst [smem:[#allocation25_spill]] %s5394_s1 }
   0x2   :  { %5422 = sst [smem:[#allocation26_spill]] %s5396_s3 }
   0x3   :  { %5423 = sst [smem:[#allocation27_spill]] %s5399_s6 }
   0x4   :  { %11 = vsyncpa [#allocation3], 0 }
   0x5   :  { %13 = vsyncpa [#allocation3 + $0x1], 0 }
   0x6   :  { %14 = vsyncpa [#allocation6], 0 }
   0x7   :  { %16 = vsyncpa [#allocation6 + $0x1], 0 }
   0x8   :  { %17 = vsyncpa [#allocation9], 0 }
   0x9   :  { %18 = vsyncpa [#allocation12], 0 }
   0xa   :  { %19 = vsyncpa [#allocation4], 0 }
   0xb   :  { %21 = vsyncpa [#allocation4 + $0x1], 0  ;;  %s4938_s21 = smov 0   ;;  %s4940_s22 = smov 0  }
   0xc   :  { %s4942_s23 = smov 0   ;;  %s4944_s24 = smov 0  }
   0xd   :  { %s4946_s25 = smov 0   ;;  %s4948_s26 = smov 0  }
   0xe LB: > { %5424 = sst [smem:[#allocation19_spill]] %s4872_s21  ;;  %s4969_s27 = sadd.s32 4294967295, %s4892_s26   ;;  %s4892_s26 = sphi %s4948_s26, %s27_s26   ;;  %s4888_s25 = sphi %s4946_s25, %s5467_s25   ;;  %s4884_s24 = sphi %s4944_s24, %s5466_s24   ;;  %s4880_s23 = sphi %s4942_s23, %s5462_s23   ;;  %s4876_s22 = sphi %s4940_s22, %s5465_s22   ;;  %s4872_s21 = sphi %s4938_s21, %s5464_s21  }
   0xf   : > { %5425 = sst [smem:[#allocation20_spill]] %s4880_s23  ;;  %s3517_s28 = sadd.s32 4294967294, %s4892_s26  }
  0x10   : > { %5426 = sst [smem:[#allocation21_spill]] %s4892_s26  ;;  %p59_p0 = scmp.ne.s32.totalorder %s4876_s22, %s4872_s21 }
  0x11   : > { %p5400_p1 = scmp.eq.s32.totalorder %s4969_s27, 0  ;;  %p210_p3 = scmp.eq.s32.totalorder %s3517_s28, 1 }
  0x12   : > { %p3518_p5 = scmp.ge.s32.totalorder %s4892_s26, 1  ;;  %p217_p7 = scmp.lt.s32.totalorder %s4892_s26, 3 }
  0x13   : > { %p4978_p4 = por %p5400_p1, %p59_p0  ;;  %p4983_p6 = por %p210_p3, %p59_p0 }
  0x14   : > { %p4988_p8 = pnand %p3518_p5, %p217_p7  ;;  %s4894_s8 = smov [#allocation8]  }
  0x15   : > { %s5427_s29 = scalar_select %p4978_p4, 1, 0 }
  0x16   : > { %s5428_s30 = scalar_select %p4983_p6, 1, 0 }
  0x17   : > { %s5430_s7 = scalar_select %p4988_p8, 1, 0 }
  0x18   : > { %5429 = sst [smem:[#allocation22_spill]] %s5428_s30  ;;  %s229_s9 = sshll.u32 %s4894_s8, 4  ;;  %s230_s9 = int_to_ptr.vmem [resolvable:$true] %s229_s9 }
  0x19   : > { %p3955_p9 = pneg %p4988_p8  ;;  %s39_s11 = sadd.s32 1, %s4888_s25 }
  0x1a   : > { %s5432_s3 = sld [smem:[#allocation26_spill]] }
  0x1b   : > { %p4997_p11 = pnand %p3955_p9, %p5400_p1 }
  0x1d   : > { %s5431_s10 = scalar_select %p4997_p11, 1, 0 }
  0x1e   : > { %p5010_p13 = pneg %p4997_p11 }
  0x20   : > { %s4624_s14 = scalar_lea.hbm %s5432_s3, 36864 }
  0x21   : > { %p4625_p12 = scmp.ne.s32.totalorder %s5432_s3, %s4624_s14  ;;  %p4631_p5 = scmp.lt.u32.totalorder %s4624_s14, %s5432_s3 }
  0x22   : > { %s5433_s17 = scalar_select %p5010_p13, 1, 0 }
  0x23   : > { %p4627_p0 = pnand %p5010_p13, %p4625_p12 }
  0x25   : > { %p4628_p3 = pneg %p4627_p0 }
  0x27   : > { %p4633_p7 = pnand %p4631_p5, %p4628_p3 }
  0x29   : > { %4636 = shalt.err (!%p4633_p7)
}
  0x2a   : > { %s4637_s20 = scalar_lea.vmem %s230_s9, 36864  ;;  %p4645_p2 = scmp.lt.s32.totalorder %s230_s9, %s230_s9 }
  0x2b   : > { %p4638_p9 = scmp.ne.s32.totalorder %s230_s9, %s4637_s20  ;;  %p4646_p6 = scmp.lt.s32.totalorder %s4637_s20, %s4637_s20 }
  0x2d   : > { %p4640_p10 = pnand %p4638_p9, %p5010_p13  ;;  %p4647_p4 = por %p4646_p6, %p4645_p2 }
  0x2f   : > { %p4641_p1 = pneg %p4640_p10 }
  0x31   : > { %p4648_p8 = pnand %p4647_p4, %p4641_p1 }
  0x33   : > { %4651 = shalt.err (!%p4648_p8)
}
  0x34   : > { %s5403_s28 = smov 384   ;;  %s5404_s8 = smov 24  }
  0x35   : > { %3958 = dma.hbm_to_vmem [thread:$0]  (!%p4997_p11), %s5432_s3, 36864, %s230_s9, [#allocation9], %s5403_s28, %s5403_s28, %s5404_s8  }
  0x36   : > { %p41_p1 = scmp.ge.s32.totalorder %s39_s11, 2  ;;  %s46_s14 = sadd.s32 1, %s4880_s23 }
  0x37   : > { %p53_p2 = scmp.ne.s32.totalorder %s4880_s23, %s4876_s22  ;;  %p54_p4 = scmp.eq.s32.totalorder %s4892_s26, 0 }
  0x38   : > { %s5469_s11 = smov (%p41_p1, %s39_s11), 0  ;;  %p5435_p8 = scmp.eq.s32.totalorder %s4969_s27, 1 }
  0x39   : > { %5434 = sst [smem:[#allocation23_spill]] %s5469_s11  ;;  %p55_p6 = por %p54_p4, %p53_p2 }
  0x3a   : > { %p5037_p10 = por %p5435_p8, %p53_p2  ;;  %s43_s16 = ssub.s32 %s4888_s25, %s5469_s11 }
  0x3b   : > { %p3982_p12 = scmp.lt.s32.totalorder %s4892_s26, 2  ;;  %p44_p0 = scmp.eq.s32.totalorder %s43_s16, 0 }
  0x3c   : > { %s5436_s15 = scalar_select %p5037_p10, 1, 0 }
  0x3d   : > { %s5045_s18 = sand.u32 1, %s4880_s23   ;;  %p5047_p3 = pnand %p3982_p12, %p55_p6 }
  0x3e   : > { %s286_s19 = sand.u32 1, %s4892_s26   ;;  %s3931_s12 = smul.u32 24, %s5045_s18 }
  0x3f   : > { %s5437_s9 = scalar_select %p5047_p3, 1, 0 }
  0x40   : > { %s5053_s20 = scalar_select %p44_p0, %s4880_s23, %s46_s14  }
  0x41   : > { %s3932_s13 = smul.u32 384, %s4888_s25  ;;  %s4897_s28 = smov [#allocation10]  }
  0x42   : > { %5438 = sst [smem:[#allocation24_spill]] %s5053_s20  ;;  %s242_s8 = sshll.u32 %s4897_s28, 4  ;;  %s5057_s8 = int_to_ptr.vmem [resolvable:$true] %s242_s8 }
  0x43   : > { %s5439_s1 = sld [smem:[#allocation25_spill]]  ;;  %s290_s30 = scalar_lea.vmem [#allocation5], %s3931_s12 }
  0x44   : > { %s300_s21 = sshll.u32 %s290_s30, 4  ;;  %s5066_s14 = scalar_lea.sflag [#allocation6], %s286_s19  ;;  %s5064_s21 = int_to_ptr.vmem [resolvable:$true] %s300_s21 }
  0x45   : > { %p5072_p7 = pneg %p5047_p3 }
  0x47   : > { %s5440_s28 = scalar_select %p5072_p7, 1, 0 }
  0x49   : > { %s5062_s16 = scalar_lea.hbm %s5439_s1, %s3932_s13  ;;  %s4657_s12 = scalar_lea.hbm %s5439_s1, 768 }
  0x4a   : > { %s4652_s20 = scalar_lea.hbm %s5062_s16, 384  ;;  %p4658_p2 = scmp.lt.u32.totalorder %s5062_s16, %s5439_s1 }
  0x4b   : > { %p4653_p5 = scmp.ne.s32.totalorder %s5062_s16, %s4652_s20  ;;  %p4659_p4 = scmp.lt.u32.totalorder %s4657_s12, %s4652_s20 }
  0x4c   : > { %p4661_p8 = scmp.lt.u32.totalorder %s4652_s20, %s5062_s16 }
  0x4d   : > { %p4655_p9 = pnand %p5072_p7, %p4653_p5  ;;  %p4660_p6 = por %p4659_p4, %p4658_p2 }
  0x4f   : > { %p4656_p1 = pneg %p4655_p9  ;;  %p4662_p12 = por %p4661_p8, %p4660_p6 }
  0x51   : > { %p4663_p0 = pnand %p4662_p12, %p4656_p1 }
  0x53   : > { %4666 = shalt.err (!%p4663_p0)
}
  0x54   : > { %s4667_s19 = scalar_lea.vmem %s5064_s21, 384  ;;  %s4898_s3 = smov [#allocation5]  }
  0x55   : > { %p4668_p5 = scmp.ne.s32.totalorder %s5064_s21, %s4667_s19  ;;  %s4672_s11 = sshll.u32 %s4898_s3, 4  ;;  %s4673_s11 = int_to_ptr.vmem [resolvable:$false] %s4672_s11 }
  0x56   : > { %s4674_s30 = scalar_lea.vmem %s4673_s11, 768  ;;  %p4675_p11 = scmp.lt.s32.totalorder %s5064_s21, %s4673_s11 }
  0x57   : > { %p4670_p9 = pnand %p4668_p5, %p5072_p7  ;;  %p4676_p13 = scmp.lt.s32.totalorder %s4674_s30, %s4667_s19 }
  0x59   : > { %p4671_p10 = pneg %p4670_p9  ;;  %p4677_p2 = por %p4676_p13, %p4675_p11 }
  0x5b   : > { %p4678_p4 = pnand %p4677_p2, %p4671_p10 }
  0x5d   : > { %4681 = shalt.err (!%p4678_p4)
}
  0x5e   : > { %3971 = dma.hbm_to_vmem [thread:$0]  (!%p5047_p3), %s5062_s16, 384, %s5064_s21, %s5066_s14  }
  0x5f   : > { %s4682_s13 = scalar_lea.hbm %s5397_s4, 12288  ;;  %p5441_p6 = scmp.ne.s32.totalorder %s5433_s17, 0 }
  0x60   : > { %p4683_p1 = scmp.ne.s32.totalorder %s5397_s4, %s4682_s13  ;;  %p4689_p13 = scmp.lt.u32.totalorder %s4682_s13, %s5397_s4 }
  0x62   : > { %p4685_p8 = pnand %p4683_p1, %p5441_p6 }
  0x64   : > { %p4686_p11 = pneg %p4685_p8 }
  0x66   : > { %p4691_p10 = pnand %p4689_p13, %p4686_p11 }
  0x68   : > { %4694 = shalt.err (!%p4691_p10)
}
  0x69   : > { %s4695_s21 = scalar_lea.vmem %s5057_s8, 12288  ;;  %p4703_p9 = scmp.lt.s32.totalorder %s5057_s8, %s5057_s8 }
  0x6a   : > { %p4696_p12 = scmp.ne.s32.totalorder %s5057_s8, %s4695_s21  ;;  %p4704_p2 = scmp.lt.s32.totalorder %s4695_s21, %s4695_s21 }
  0x6c   : > { %p4698_p0 = pnand %p4696_p12, %p5441_p6  ;;  %p4705_p4 = por %p4704_p2, %p4703_p9 }
  0x6e   : > { %p4699_p5 = pneg %p4698_p0 }
  0x70   : > { %p4706_p1 = pnand %p4705_p4, %p4699_p5 }
  0x72   : > { %4709 = shalt.err (!%p4706_p1)
}
  0x73   : > { %p5442_p8 = scmp.ne.s32.totalorder %s5431_s10, 0  ;;  %s5443_s1 = smov 24  }
  0x74   : > { %s5444_s16 = smov 384   ;;  %s4899_s12 = smov [#allocation11]  }
  0x75   : > { %3961 = dma.hbm_to_vmem [thread:$0]  (!%p5442_p8), %s5397_s4, 12288, %s5057_s8, [#allocation9], %s5444_s16, %s5444_s16, %s5443_s1  }
  0x76   : > { %s256_s13 = sshll.u32 %s4899_s12, 4  ;;  %s3929_s3 = smul.u32 6, %s5045_s18  ;;  %s257_s13 = int_to_ptr.vmem [resolvable:$true] %s256_s13 }
  0x77   : > { %s4710_s21 = scalar_lea.hbm %s5398_s5, 96 }
  0x78   : > { %p4711_p11 = scmp.ne.s32.totalorder %s5398_s5, %s4710_s21  ;;  %p4717_p12 = scmp.lt.u32.totalorder %s4710_s21, %s5398_s5 }
  0x7a   : > { %p4713_p13 = pnand %p4711_p11, %p5441_p6 }
  0x7c   : > { %p4714_p10 = pneg %p4713_p13 }
  0x7e   : > { %p4719_p0 = pnand %p4717_p12, %p4714_p10 }
  0x80   : > { %4722 = shalt.err (!%p4719_p0)
}
  0x81   : > { %s4723_s8 = scalar_lea.vmem %s257_s13, 96  ;;  %p4731_p4 = scmp.lt.s32.totalorder %s257_s13, %s257_s13 }
  0x82   : > { %p4724_p5 = scmp.ne.s32.totalorder %s257_s13, %s4723_s8  ;;  %p4732_p1 = scmp.lt.s32.totalorder %s4723_s8, %s4723_s8 }
  0x84   : > { %p4726_p9 = pnand %p4724_p5, %p5441_p6  ;;  %p4733_p3 = por %p4732_p1, %p4731_p4 }
  0x86   : > { %p4727_p2 = pneg %p4726_p9 }
  0x88   : > { %p4734_p7 = pnand %p4733_p3, %p4727_p2 }
  0x8a   : > { %4737 = shalt.err (!%p4734_p7)
}
  0x8b   : > { %3964 = dma.hbm_to_vmem [thread:$0]  (!%p5442_p8), %s5398_s5, 96, %s257_s13, [#allocation12]  }
  0x8c   : > { %s3930_s6 = smul.u32 96, %s4888_s25  ;;  %s271_s1 = scalar_lea.vmem [#allocation2], %s3929_s3 }
  0x8d   : > { %s279_s17 = sshll.u32 %s271_s1, 4  ;;  %s3525_s16 = sshll.u32 %s5045_s18, 3  ;;  %s280_s17 = int_to_ptr.vmem [resolvable:$true] %s279_s17 }
  0x8e   : > { %s5146_s19 = scalar_lea.hbm %s5393_s0, %s3930_s6  ;;  %s268_s10 = scalar_lea.sflag [#allocation3], %s5045_s18 }
  0x8f   : > { %s4738_s11 = scalar_lea.hbm %s5146_s19, 96  ;;  %p5445_p7 = scmp.ne.s32.totalorder %s5440_s28, 0 }
  0x90   : > { %p4739_p3 = scmp.ne.s32.totalorder %s5146_s19, %s4738_s11  ;;  %s4743_s21 = scalar_lea.hbm %s5393_s0, 192 }
  0x91   : > { %p4744_p11 = scmp.lt.u32.totalorder %s5146_s19, %s5393_s0  ;;  %p4745_p13 = scmp.lt.u32.totalorder %s4743_s21, %s4738_s11 }
  0x92   : > { %p4741_p6 = pnand %p4739_p3, %p5445_p7  ;;  %p4747_p12 = scmp.lt.u32.totalorder %s4738_s11, %s5146_s19 }
  0x93   : > { %p4746_p10 = por %p4745_p13, %p4744_p11 }
  0x94   : > { %p4742_p8 = pneg %p4741_p6 }
  0x95   : > { %p4748_p0 = por %p4747_p12, %p4746_p10 }
  0x97   : > { %p4749_p5 = pnand %p4748_p0, %p4742_p8 }
  0x99   : > { %4752 = shalt.err (!%p4749_p5)
}
  0x9a   : > { %s4753_s23 = scalar_lea.vmem %s280_s17, 96  ;;  %s4900_s26 = smov [#allocation2]  }
  0x9b   : > { %p4754_p9 = scmp.ne.s32.totalorder %s280_s17, %s4753_s23  ;;  %s4758_s6 = sshll.u32 %s4900_s26, 4  ;;  %s4759_s6 = int_to_ptr.vmem [resolvable:$false] %s4758_s6 }
  0x9c   : > { %s4760_s1 = scalar_lea.vmem %s4759_s6, 192  ;;  %p4761_p1 = scmp.lt.s32.totalorder %s280_s17, %s4759_s6 }
  0x9d   : > { %p4756_p2 = pnand %p4754_p9, %p5445_p7  ;;  %p4762_p3 = scmp.lt.s32.totalorder %s4760_s1, %s4753_s23 }
  0x9f   : > { %p4757_p4 = pneg %p4756_p2  ;;  %p4763_p6 = por %p4762_p3, %p4761_p1 }
  0xa1   : > { %p4764_p11 = pnand %p4763_p6, %p4757_p4 }
  0xa3   : > { %4767 = shalt.err (!%p4764_p11)
}
  0xa4   : > { %p5446_p13 = scmp.ne.s32.totalorder %s5437_s9, 0  ;;  %s3928_s20 = sshll.u32 %s4888_s25, 7 }
  0xa5   : > { %s5170_s13 = scalar_lea.hbm %s5395_s2, %s3928_s20  ;;  %s311_s3 = scalar_lea.vmem [#allocation7], %s3525_s16 }
  0xa6   : > { %3968 = dma.hbm_to_vmem [thread:$0]  (!%p5446_p13), %s5146_s19, 96, %s280_s17, %s268_s10  }
  0xa7   : > { %s321_s21 = sshll.u32 %s311_s3, 4  ;;  %s4768_s30 = scalar_lea.hbm %s5170_s13, 128  ;;  %s322_s21 = int_to_ptr.vmem [resolvable:$true] %s321_s21 }
  0xa8   : > { %p4769_p8 = scmp.ne.s32.totalorder %s5170_s13, %s4768_s30  ;;  %s4773_s10 = scalar_lea.hbm %s5395_s2, 256 }
  0xa9   : > { %p4774_p0 = scmp.lt.u32.totalorder %s5170_s13, %s5395_s2  ;;  %p4775_p5 = scmp.lt.u32.totalorder %s4773_s10, %s4768_s30 }
  0xaa   : > { %p4771_p10 = pnand %p4769_p8, %p5445_p7  ;;  %p4777_p2 = scmp.lt.u32.totalorder %s4768_s30, %s5170_s13 }
  0xab   : > { %p4776_p9 = por %p4775_p5, %p4774_p0 }
  0xac   : > { %p4772_p12 = pneg %p4771_p10 }
  0xad   : > { %p4778_p4 = por %p4777_p2, %p4776_p9 }
  0xaf   : > { %p4779_p1 = pnand %p4778_p4, %p4772_p12 }
  0xb1   : > { %4782 = shalt.err (!%p4779_p1)
}
  0xb2   : > { %s4783_s18 = scalar_lea.vmem %s322_s21, 128  ;;  %s4901_s16 = smov [#allocation7]  }
  0xb3   : > { %p4784_p3 = scmp.ne.s32.totalorder %s322_s21, %s4783_s18  ;;  %s4788_s26 = sshll.u32 %s4901_s16, 4  ;;  %s4789_s26 = int_to_ptr.vmem [resolvable:$false] %s4788_s26 }
  0xb4   : > { %s4790_s6 = scalar_lea.vmem %s4789_s26, 256  ;;  %p4791_p8 = scmp.lt.s32.totalorder %s322_s21, %s4789_s26 }
  0xb5   : > { %p4786_p6 = pnand %p4784_p3, %p5445_p7  ;;  %p4792_p10 = scmp.lt.s32.totalorder %s4790_s6, %s4783_s18 }
  0xb7   : > { %p4787_p11 = pneg %p4786_p6  ;;  %p4793_p13 = por %p4792_p10, %p4791_p8 }
  0xb9   : > { %p4794_p0 = pnand %p4793_p13, %p4787_p11 }
  0xbb   : > { %4797 = shalt.err (!%p4794_p0)
}
  0xbc   : > { %p5447_p5 = scmp.ne.s32.totalorder %s5437_s9, 0  ;;  %p5448_p12 = scmp.ne.s32.totalorder %s5430_s7, 0 }
  0xbd   : > { %s5195_s28 = sand.u32 (!%p5448_p12), 1, %s4876_s22   ;;  %p5449_p7 = scmp.ne.s32.totalorder (!%p5448_p12), %s5427_s29, 0 }
  0xbe   : > { %3974 = dma.hbm_to_vmem [thread:$0]  (!%p5447_p5), %s5170_s13, 128, %s322_s21, %s5066_s14  }
  0xbf   : > { %330 = sbr.rel (%p5448_p12) target bundleno = 979 (0x3d3), region = 44  ;;  %s333_s20 = scalar_lea.sflag (!%p5448_p12), [#allocation3], %s5195_s28 }
  0xc0   : > { %s3933_s1 = smul.u32 (!%p5448_p12), 6, %s5195_s28 }
  0xc2   : > { %s5199_s12 = scalar_lea.vmem (!%p5448_p12), [#allocation2], %s3933_s1 }
  0xc6   : > { %4851 = dma.done.wait (%p5449_p7), %s333_s20, 96  }
  0xc7   : > { %4853 = vsyncadd (%p5449_p7), %s333_s20, 4294967200  ;;  %s341_s7 = sand.u32 1, %s4969_s27   ;;  %s3934_s9 = smul.u32 24, %s5195_s28 }
  0xc8   : > { %s342_s14 = scalar_lea.sflag [#allocation6], %s341_s7 }
  0xc9   : > { %s5207_s11 = scalar_lea.vmem [#allocation5], %s3934_s9 }
  0xca   : > { %4855 = dma.done.wait (%p5449_p7), %s342_s14, 512  }
  0xcb   : > { %4857 = vsyncadd (%p5449_p7), %s342_s14, 4294966784  ;;  %s3529_s13 = sshll.u32 %s5195_s28, 3  ;;  %p5450_p13 = scmp.eq.s32.totalorder %s4969_s27, 0 }
  0xcc   : > { %s5214_s3 = scalar_lea.vmem [#allocation7], %s3529_s13 }
  0xcd   : > { %4859 = dma.done.wait (%p5450_p13), [#allocation9], 49152   ;;  %p5451_p9 = pmov %p5450_p13 }
  0xcf   : > { %4861 = vsyncadd (%p5451_p9), [#allocation9], 4294918144  ;;  %p5452_p2 = pmov %p5451_p9 }
  0xd1   : > { %4863 = dma.done.wait (%p5452_p2), [#allocation12], 96   ;;  %p5453_p4 = pmov %p5452_p2 }
  0xd2   : > { %v4040_v0 = vld [vmem:[#allocation10 + $0x4] ss:$24 sps:$4 sm:$0xff]   ;;  %v4044_v2 = vld [vmem:[#allocation10] ss:$24 sps:$4 sm:$0xff]   ;;  %v4046_v4 = vld [vmem:[#allocation10 + $0x34] ss:$24 sps:$4 sm:$0xff]  }
  0xd3   : > { %4865 = vsyncadd (%p5453_p4), [#allocation12], 4294967200  ;;  %v4042_v1 = vld [vmem:[#allocation10 + $0xc] ss:$24 sps:$4 sm:$0xff]   ;;  %990 = vmatprep.subr.bf16.mxu0 %v4040_v0  ;;  %v4045_v3 = vld [vmem:[#allocation10 + $0x8] ss:$24 sps:$4 sm:$0xff]  }
  0xd4   : > { %1031 = vmatprep.subr.bf16.mxu1 %v4042_v1  ;;  %991 = vmatpush1.bf16.msra.mxu0 %v4044_v2  ;;  %v4048_v5 = vld [vmem:[#allocation10 + $0x3c] ss:$24 sps:$4 sm:$0xff]   ;;  %v4050_v6 = vld [vmem:[#allocation10 + $0x30] ss:$24 sps:$4 sm:$0xff]   ;;  %v4054_v9 = vld [vmem:[#allocation10 + $0x6c] ss:$24 sps:$4 sm:$0xff]  }
  0xd5   : > { %1032 = vmatpush1.bf16.msra.mxu1 %v4045_v3  ;;  %992 = vmatprep.subr.bf16.mxu0 %v4046_v4  ;;  %v4051_v7 = vld [vmem:[#allocation10 + $0x38] ss:$24 sps:$4 sm:$0xff]   ;;  %v4052_v8 = vld [vmem:[#allocation10 + $0x64] ss:$24 sps:$4 sm:$0xff]   ;;  %v4057_v11 = vld [vmem:[#allocation10 + $0x68] ss:$24 sps:$4 sm:$0xff]  }
  0xd6   : > { %1033 = vmatprep.subr.bf16.mxu1 %v4048_v5  ;;  %v4056_v10 = vld [vmem:[#allocation10 + $0x60] ss:$24 sps:$4 sm:$0xff]   ;;  %v4058_v12 = vld [vmem:[#allocation10 + $0x94] ss:$24 sps:$4 sm:$0xff]   ;;  %v4062_v14 = vld [vmem:[#allocation10 + $0x90] ss:$24 sps:$4 sm:$0xff]  }
  0xd7   : > { %v4060_v13 = vld [vmem:[#allocation10 + $0x9c] ss:$24 sps:$4 sm:$0xff]   ;;  %v4063_v15 = vld [vmem:[#allocation10 + $0x98] ss:$24 sps:$4 sm:$0xff]   ;;  %v4066_v17 = vld [vmem:[#allocation10 + $0xcc] ss:$24 sps:$4 sm:$0xff]  }
  0xd8   : > { %993 = vmatpush1.bf16.msra.mxu0 %v4050_v6  ;;  %v4064_v16 = vld [vmem:[#allocation10 + $0xc4] ss:$24 sps:$4 sm:$0xff]   ;;  %v4068_v18 = vld [vmem:[#allocation10 + $0xc0] ss:$24 sps:$4 sm:$0xff]   ;;  %v4070_v20 = vld [vmem:[#allocation10 + $0xf4] ss:$24 sps:$4 sm:$0xff]  }
  0xd9   : > { %1034 = vmatpush1.bf16.msra.mxu1 %v4051_v7  ;;  %994 = vmatprep.subr.bf16.mxu0 %v4052_v8  ;;  %v4069_v19 = vld [vmem:[#allocation10 + $0xc8] ss:$24 sps:$4 sm:$0xff]   ;;  %v4072_v21 = vld [vmem:[#allocation10 + $0xfc] ss:$24 sps:$4 sm:$0xff]   ;;  %v4075_v23 = vld [vmem:[#allocation10 + $0xf8] ss:$24 sps:$4 sm:$0xff]  }
  0xda   : > { %1035 = vmatprep.subr.bf16.mxu1 %v4054_v9  ;;  %v4074_v22 = vld [vmem:[#allocation10 + $0xf0] ss:$24 sps:$4 sm:$0xff]   ;;  %v4076_v24 = vld [vmem:[#allocation10 + $0x124] ss:$24 sps:$4 sm:$0xff]   ;;  %v4080_v26 = vld [vmem:[#allocation10 + $0x120] ss:$24 sps:$4 sm:$0xff]  }
  0xdb   : > { %v4078_v25 = vld [vmem:[#allocation10 + $0x12c] ss:$24 sps:$4 sm:$0xff]   ;;  %v4081_v27 = vld [vmem:[#allocation10 + $0x128] ss:$24 sps:$4 sm:$0xff]   ;;  %v4084_v29 = vld [vmem:[#allocation10 + $0x15c] ss:$24 sps:$4 sm:$0xff]  }
  0xdc   : > { %995 = vmatpush1.bf16.msra.mxu0 %v4056_v10  ;;  %v4082_v28 = vld [vmem:[#allocation10 + $0x154] ss:$24 sps:$4 sm:$0xff]   ;;  %v4086_v30 = vld [vmem:[#allocation10 + $0x150] ss:$24 sps:$4 sm:$0xff]   ;;  %v4088_v32 = vld [vmem:[#allocation10 + $0x184] ss:$24 sps:$4 sm:$0xff]  }
  0xdd   : > { %1036 = vmatpush1.bf16.msra.mxu1 %v4057_v11  ;;  %996 = vmatprep.subr.bf16.mxu0 %v4058_v12  ;;  %v4087_v31 = vld [vmem:[#allocation10 + $0x158] ss:$24 sps:$4 sm:$0xff]   ;;  %v4090_v33 = vld [vmem:[#allocation10 + $0x18c] ss:$24 sps:$4 sm:$0xff]   ;;  %v4093_v35 = vld [vmem:[#allocation10 + $0x188] ss:$24 sps:$4 sm:$0xff]  }
  0xde   : > { %1037 = vmatprep.subr.bf16.mxu1 %v4060_v13  ;;  %v4092_v34 = vld [vmem:[#allocation10 + $0x180] ss:$24 sps:$4 sm:$0xff]   ;;  %v4094_v36 = vld [vmem:[#allocation10 + $0x1b4] ss:$24 sps:$4 sm:$0xff]   ;;  %v4098_v38 = vld [vmem:[#allocation10 + $0x1b0] ss:$24 sps:$4 sm:$0xff]  }
  0xdf   : > { %v4096_v37 = vld [vmem:[#allocation10 + $0x1bc] ss:$24 sps:$4 sm:$0xff]   ;;  %v4099_v39 = vld [vmem:[#allocation10 + $0x1b8] ss:$24 sps:$4 sm:$0xff]   ;;  %v4102_v41 = vld [vmem:[#allocation10 + $0x1ec] ss:$24 sps:$4 sm:$0xff]  }
  0xe0   : > { %997 = vmatpush1.bf16.msra.mxu0 %v4062_v14  ;;  %v4100_v40 = vld [vmem:[#allocation10 + $0x1e4] ss:$24 sps:$4 sm:$0xff]   ;;  %v4104_v42 = vld [vmem:[#allocation10 + $0x1e0] ss:$24 sps:$4 sm:$0xff]   ;;  %v4106_v44 = vld [vmem:[#allocation10 + $0x214] ss:$24 sps:$4 sm:$0xff]  }
  0xe1   : > { %1038 = vmatpush1.bf16.msra.mxu1 %v4063_v15  ;;  %998 = vmatprep.subr.bf16.mxu0 %v4064_v16  ;;  %v4105_v43 = vld [vmem:[#allocation10 + $0x1e8] ss:$24 sps:$4 sm:$0xff]   ;;  %v4108_v45 = vld [vmem:[#allocation10 + $0x21c] ss:$24 sps:$4 sm:$0xff]   ;;  %v4111_v49 = vld [vmem:[#allocation10 + $0x218] ss:$24 sps:$4 sm:$0xff]  }
  0xe2   : > { %1039 = vmatprep.subr.bf16.mxu1 %v4066_v17  ;;  %v406_v46 = vld [vmem:[%s5214_s3] sm:$0xff]  ;;  %v4114_v51 = vld [vmem:[#allocation10 + $0x24c] ss:$24 sps:$4 sm:$0xff]   ;;  %v4117_v53 = vld [vmem:[#allocation10 + $0x248] ss:$24 sps:$4 sm:$0xff]   ;;  %s3925_s27 = sshll.u32 %s4884_s24, 4 }
  0xe3   : > { %v4110_v47 = vld [vmem:[#allocation10 + $0x210] ss:$24 sps:$4 sm:$0xff]   ;;  %v3534_v48 = vcombine.high %v406_v46, %v406_v46  ;;  %v4112_v50 = vld [vmem:[#allocation10 + $0x244] ss:$24 sps:$4 sm:$0xff]   ;;  %v4116_v52 = vld [vmem:[#allocation10 + $0x240] ss:$24 sps:$4 sm:$0xff]   ;;  %v5225_v4 = vcombine.low %v406_v46, %v406_v46 }
  0xe4   : > { %999 = vmatpush1.bf16.msra.mxu0 %v4068_v18  ;;  %v4118_v54 = vld [vmem:[#allocation10 + $0x274] ss:$24 sps:$4 sm:$0xff]   ;;  %v4122_v56 = vld [vmem:[#allocation10 + $0x270] ss:$24 sps:$4 sm:$0xff]   ;;  %v4124_v58 = vld [vmem:[#allocation10 + $0x2a4] ss:$24 sps:$4 sm:$0xff]  }
  0xe5   : > { %1040 = vmatpush1.bf16.msra.mxu1 %v4069_v19  ;;  %1000 = vmatprep.subr.bf16.mxu0 %v4070_v20  ;;  %v4120_v55 = vld [vmem:[#allocation10 + $0x27c] ss:$24 sps:$4 sm:$0xff]   ;;  %v4123_v57 = vld [vmem:[#allocation10 + $0x278] ss:$24 sps:$4 sm:$0xff]   ;;  %v4126_v59 = vld [vmem:[#allocation10 + $0x2ac] ss:$24 sps:$4 sm:$0xff]  }
  0xe6   : > { %1041 = vmatprep.subr.bf16.mxu1 %v4072_v21  ;;  %1022 = vmatprep.mubr.bf16.mxu0 %v3534_v48  ;;  %v4128_v60 = vld [vmem:[#allocation10 + $0x2a0] ss:$24 sps:$4 sm:$0xff]   ;;  %v4130_v62 = vld [vmem:[#allocation10 + $0x2d4] ss:$24 sps:$4 sm:$0xff]   ;;  %v4134_v0 = vld [vmem:[#allocation10 + $0x2d0] ss:$24 sps:$4 sm:$0xff]  }
  0xe7   : > { %1063 = vmatprep.mubr.bf16.mxu1 %v3534_v48  ;;  %v4129_v61 = vld [vmem:[#allocation10 + $0x2a8] ss:$24 sps:$4 sm:$0xff]   ;;  %v4132_v63 = vld [vmem:[#allocation10 + $0x2dc] ss:$24 sps:$4 sm:$0xff]   ;;  %v4135_v1 = vld [vmem:[#allocation10 + $0x2d8] ss:$24 sps:$4 sm:$0xff]  }
  0xe8   : > { %1001 = vmatpush1.bf16.msra.mxu0 %v4074_v22  ;;  %v4140_v2 = vld [vmem:[#allocation10 + $0x14] ss:$24 sps:$4 sm:$0xff]   ;;  %v4143_v3 = vld [vmem:[#allocation8 + $0x4] ss:$24 sps:$4 sm:$0xff]   ;;  %v4138_v5 = vld [vmem:[#allocation10 + $0x10] ss:$24 sps:$4 sm:$0xff]  }
  0xe9   : > { %1042 = vmatpush1.bf16.msra.mxu1 %v4075_v23  ;;  %1002 = vmatprep.subr.bf16.mxu0 %v4076_v24  ;;  %v4141_v6 = vld [vmem:[#allocation8] ss:$24 sps:$4 sm:$0xff]   ;;  %v4146_v7 = vld [vmem:[#allocation10 + $0x44] ss:$24 sps:$4 sm:$0xff]   ;;  %v4149_v8 = vld [vmem:[#allocation8 + $0x34] ss:$24 sps:$4 sm:$0xff]  }
  0xea   : > { %1043 = vmatprep.subr.bf16.mxu1 %v4078_v25  ;;  %v4144_v9 = vld [vmem:[#allocation10 + $0x40] ss:$24 sps:$4 sm:$0xff]   ;;  %v4147_v10 = vld [vmem:[#allocation8 + $0x30] ss:$24 sps:$4 sm:$0xff]   ;;  %v4152_v11 = vld [vmem:[#allocation10 + $0x74] ss:$24 sps:$4 sm:$0xff]  }
  0xeb   : > { %v4155_v12 = vld [vmem:[#allocation8 + $0x64] ss:$24 sps:$4 sm:$0xff]   ;;  %v4150_v13 = vld [vmem:[#allocation10 + $0x70] ss:$24 sps:$4 sm:$0xff]   ;;  %v4153_v14 = vld [vmem:[#allocation8 + $0x60] ss:$24 sps:$4 sm:$0xff]  }
  0xec   : > { %1003 = vmatpush1.bf16.msra.mxu0 %v4080_v26  ;;  %v4158_v15 = vld [vmem:[#allocation10 + $0xa4] ss:$24 sps:$4 sm:$0xff]   ;;  %v4161_v16 = vld [vmem:[#allocation8 + $0x94] ss:$24 sps:$4 sm:$0xff]   ;;  %v4156_v17 = vld [vmem:[#allocation10 + $0xa0] ss:$24 sps:$4 sm:$0xff]  }
  0xed   : > { %1044 = vmatpush1.bf16.msra.mxu1 %v4081_v27  ;;  %1004 = vmatprep.subr.bf16.mxu0 %v4082_v28  ;;  %v4159_v18 = vld [vmem:[#allocation8 + $0x90] ss:$24 sps:$4 sm:$0xff]   ;;  %v4164_v19 = vld [vmem:[#allocation10 + $0xd4] ss:$24 sps:$4 sm:$0xff]   ;;  %v4167_v20 = vld [vmem:[#allocation8 + $0xc4] ss:$24 sps:$4 sm:$0xff]  }
  0xee   : > { %1045 = vmatprep.subr.bf16.mxu1 %v4084_v29  ;;  %v4162_v21 = vld [vmem:[#allocation10 + $0xd0] ss:$24 sps:$4 sm:$0xff]   ;;  %v4165_v22 = vld [vmem:[#allocation8 + $0xc0] ss:$24 sps:$4 sm:$0xff]   ;;  %v4170_v23 = vld [vmem:[#allocation10 + $0x104] ss:$24 sps:$4 sm:$0xff]  }
  0xef   : > { %v4173_v24 = vld [vmem:[#allocation8 + $0xf4] ss:$24 sps:$4 sm:$0xff]   ;;  %v4168_v25 = vld [vmem:[#allocation10 + $0x100] ss:$24 sps:$4 sm:$0xff]   ;;  %v4171_v26 = vld [vmem:[#allocation8 + $0xf0] ss:$24 sps:$4 sm:$0xff]  }
  0xf0   : > { %1005 = vmatpush1.bf16.msra.mxu0 %v4086_v30  ;;  %v4176_v27 = vld [vmem:[#allocation10 + $0x134] ss:$24 sps:$4 sm:$0xff]   ;;  %v4179_v28 = vld [vmem:[#allocation8 + $0x124] ss:$24 sps:$4 sm:$0xff]   ;;  %s403_s29 = scalar_lea.vmem [#allocation13], %s5195_s28  ;;  %vm3347_vm0 = vcmask 57344  }
  0xf1   : > { %1046 = vmatpush1.bf16.msra.mxu1 %v4087_v31  ;;  %1006 = vmatprep.subr.bf16.mxu0 %v4088_v32  ;;  %v5230_v29 = vld [vmem:[%s5207_s11] sm:$0xff]  ;;  %v4174_v31 = vld [vmem:[#allocation10 + $0x130] ss:$24 sps:$4 sm:$0xff]   ;;  %s3363_s21 = sshll.u32 %s403_s29, 4  ;;  %s5454_s19 = sld [smem:[#allocation27_spill]]  ;;  %s5346_s21 = int_to_ptr.vmem [resolvable:$true] %s3363_s21 }
  0xf2   : > { %1047 = vmatprep.subr.bf16.mxu1 %v4090_v33  ;;  %v5234_v30 = vcombine.high %v5230_v29, %v5230_v29  ;;  %v4177_v32 = vld [vmem:[#allocation8 + $0x120] ss:$24 sps:$4 sm:$0xff]   ;;  %v4182_v33 = vld [vmem:[#allocation10 + $0x164] ss:$24 sps:$4 sm:$0xff]   ;;  %s3350_s8 = scalar_lea.sflag [#allocation4], %s5195_s28  ;;  %s4798_s23 = scalar_lea.vmem %s5346_s21, 16 }
  0xf3   : > { %v4203_v46 = vld [vmem:[#allocation8 + $0x1e4] ss:$24 sps:$4 sm:$0xff]   ;;  %p4799_p1 = scmp.ne.s32.totalorder %s5346_s21, %s4798_s23  ;;  %p5455_p3 = scmp.ne.s32.totalorder %s5436_s15, 0 }
  0xf4   : > { %1007 = vmatpush1.bf16.msra.mxu0 %v4092_v34  ;;  %v4185_v34 = vld [vmem:[#allocation8 + $0x154] ss:$24 sps:$4 sm:$0xff]   ;;  %s4902_s24 = smov [#allocation13]  }
  0xf5   : > { %1048 = vmatpush1.bf16.msra.mxu1 %v4093_v35  ;;  %1008 = vmatprep.subr.bf16.mxu0 %v4094_v36  ;;  %v4180_v35 = vld [vmem:[#allocation10 + $0x160] ss:$24 sps:$4 sm:$0xff]   ;;  %v4183_v36 = vld [vmem:[#allocation8 + $0x150] ss:$24 sps:$4 sm:$0xff]   ;;  %p4800_p6 = pnand %p4799_p1, %p5455_p3  ;;  %s4802_s18 = sshll.u32 %s4902_s24, 4  ;;  %s4803_s18 = int_to_ptr.vmem [resolvable:$false] %s4802_s18 }
  0xf6   : > { %1049 = vmatprep.subr.bf16.mxu1 %v4096_v37  ;;  %v4188_v37 = vld [vmem:[#allocation10 + $0x194] ss:$24 sps:$4 sm:$0xff]   ;;  %s4804_s16 = scalar_lea.vmem %s4803_s18, 32  ;;  %p4805_p8 = scmp.lt.s32.totalorder %s5346_s21, %s4803_s18 }
  0xf7   : > { %s5344_s10 = scalar_lea.hbm %s5454_s19, %s3925_s27  ;;  %p4801_p11 = pneg %p4800_p6 }
  0xf8   : > { %1009 = vmatpush1.bf16.msra.mxu0 %v4098_v38  ;;  %v4191_v38 = vld [vmem:[#allocation8 + $0x184] ss:$24 sps:$4 sm:$0xff]   ;;  %p4806_p10 = scmp.lt.s32.totalorder %s4804_s16, %s4798_s23 }
  0xf9   : > { %1050 = vmatpush1.bf16.msra.mxu1 %v4099_v39  ;;  %1010 = vmatprep.subr.bf16.mxu0 %v4100_v40  ;;  %v4186_v39 = vld [vmem:[#allocation10 + $0x190] ss:$24 sps:$4 sm:$0xff]   ;;  %v4189_v40 = vld [vmem:[#allocation8 + $0x180] ss:$24 sps:$4 sm:$0xff]  }
  0xfa   : > { %1051 = vmatprep.subr.bf16.mxu1 %v4102_v41  ;;  %v4194_v41 = vld [vmem:[#allocation10 + $0x1c4] ss:$24 sps:$4 sm:$0xff]   ;;  %p4807_p0 = por %p4806_p10, %p4805_p8 }
  0xfc   : > { %1011 = vmatpush1.bf16.msra.mxu0 %v4104_v42  ;;  %v4197_v42 = vld [vmem:[#allocation8 + $0x1b4] ss:$24 sps:$4 sm:$0xff]   ;;  %p4808_p5 = pnand %p4807_p0, %p4801_p11 }
  0xfd   : > { %1052 = vmatpush1.bf16.msra.mxu1 %v4105_v43  ;;  %1012 = vmatprep.subr.bf16.mxu0 %v4106_v44  ;;  %v4192_v43 = vld [vmem:[#allocation10 + $0x1c0] ss:$24 sps:$4 sm:$0xff]   ;;  %v4195_v44 = vld [vmem:[#allocation8 + $0x1b0] ss:$24 sps:$4 sm:$0xff]  }
  0xfe   : > { %1053 = vmatprep.subr.bf16.mxu1 %v4108_v45  ;;  %v4200_v45 = vld [vmem:[#allocation10 + $0x1f4] ss:$24 sps:$4 sm:$0xff]  }
 0x100   : > { %1013 = vmatpush1.bf16.msra.mxu0 %v4110_v47  ;;  %v4198_v47 = vld [vmem:[#allocation10 + $0x1f0] ss:$24 sps:$4 sm:$0xff]  }
 0x101   : > { %1054 = vmatpush1.bf16.msra.mxu1 %v4111_v49  ;;  %1014 = vmatprep.subr.bf16.mxu0 %v4112_v50  ;;  %v4206_v49 = vld [vmem:[#allocation10 + $0x224] ss:$24 sps:$4 sm:$0xff]   ;;  %v4209_v50 = vld [vmem:[#allocation8 + $0x214] ss:$24 sps:$4 sm:$0xff]  }
 0x102   : > { %1055 = vmatprep.subr.bf16.mxu1 %v4114_v51  ;;  %v4204_v51 = vld [vmem:[#allocation10 + $0x220] ss:$24 sps:$4 sm:$0xff]  }
 0x104   : > { %1015 = vmatpush1.bf16.msra.mxu0 %v4116_v52  ;;  %v4207_v52 = vld [vmem:[#allocation8 + $0x210] ss:$24 sps:$4 sm:$0xff]  }
 0x105   : > { %1056 = vmatpush1.bf16.msra.mxu1 %v4117_v53  ;;  %1016 = vmatprep.subr.bf16.mxu0 %v4118_v54  ;;  %v4212_v53 = vld [vmem:[#allocation10 + $0x254] ss:$24 sps:$4 sm:$0xff]   ;;  %v4215_v54 = vld [vmem:[#allocation8 + $0x244] ss:$24 sps:$4 sm:$0xff]  }
 0x106   : > { %1057 = vmatprep.subr.bf16.mxu1 %v4120_v55  ;;  %v4210_v55 = vld [vmem:[#allocation10 + $0x250] ss:$24 sps:$4 sm:$0xff]  }
 0x108   : > { %1017 = vmatpush1.bf16.msra.mxu0 %v4122_v56  ;;  %v4213_v56 = vld [vmem:[#allocation8 + $0x240] ss:$24 sps:$4 sm:$0xff]  }
 0x109   : > { %1058 = vmatpush1.bf16.msra.mxu1 %v4123_v57  ;;  %1018 = vmatprep.subr.bf16.mxu0 %v4124_v58  ;;  %v4218_v57 = vld [vmem:[#allocation10 + $0x284] ss:$24 sps:$4 sm:$0xff]   ;;  %v4221_v58 = vld [vmem:[#allocation8 + $0x274] ss:$24 sps:$4 sm:$0xff]  }
 0x10a   : > { %1059 = vmatprep.subr.bf16.mxu1 %v4126_v59  ;;  %v4216_v59 = vld [vmem:[#allocation10 + $0x280] ss:$24 sps:$4 sm:$0xff]  }
 0x10c   : > { %1019 = vmatpush1.bf16.msra.mxu0 %v4128_v60  ;;  %v4219_v60 = vld [vmem:[#allocation8 + $0x270] ss:$24 sps:$4 sm:$0xff]  }
 0x10d   : > { %1060 = vmatpush1.bf16.msra.mxu1 %v4129_v61  ;;  %1020 = vmatprep.subr.bf16.mxu0 %v4130_v62  ;;  %v4224_v61 = vld [vmem:[#allocation10 + $0x2b4] ss:$24 sps:$4 sm:$0xff]   ;;  %v4227_v62 = vld [vmem:[#allocation8 + $0x2a4] ss:$24 sps:$4 sm:$0xff]  }
 0x10e   : > { %1061 = vmatprep.subr.bf16.mxu1 %v4132_v63  ;;  %v4222_v63 = vld [vmem:[#allocation10 + $0x2b0] ss:$24 sps:$4 sm:$0xff]  }
 0x110   : > { %1021 = vmatpush1.bf16.msra.mxu0 %v4134_v0  ;;  %v4225_v0 = vld [vmem:[#allocation8 + $0x2a0] ss:$24 sps:$4 sm:$0xff]  }
 0x111   : > { %1062 = vmatpush1.bf16.msra.mxu1 %v4135_v1  ;;  %1072 = vmatprep.subr.bf16.mxu0 %v4140_v2  ;;  %v4230_v1 = vld [vmem:[#allocation10 + $0x2e4] ss:$24 sps:$4 sm:$0xff]   ;;  %v4233_v2 = vld [vmem:[#allocation8 + $0x2d4] ss:$24 sps:$4 sm:$0xff]  }
 0x112   : > { %2865 = vmatprep.subr.bf16.mxu1 %v4143_v3  ;;  %v4228_v3 = vld [vmem:[#allocation10 + $0x2e0] ss:$24 sps:$4 sm:$0xff]  }
 0x113   : > { %1023 = vmatmul.mubr.bf16.vlgmr.msra.gmra.mrb[0].mxu0 %v5225_v4 }
 0x114   : > { %1064 = vmatmul.mubr.bf16.vlgmr.msra.gmra.mrb[0].mxu1 %v5225_v4  ;;  %1073 = vmatpush1.bf16.msra.mxu0 %v4138_v5  ;;  %v4231_v5 = vld [vmem:[#allocation8 + $0x2d0] ss:$24 sps:$4 sm:$0xff]  }
 0x115   : > { %2866 = vmatpush1.bf16.msra.mxu1 %v4141_v6  ;;  %1074 = vmatprep.subr.bf16.mxu0 %v4146_v7  ;;  %v4238_v6 = vld [vmem:[#allocation8 + $0x304] ss:$24 sps:$4 sm:$0xff]  }
 0x116   : > { %2867 = vmatprep.subr.bf16.mxu1 %v4149_v8  ;;  %1104 = vmatprep.mubr.bf16.mxu0 %v3534_v48  ;;  %v4201_v48 = vld [vmem:[#allocation8 + $0x1e0] ss:$24 sps:$4 sm:$0xff]   ;;  %v4241_v7 = vld [vmem:[#allocation8 + $0x604] ss:$24 sps:$4 sm:$0xff]  }
 0x117   : > { %2897 = vmatprep.mubr.bf16.mxu1 %v5234_v30  ;;  %v4236_v8 = vld [vmem:[#allocation8 + $0x300] ss:$24 sps:$4 sm:$0xff]  }
 0x118   : > { %1075 = vmatpush1.bf16.msra.mxu0 %v4144_v9  ;;  %v5239_v9 = vcombine.low %v5230_v29, %v5230_v29  ;;  %v4263_v29 = vld [vmem:[#allocation8 + $0x6c0] ss:$24 sps:$4 sm:$0xff]  }
 0x119   : > { %2868 = vmatpush1.bf16.msra.mxu1 %v4147_v10  ;;  %1076 = vmatprep.subr.bf16.mxu0 %v4152_v11  ;;  %v4239_v10 = vld [vmem:[#allocation8 + $0x600] ss:$24 sps:$4 sm:$0xff]   ;;  %v4244_v11 = vld [vmem:[#allocation8 + $0x334] ss:$24 sps:$4 sm:$0xff]  }
 0x11a   : > { %2869 = vmatprep.subr.bf16.mxu1 %v4155_v12  ;;  %v4247_v12 = vld [vmem:[#allocation8 + $0x634] ss:$24 sps:$4 sm:$0xff]  }
 0x11c   : > { %1077 = vmatpush1.bf16.msra.mxu0 %v4150_v13  ;;  %v5242_v13 = vld [vmem:[%s5207_s11 + $0x8] sm:$0xff] }
 0x11d   : > { %2870 = vmatpush1.bf16.msra.mxu1 %v4153_v14  ;;  %1078 = vmatprep.subr.bf16.mxu0 %v4158_v15  ;;  %v5245_v14 = vld [vmem:[%s5207_s11 + $0x10] sm:$0xff]  ;;  %v5249_v15 = vcombine.high %v5242_v13, %v5242_v13 }
 0x11e   : > { %2871 = vmatprep.subr.bf16.mxu1 %v4161_v16  ;;  %v5253_v16 = vcombine.high %v5245_v14, %v5245_v14 }
 0x120   : > { %1079 = vmatpush1.bf16.msra.mxu0 %v4156_v17  ;;  %v4242_v17 = vld [vmem:[#allocation8 + $0x330] ss:$24 sps:$4 sm:$0xff]  }
 0x121   : > { %2872 = vmatpush1.bf16.msra.mxu1 %v4159_v18  ;;  %1080 = vmatprep.subr.bf16.mxu0 %v4164_v19  ;;  %v4245_v18 = vld [vmem:[#allocation8 + $0x630] ss:$24 sps:$4 sm:$0xff]   ;;  %v4250_v19 = vld [vmem:[#allocation8 + $0x364] ss:$24 sps:$4 sm:$0xff]  }
 0x122   : > { %2873 = vmatprep.subr.bf16.mxu1 %v4167_v20  ;;  %v4253_v20 = vld [vmem:[#allocation8 + $0x664] ss:$24 sps:$4 sm:$0xff]  }
 0x124   : > { %1081 = vmatpush1.bf16.msra.mxu0 %v4162_v21  ;;  %v4248_v21 = vld [vmem:[#allocation8 + $0x360] ss:$24 sps:$4 sm:$0xff]  }
 0x125   : > { %2874 = vmatpush1.bf16.msra.mxu1 %v4165_v22  ;;  %1082 = vmatprep.subr.bf16.mxu0 %v4170_v23  ;;  %v4251_v22 = vld [vmem:[#allocation8 + $0x660] ss:$24 sps:$4 sm:$0xff]   ;;  %v4256_v23 = vld [vmem:[#allocation8 + $0x394] ss:$24 sps:$4 sm:$0xff]  }
 0x126   : > { %2875 = vmatprep.subr.bf16.mxu1 %v4173_v24  ;;  %v4254_v24 = vld [vmem:[#allocation8 + $0x390] ss:$24 sps:$4 sm:$0xff]  }
 0x128   : > { %1083 = vmatpush1.bf16.msra.mxu0 %v4168_v25  ;;  %v4257_v25 = vld [vmem:[#allocation8 + $0x690] ss:$24 sps:$4 sm:$0xff]  }
 0x129   : > { %2876 = vmatpush1.bf16.msra.mxu1 %v4171_v26  ;;  %1084 = vmatprep.subr.bf16.mxu0 %v4176_v27  ;;  %v4262_v26 = vld [vmem:[#allocation8 + $0x3c4] ss:$24 sps:$4 sm:$0xff]  }
 0x12a   : > { %2877 = vmatprep.subr.bf16.mxu1 %v4179_v28  ;;  %v4265_v27 = vld [vmem:[#allocation8 + $0x6c4] ss:$24 sps:$4 sm:$0xff]   ;;  %v4260_v28 = vld [vmem:[#allocation8 + $0x3c0] ss:$24 sps:$4 sm:$0xff]  }
 0x12c   : > { %1085 = vmatpush1.bf16.msra.mxu0 %v4174_v31  ;;  %v4268_v31 = vld [vmem:[#allocation8 + $0x3f4] ss:$24 sps:$4 sm:$0xff]  }
 0x12d   : > { %2878 = vmatpush1.bf16.msra.mxu1 %v4177_v32  ;;  %1086 = vmatprep.subr.bf16.mxu0 %v4182_v33  ;;  %v4271_v32 = vld [vmem:[#allocation8 + $0x6f4] ss:$24 sps:$4 sm:$0xff]   ;;  %v4266_v33 = vld [vmem:[#allocation8 + $0x3f0] ss:$24 sps:$4 sm:$0xff]  }
 0x12e   : > { %2879 = vmatprep.subr.bf16.mxu1 %v4185_v34  ;;  %v4269_v34 = vld [vmem:[#allocation8 + $0x6f0] ss:$24 sps:$4 sm:$0xff]  }
 0x130   : > { %1087 = vmatpush1.bf16.msra.mxu0 %v4180_v35  ;;  %v4274_v35 = vld [vmem:[#allocation8 + $0x424] ss:$24 sps:$4 sm:$0xff]  }
 0x131   : > { %2880 = vmatpush1.bf16.msra.mxu1 %v4183_v36  ;;  %1088 = vmatprep.subr.bf16.mxu0 %v4188_v37  ;;  %v4277_v36 = vld [vmem:[#allocation8 + $0x724] ss:$24 sps:$4 sm:$0xff]   ;;  %v4272_v37 = vld [vmem:[#allocation8 + $0x420] ss:$24 sps:$4 sm:$0xff]  }
 0x132   : > { %2881 = vmatprep.subr.bf16.mxu1 %v4191_v38  ;;  %v4275_v38 = vld [vmem:[#allocation8 + $0x720] ss:$24 sps:$4 sm:$0xff]  }
 0x134   : > { %1089 = vmatpush1.bf16.msra.mxu0 %v4186_v39  ;;  %v4280_v39 = vld [vmem:[#allocation8 + $0x454] ss:$24 sps:$4 sm:$0xff]  }
 0x135   : > { %2882 = vmatpush1.bf16.msra.mxu1 %v4189_v40  ;;  %1090 = vmatprep.subr.bf16.mxu0 %v4194_v41  ;;  %v4283_v40 = vld [vmem:[#allocation8 + $0x754] ss:$24 sps:$4 sm:$0xff]   ;;  %v4278_v41 = vld [vmem:[#allocation8 + $0x450] ss:$24 sps:$4 sm:$0xff]  }
 0x136   : > { %2883 = vmatprep.subr.bf16.mxu1 %v4197_v42  ;;  %v4281_v42 = vld [vmem:[#allocation8 + $0x750] ss:$24 sps:$4 sm:$0xff]  }
 0x138   : > { %1091 = vmatpush1.bf16.msra.mxu0 %v4192_v43  ;;  %v4286_v43 = vld [vmem:[#allocation8 + $0x484] ss:$24 sps:$4 sm:$0xff]  }
 0x139   : > { %2884 = vmatpush1.bf16.msra.mxu1 %v4195_v44  ;;  %1092 = vmatprep.subr.bf16.mxu0 %v4200_v45  ;;  %v4289_v44 = vld [vmem:[#allocation8 + $0x784] ss:$24 sps:$4 sm:$0xff]   ;;  %v4284_v45 = vld [vmem:[#allocation8 + $0x480] ss:$24 sps:$4 sm:$0xff]  }
 0x13a   : > { %2885 = vmatprep.subr.bf16.mxu1 %v4203_v46  ;;  %v4287_v46 = vld [vmem:[#allocation8 + $0x780] ss:$24 sps:$4 sm:$0xff]  }
 0x13c   : > { %1093 = vmatpush1.bf16.msra.mxu0 %v4198_v47  ;;  %v4292_v47 = vld [vmem:[#allocation8 + $0x4b4] ss:$24 sps:$4 sm:$0xff]  }
 0x13d   : > { %2886 = vmatpush1.bf16.msra.mxu1 %v4201_v48  ;;  %1094 = vmatprep.subr.bf16.mxu0 %v4206_v49  ;;  %v4295_v48 = vld [vmem:[#allocation8 + $0x7b4] ss:$24 sps:$4 sm:$0xff]   ;;  %v4290_v49 = vld [vmem:[#allocation8 + $0x4b0] ss:$24 sps:$4 sm:$0xff]  }
 0x13e   : > { %2887 = vmatprep.subr.bf16.mxu1 %v4209_v50  ;;  %v4293_v50 = vld [vmem:[#allocation8 + $0x7b0] ss:$24 sps:$4 sm:$0xff]  }
 0x140   : > { %1095 = vmatpush1.bf16.msra.mxu0 %v4204_v51  ;;  %v4298_v51 = vld [vmem:[#allocation8 + $0x4e4] ss:$24 sps:$4 sm:$0xff]  }
 0x141   : > { %2888 = vmatpush1.bf16.msra.mxu1 %v4207_v52  ;;  %1096 = vmatprep.subr.bf16.mxu0 %v4212_v53  ;;  %v4301_v52 = vld [vmem:[#allocation8 + $0x7e4] ss:$24 sps:$4 sm:$0xff]   ;;  %v4296_v53 = vld [vmem:[#allocation8 + $0x4e0] ss:$24 sps:$4 sm:$0xff]  }
 0x142   : > { %2889 = vmatprep.subr.bf16.mxu1 %v4215_v54  ;;  %v4299_v54 = vld [vmem:[#allocation8 + $0x7e0] ss:$24 sps:$4 sm:$0xff]  }
 0x144   : > { %1097 = vmatpush1.bf16.msra.mxu0 %v4210_v55  ;;  %v4304_v55 = vld [vmem:[#allocation8 + $0x514] ss:$24 sps:$4 sm:$0xff]  }
 0x145   : > { %2890 = vmatpush1.bf16.msra.mxu1 %v4213_v56  ;;  %1098 = vmatprep.subr.bf16.mxu0 %v4218_v57  ;;  %v4307_v56 = vld [vmem:[#allocation8 + $0x814] ss:$24 sps:$4 sm:$0xff]   ;;  %v4302_v57 = vld [vmem:[#allocation8 + $0x510] ss:$24 sps:$4 sm:$0xff]  }
 0x146   : > { %2891 = vmatprep.subr.bf16.mxu1 %v4221_v58  ;;  %v4305_v58 = vld [vmem:[#allocation8 + $0x810] ss:$24 sps:$4 sm:$0xff]  }
 0x148   : > { %1099 = vmatpush1.bf16.msra.mxu0 %v4216_v59  ;;  %v4310_v59 = vld [vmem:[#allocation8 + $0x544] ss:$24 sps:$4 sm:$0xff]  }
 0x149   : > { %2892 = vmatpush1.bf16.msra.mxu1 %v4219_v60  ;;  %1100 = vmatprep.subr.bf16.mxu0 %v4224_v61  ;;  %v4313_v60 = vld [vmem:[#allocation8 + $0x844] ss:$24 sps:$4 sm:$0xff]   ;;  %v4308_v61 = vld [vmem:[#allocation8 + $0x540] ss:$24 sps:$4 sm:$0xff]  }
 0x14a   : > { %2893 = vmatprep.subr.bf16.mxu1 %v4227_v62  ;;  %v4311_v62 = vld [vmem:[#allocation8 + $0x840] ss:$24 sps:$4 sm:$0xff]  }
 0x14c   : > { %1101 = vmatpush1.bf16.msra.mxu0 %v4222_v63  ;;  %v4316_v63 = vld [vmem:[#allocation8 + $0x574] ss:$24 sps:$4 sm:$0xff]  }
 0x14d   : > { %2894 = vmatpush1.bf16.msra.mxu1 %v4225_v0  ;;  %1102 = vmatprep.subr.bf16.mxu0 %v4230_v1  ;;  %v4319_v0 = vld [vmem:[#allocation8 + $0x874] ss:$24 sps:$4 sm:$0xff]   ;;  %v4314_v1 = vld [vmem:[#allocation8 + $0x570] ss:$24 sps:$4 sm:$0xff]  }
 0x14e   : > { %2895 = vmatprep.subr.bf16.mxu1 %v4233_v2  ;;  %v4317_v2 = vld [vmem:[#allocation8 + $0x870] ss:$24 sps:$4 sm:$0xff]  }
 0x150   : > { %1103 = vmatpush1.bf16.msra.mxu0 %v4228_v3  ;;  %v4322_v3 = vld [vmem:[#allocation8 + $0x5a4] ss:$24 sps:$4 sm:$0xff]  }
 0x151   : > { %2896 = vmatpush1.bf16.msra.mxu1 %v4231_v5  ;;  %2906 = vmatprep.subr.bf16.mxu0 %v4238_v6  ;;  %v4325_v5 = vld [vmem:[#allocation8 + $0x8a4] ss:$24 sps:$4 sm:$0xff]   ;;  %v4320_v6 = vld [vmem:[#allocation8 + $0x5a0] ss:$24 sps:$4 sm:$0xff]  }
 0x152   : > { %2947 = vmatprep.subr.bf16.mxu1 %v4241_v7  ;;  %v4323_v7 = vld [vmem:[#allocation8 + $0x8a0] ss:$24 sps:$4 sm:$0xff]  }
 0x153   : > { %1105 = vmatmul.mubr.bf16.vlgmr.msra.gmra.mrb[4].mxu0 %v5225_v4  ;;  %v4259_v4 = vld [vmem:[#allocation8 + $0x694] ss:$24 sps:$4 sm:$0xff]  }
 0x154   : > { %2898 = vmatmul.mubr.bf16.vlgmr.msra.gmra.mrb[4].mxu1 %v5239_v9  ;;  %2907 = vmatpush1.bf16.msra.mxu0 %v4236_v8  ;;  %v4328_v8 = vld [vmem:[#allocation8 + $0x5d4] ss:$24 sps:$4 sm:$0xff]  }
 0x155   : > { %2948 = vmatpush1.bf16.msra.mxu1 %v4239_v10  ;;  %2908 = vmatprep.subr.bf16.mxu0 %v4244_v11  ;;  %v4331_v10 = vld [vmem:[#allocation8 + $0x8d4] ss:$24 sps:$4 sm:$0xff]   ;;  %v4326_v11 = vld [vmem:[#allocation8 + $0x5d0] ss:$24 sps:$4 sm:$0xff]  }
 0x156   : > { %2949 = vmatprep.subr.bf16.mxu1 %v4247_v12  ;;  %2938 = vmatprep.mubr.bf16.mxu0 %v5249_v15  ;;  %v4329_v12 = vld [vmem:[#allocation8 + $0x8d0] ss:$24 sps:$4 sm:$0xff]  }
 0x157   : > { %2979 = vmatprep.mubr.bf16.mxu1 %v5253_v16 }
 0x158   : > { %2909 = vmatpush1.bf16.msra.mxu0 %v4242_v17  ;;  %v4338_v17 = vld [vmem:[#allocation8 + $0xc] ss:$24 sps:$4 sm:$0xff]  }
 0x159   : > { %2950 = vmatpush1.bf16.msra.mxu1 %v4245_v18  ;;  %2910 = vmatprep.subr.bf16.mxu0 %v4250_v19  ;;  %v4341_v18 = vld [vmem:[#allocation8 + $0x30c] ss:$24 sps:$4 sm:$0xff]   ;;  %v5261_v19 = vcombine.low %v5242_v13, %v5242_v13  ;;  %v4342_v13 = vld [vmem:[#allocation8 + $0x38] ss:$24 sps:$4 sm:$0xff]  }
 0x15a   : > { %2951 = vmatprep.subr.bf16.mxu1 %v4253_v20  ;;  %v5265_v20 = vcombine.low %v5245_v14, %v5245_v14  ;;  %v4350_v14 = vld [vmem:[#allocation8 + $0x6c] ss:$24 sps:$4 sm:$0xff]  }
 0x15c   : > { %2911 = vmatpush1.bf16.msra.mxu0 %v4248_v21  ;;  %v4336_v21 = vld [vmem:[#allocation8 + $0x8] ss:$24 sps:$4 sm:$0xff]  }
 0x15d   : > { %2952 = vmatpush1.bf16.msra.mxu1 %v4251_v22  ;;  %2912 = vmatprep.subr.bf16.mxu0 %v4256_v23  ;;  %v4339_v22 = vld [vmem:[#allocation8 + $0x308] ss:$24 sps:$4 sm:$0xff]   ;;  %v4344_v23 = vld [vmem:[#allocation8 + $0x3c] ss:$24 sps:$4 sm:$0xff]  }
 0x15e   : > { %2953 = vmatprep.subr.bf16.mxu1 %v4259_v4  ;;  %v4347_v4 = vld [vmem:[#allocation8 + $0x33c] ss:$24 sps:$4 sm:$0xff]  }
 0x160   : > { %2913 = vmatpush1.bf16.msra.mxu0 %v4254_v24  ;;  %v4345_v24 = vld [vmem:[#allocation8 + $0x338] ss:$24 sps:$4 sm:$0xff]  }
 0x161   : > { %2954 = vmatpush1.bf16.msra.mxu1 %v4257_v25  ;;  %2914 = vmatprep.subr.bf16.mxu0 %v4262_v26  ;;  %v4353_v25 = vld [vmem:[#allocation8 + $0x36c] ss:$24 sps:$4 sm:$0xff]   ;;  %v4348_v26 = vld [vmem:[#allocation8 + $0x68] ss:$24 sps:$4 sm:$0xff]  }
 0x162   : > { %2955 = vmatprep.subr.bf16.mxu1 %v4265_v27  ;;  %v4351_v27 = vld [vmem:[#allocation8 + $0x368] ss:$24 sps:$4 sm:$0xff]  }
 0x164   : > { %2915 = vmatpush1.bf16.msra.mxu0 %v4260_v28  ;;  %v4356_v28 = vld [vmem:[#allocation8 + $0x9c] ss:$24 sps:$4 sm:$0xff]  }
 0x165   : > { %2956 = vmatpush1.bf16.msra.mxu1 %v4263_v29  ;;  %2916 = vmatprep.subr.bf16.mxu0 %v4268_v31  ;;  %v4359_v29 = vld [vmem:[#allocation8 + $0x39c] ss:$24 sps:$4 sm:$0xff]   ;;  %v4354_v31 = vld [vmem:[#allocation8 + $0x98] ss:$24 sps:$4 sm:$0xff]  }
 0x166   : > { %2957 = vmatprep.subr.bf16.mxu1 %v4271_v32  ;;  %v4357_v32 = vld [vmem:[#allocation8 + $0x398] ss:$24 sps:$4 sm:$0xff]  }
 0x168   : > { %2917 = vmatpush1.bf16.msra.mxu0 %v4266_v33  ;;  %v4362_v33 = vld [vmem:[#allocation8 + $0xcc] ss:$24 sps:$4 sm:$0xff]  }
 0x169   : > { %2958 = vmatpush1.bf16.msra.mxu1 %v4269_v34  ;;  %2918 = vmatprep.subr.bf16.mxu0 %v4274_v35  ;;  %v4365_v34 = vld [vmem:[#allocation8 + $0x3cc] ss:$24 sps:$4 sm:$0xff]   ;;  %v4360_v35 = vld [vmem:[#allocation8 + $0xc8] ss:$24 sps:$4 sm:$0xff]  }
 0x16a   : > { %2959 = vmatprep.subr.bf16.mxu1 %v4277_v36  ;;  %v4363_v36 = vld [vmem:[#allocation8 + $0x3c8] ss:$24 sps:$4 sm:$0xff]  }
 0x16c   : > { %2919 = vmatpush1.bf16.msra.mxu0 %v4272_v37  ;;  %v4368_v37 = vld [vmem:[#allocation8 + $0xfc] ss:$24 sps:$4 sm:$0xff]  }
 0x16d   : > { %2960 = vmatpush1.bf16.msra.mxu1 %v4275_v38  ;;  %2920 = vmatprep.subr.bf16.mxu0 %v4280_v39  ;;  %v4371_v38 = vld [vmem:[#allocation8 + $0x3fc] ss:$24 sps:$4 sm:$0xff]   ;;  %v4366_v39 = vld [vmem:[#allocation8 + $0xf8] ss:$24 sps:$4 sm:$0xff]  }
 0x16e   : > { %2961 = vmatprep.subr.bf16.mxu1 %v4283_v40  ;;  %v4369_v40 = vld [vmem:[#allocation8 + $0x3f8] ss:$24 sps:$4 sm:$0xff]  }
 0x170   : > { %2921 = vmatpush1.bf16.msra.mxu0 %v4278_v41  ;;  %v4374_v41 = vld [vmem:[#allocation8 + $0x12c] ss:$24 sps:$4 sm:$0xff]  }
 0x171   : > { %2962 = vmatpush1.bf16.msra.mxu1 %v4281_v42  ;;  %2922 = vmatprep.subr.bf16.mxu0 %v4286_v43  ;;  %v4377_v42 = vld [vmem:[#allocation8 + $0x42c] ss:$24 sps:$4 sm:$0xff]   ;;  %v4372_v43 = vld [vmem:[#allocation8 + $0x128] ss:$24 sps:$4 sm:$0xff]  }
 0x172   : > { %2963 = vmatprep.subr.bf16.mxu1 %v4289_v44  ;;  %v4375_v44 = vld [vmem:[#allocation8 + $0x428] ss:$24 sps:$4 sm:$0xff]  }
 0x174   : > { %2923 = vmatpush1.bf16.msra.mxu0 %v4284_v45  ;;  %v4380_v45 = vld [vmem:[#allocation8 + $0x15c] ss:$24 sps:$4 sm:$0xff]  }
 0x175   : > { %2964 = vmatpush1.bf16.msra.mxu1 %v4287_v46  ;;  %2924 = vmatprep.subr.bf16.mxu0 %v4292_v47  ;;  %v4383_v46 = vld [vmem:[#allocation8 + $0x45c] ss:$24 sps:$4 sm:$0xff]   ;;  %v4378_v47 = vld [vmem:[#allocation8 + $0x158] ss:$24 sps:$4 sm:$0xff]  }
 0x176   : > { %2965 = vmatprep.subr.bf16.mxu1 %v4295_v48  ;;  %v4381_v48 = vld [vmem:[#allocation8 + $0x458] ss:$24 sps:$4 sm:$0xff]  }
 0x178   : > { %2925 = vmatpush1.bf16.msra.mxu0 %v4290_v49  ;;  %v4386_v49 = vld [vmem:[#allocation8 + $0x18c] ss:$24 sps:$4 sm:$0xff]  }
 0x179   : > { %2966 = vmatpush1.bf16.msra.mxu1 %v4293_v50  ;;  %2926 = vmatprep.subr.bf16.mxu0 %v4298_v51  ;;  %v4389_v50 = vld [vmem:[#allocation8 + $0x48c] ss:$24 sps:$4 sm:$0xff]   ;;  %v4384_v51 = vld [vmem:[#allocation8 + $0x188] ss:$24 sps:$4 sm:$0xff]  }
 0x17a   : > { %2967 = vmatprep.subr.bf16.mxu1 %v4301_v52  ;;  %v4387_v52 = vld [vmem:[#allocation8 + $0x488] ss:$24 sps:$4 sm:$0xff]  }
 0x17c   : > { %2927 = vmatpush1.bf16.msra.mxu0 %v4296_v53  ;;  %v4392_v53 = vld [vmem:[#allocation8 + $0x1bc] ss:$24 sps:$4 sm:$0xff]  }
 0x17d   : > { %2968 = vmatpush1.bf16.msra.mxu1 %v4299_v54  ;;  %2928 = vmatprep.subr.bf16.mxu0 %v4304_v55  ;;  %v4395_v54 = vld [vmem:[#allocation8 + $0x4bc] ss:$24 sps:$4 sm:$0xff]   ;;  %v4390_v55 = vld [vmem:[#allocation8 + $0x1b8] ss:$24 sps:$4 sm:$0xff]  }
 0x17e   : > { %2969 = vmatprep.subr.bf16.mxu1 %v4307_v56  ;;  %v4393_v56 = vld [vmem:[#allocation8 + $0x4b8] ss:$24 sps:$4 sm:$0xff]  }
 0x180   : > { %2929 = vmatpush1.bf16.msra.mxu0 %v4302_v57  ;;  %v4398_v57 = vld [vmem:[#allocation8 + $0x1ec] ss:$24 sps:$4 sm:$0xff]  }
 0x181   : > { %2970 = vmatpush1.bf16.msra.mxu1 %v4305_v58  ;;  %2930 = vmatprep.subr.bf16.mxu0 %v4310_v59  ;;  %v4401_v58 = vld [vmem:[#allocation8 + $0x4ec] ss:$24 sps:$4 sm:$0xff]   ;;  %v4396_v59 = vld [vmem:[#allocation8 + $0x1e8] ss:$24 sps:$4 sm:$0xff]  }
 0x182   : > { %2971 = vmatprep.subr.bf16.mxu1 %v4313_v60  ;;  %v4399_v60 = vld [vmem:[#allocation8 + $0x4e8] ss:$24 sps:$4 sm:$0xff]  }
 0x184   : > { %2931 = vmatpush1.bf16.msra.mxu0 %v4308_v61  ;;  %v4404_v61 = vld [vmem:[#allocation8 + $0x21c] ss:$24 sps:$4 sm:$0xff]  }
 0x185   : > { %2972 = vmatpush1.bf16.msra.mxu1 %v4311_v62  ;;  %2932 = vmatprep.subr.bf16.mxu0 %v4316_v63  ;;  %v4407_v62 = vld [vmem:[#allocation8 + $0x51c] ss:$24 sps:$4 sm:$0xff]   ;;  %v4402_v63 = vld [vmem:[#allocation8 + $0x218] ss:$24 sps:$4 sm:$0xff]  }
 0x186   : > { %2973 = vmatprep.subr.bf16.mxu1 %v4319_v0  ;;  %v4405_v0 = vld [vmem:[#allocation8 + $0x518] ss:$24 sps:$4 sm:$0xff]  }
 0x188   : > { %2933 = vmatpush1.bf16.msra.mxu0 %v4314_v1  ;;  %v4410_v1 = vld [vmem:[#allocation8 + $0x24c] ss:$24 sps:$4 sm:$0xff]  }
 0x189   : > { %2974 = vmatpush1.bf16.msra.mxu1 %v4317_v2  ;;  %2934 = vmatprep.subr.bf16.mxu0 %v4322_v3  ;;  %v4413_v2 = vld [vmem:[#allocation8 + $0x54c] ss:$24 sps:$4 sm:$0xff]   ;;  %v4408_v3 = vld [vmem:[#allocation8 + $0x248] ss:$24 sps:$4 sm:$0xff]  }
 0x18a   : > { %2975 = vmatprep.subr.bf16.mxu1 %v4325_v5  ;;  %v4411_v5 = vld [vmem:[#allocation8 + $0x548] ss:$24 sps:$4 sm:$0xff]  }
 0x18c   : > { %2935 = vmatpush1.bf16.msra.mxu0 %v4320_v6  ;;  %v4416_v6 = vld [vmem:[#allocation8 + $0x27c] ss:$24 sps:$4 sm:$0xff]  }
 0x18d   : > { %2976 = vmatpush1.bf16.msra.mxu1 %v4323_v7  ;;  %2936 = vmatprep.subr.bf16.mxu0 %v4328_v8  ;;  %v4419_v7 = vld [vmem:[#allocation8 + $0x57c] ss:$24 sps:$4 sm:$0xff]   ;;  %v4414_v8 = vld [vmem:[#allocation8 + $0x278] ss:$24 sps:$4 sm:$0xff]  }
 0x18e   : > { %2977 = vmatprep.subr.bf16.mxu1 %v4331_v10  ;;  %v4417_v10 = vld [vmem:[#allocation8 + $0x578] ss:$24 sps:$4 sm:$0xff]  }
 0x190   : > { %2937 = vmatpush1.bf16.msra.mxu0 %v4326_v11  ;;  %v4422_v11 = vld [vmem:[#allocation8 + $0x2ac] ss:$24 sps:$4 sm:$0xff]  }
 0x191   : > { %2978 = vmatpush1.bf16.msra.mxu1 %v4329_v12  ;;  %2988 = vmatprep.subr.bf16.mxu0 %v4338_v17  ;;  %v4425_v12 = vld [vmem:[#allocation8 + $0x5ac] ss:$24 sps:$4 sm:$0xff]   ;;  %v4420_v17 = vld [vmem:[#allocation8 + $0x2a8] ss:$24 sps:$4 sm:$0xff]  }
 0x192   : > { %3029 = vmatprep.subr.bf16.mxu1 %v4341_v18  ;;  %v4423_v18 = vld [vmem:[#allocation8 + $0x5a8] ss:$24 sps:$4 sm:$0xff]  }
 0x193   : > { %2939 = vmatmul.mubr.bf16.vlgmr.msra.gmra.mrb[8].mxu0 %v5261_v19 }
 0x194   : > { %2980 = vmatmul.mubr.bf16.vlgmr.msra.gmra.mrb[8].mxu1 %v5265_v20  ;;  %2989 = vmatpush1.bf16.msra.mxu0 %v4336_v21  ;;  %v4428_v21 = vld [vmem:[#allocation8 + $0x2dc] ss:$24 sps:$4 sm:$0xff]  }
 0x195   : > { %3030 = vmatpush1.bf16.msra.mxu1 %v4339_v22  ;;  %2990 = vmatprep.subr.bf16.mxu0 %v4344_v23  ;;  %v4431_v22 = vld [vmem:[#allocation8 + $0x5dc] ss:$24 sps:$4 sm:$0xff]   ;;  %v4426_v23 = vld [vmem:[#allocation8 + $0x2d8] ss:$24 sps:$4 sm:$0xff]  }
 0x196   : > { %3031 = vmatprep.subr.bf16.mxu1 %v4347_v4  ;;  %3020 = vmatprep.mubr.bf16.mxu0 %v5234_v30  ;;  %v4429_v4 = vld [vmem:[#allocation8 + $0x5d8] ss:$24 sps:$4 sm:$0xff]  }
 0x197   : > { %3061 = vmatprep.mubr.bf16.mxu1 %v5249_v15 }
 0x198   : > { %2991 = vmatpush1.bf16.msra.mxu0 %v4342_v13  ;;  %v4434_v13 = vld [vmem:[#allocation8 + $0x60c] ss:$24 sps:$4 sm:$0xff]  }
 0x199   : > { %3032 = vmatpush1.bf16.msra.mxu1 %v4345_v24  ;;  %2992 = vmatprep.subr.bf16.mxu0 %v4350_v14  ;;  %v4437_v24 = vld [vmem:[#allocation8 + $0x14] ss:$24 sps:$4 sm:$0xff]   ;;  %v4432_v14 = vld [vmem:[#allocation8 + $0x608] ss:$24 sps:$4 sm:$0xff]  }
 0x19a   : > { %3033 = vmatprep.subr.bf16.mxu1 %v4353_v25  ;;  %v4435_v25 = vld [vmem:[#allocation8 + $0x10] ss:$24 sps:$4 sm:$0xff]  }
 0x19c   : > { %2993 = vmatpush1.bf16.msra.mxu0 %v4348_v26  ;;  %v4440_v26 = vld [vmem:[#allocation8 + $0x63c] ss:$24 sps:$4 sm:$0xff]  }
 0x19d   : > { %3034 = vmatpush1.bf16.msra.mxu1 %v4351_v27  ;;  %2994 = vmatprep.subr.bf16.mxu0 %v4356_v28  ;;  %v4443_v27 = vld [vmem:[#allocation8 + $0x44] ss:$24 sps:$4 sm:$0xff]   ;;  %v4438_v28 = vld [vmem:[#allocation8 + $0x638] ss:$24 sps:$4 sm:$0xff]  }
 0x19e   : > { %3035 = vmatprep.subr.bf16.mxu1 %v4359_v29  ;;  %v4441_v29 = vld [vmem:[#allocation8 + $0x40] ss:$24 sps:$4 sm:$0xff]  }
 0x1a0   : > { %2995 = vmatpush1.bf16.msra.mxu0 %v4354_v31  ;;  %v4446_v31 = vld [vmem:[#allocation8 + $0x66c] ss:$24 sps:$4 sm:$0xff]  }
 0x1a1   : > { %3036 = vmatpush1.bf16.msra.mxu1 %v4357_v32  ;;  %2996 = vmatprep.subr.bf16.mxu0 %v4362_v33  ;;  %v4449_v32 = vld [vmem:[#allocation8 + $0x74] ss:$24 sps:$4 sm:$0xff]   ;;  %v4444_v33 = vld [vmem:[#allocation8 + $0x668] ss:$24 sps:$4 sm:$0xff]  }
 0x1a2   : > { %3037 = vmatprep.subr.bf16.mxu1 %v4365_v34  ;;  %v4447_v34 = vld [vmem:[#allocation8 + $0x70] ss:$24 sps:$4 sm:$0xff]  }
 0x1a4   : > { %2997 = vmatpush1.bf16.msra.mxu0 %v4360_v35  ;;  %v4452_v35 = vld [vmem:[#allocation8 + $0x69c] ss:$24 sps:$4 sm:$0xff]  }
 0x1a5   : > { %3038 = vmatpush1.bf16.msra.mxu1 %v4363_v36  ;;  %2998 = vmatprep.subr.bf16.mxu0 %v4368_v37  ;;  %v4455_v36 = vld [vmem:[#allocation8 + $0xa4] ss:$24 sps:$4 sm:$0xff]   ;;  %v4450_v37 = vld [vmem:[#allocation8 + $0x698] ss:$24 sps:$4 sm:$0xff]  }
 0x1a6   : > { %3039 = vmatprep.subr.bf16.mxu1 %v4371_v38  ;;  %v4453_v38 = vld [vmem:[#allocation8 + $0xa0] ss:$24 sps:$4 sm:$0xff]  }
 0x1a8   : > { %2999 = vmatpush1.bf16.msra.mxu0 %v4366_v39  ;;  %v4458_v39 = vld [vmem:[#allocation8 + $0x6cc] ss:$24 sps:$4 sm:$0xff]  }
 0x1a9   : > { %3040 = vmatpush1.bf16.msra.mxu1 %v4369_v40  ;;  %3000 = vmatprep.subr.bf16.mxu0 %v4374_v41  ;;  %v4461_v40 = vld [vmem:[#allocation8 + $0xd4] ss:$24 sps:$4 sm:$0xff]   ;;  %v4456_v41 = vld [vmem:[#allocation8 + $0x6c8] ss:$24 sps:$4 sm:$0xff]  }
 0x1aa   : > { %3041 = vmatprep.subr.bf16.mxu1 %v4377_v42  ;;  %v4464_v42 = vld [vmem:[#allocation8 + $0x6fc] ss:$24 sps:$4 sm:$0xff]  }
 0x1ac   : > { %3001 = vmatpush1.bf16.msra.mxu0 %v4372_v43  ;;  %v4467_v43 = vld [vmem:[#allocation8 + $0x104] ss:$24 sps:$4 sm:$0xff]  }
 0x1ad   : > { %3042 = vmatpush1.bf16.msra.mxu1 %v4375_v44  ;;  %3002 = vmatprep.subr.bf16.mxu0 %v4380_v45  ;;  %v4462_v44 = vld [vmem:[#allocation8 + $0x6f8] ss:$24 sps:$4 sm:$0xff]  }
 0x1ae   : > { %3043 = vmatprep.subr.bf16.mxu1 %v4383_v46  ;;  %v4465_v45 = vld [vmem:[#allocation8 + $0x100] ss:$24 sps:$4 sm:$0xff]   ;;  %v4470_v46 = vld [vmem:[#allocation8 + $0x72c] ss:$24 sps:$4 sm:$0xff]  }
 0x1b0   : > { %3003 = vmatpush1.bf16.msra.mxu0 %v4378_v47  ;;  %v4473_v47 = vld [vmem:[#allocation8 + $0x134] ss:$24 sps:$4 sm:$0xff]  }
 0x1b1   : > { %3044 = vmatpush1.bf16.msra.mxu1 %v4381_v48  ;;  %3004 = vmatprep.subr.bf16.mxu0 %v4386_v49 }
 0x1b2   : > { %3045 = vmatprep.subr.bf16.mxu1 %v4389_v50 }
 0x1b4   : > { %3005 = vmatpush1.bf16.msra.mxu0 %v4384_v51 }
 0x1b5   : > { %3046 = vmatpush1.bf16.msra.mxu1 %v4387_v52  ;;  %3006 = vmatprep.subr.bf16.mxu0 %v4392_v53 }
 0x1b6   : > { %3047 = vmatprep.subr.bf16.mxu1 %v4395_v54  ;;  %v4468_v54 = vld [vmem:[#allocation8 + $0x728] ss:$24 sps:$4 sm:$0xff]  }
 0x1b8   : > { %3007 = vmatpush1.bf16.msra.mxu0 %v4390_v55  ;;  %v4471_v55 = vld [vmem:[#allocation8 + $0x130] ss:$24 sps:$4 sm:$0xff]  }
 0x1b9   : > { %3048 = vmatpush1.bf16.msra.mxu1 %v4393_v56  ;;  %3008 = vmatprep.subr.bf16.mxu0 %v4398_v57 }
 0x1ba   : > { %3049 = vmatprep.subr.bf16.mxu1 %v4401_v58  ;;  %v4476_v58 = vld [vmem:[#allocation8 + $0x75c] ss:$24 sps:$4 sm:$0xff]  }
 0x1bc   : > { %3009 = vmatpush1.bf16.msra.mxu0 %v4396_v59  ;;  %v4479_v59 = vld [vmem:[#allocation8 + $0x164] ss:$24 sps:$4 sm:$0xff]  }
 0x1bd   : > { %3050 = vmatpush1.bf16.msra.mxu1 %v4399_v60  ;;  %3010 = vmatprep.subr.bf16.mxu0 %v4404_v61  ;;  %v4474_v60 = vld [vmem:[#allocation8 + $0x758] ss:$24 sps:$4 sm:$0xff]  }
 0x1be   : > { %3051 = vmatprep.subr.bf16.mxu1 %v4407_v62  ;;  %v4477_v61 = vld [vmem:[#allocation8 + $0x160] ss:$24 sps:$4 sm:$0xff]   ;;  %v4482_v62 = vld [vmem:[#allocation8 + $0x78c] ss:$24 sps:$4 sm:$0xff]  }
 0x1c0   : > { %3011 = vmatpush1.bf16.msra.mxu0 %v4402_v63  ;;  %v4485_v63 = vld [vmem:[#allocation8 + $0x194] ss:$24 sps:$4 sm:$0xff]  }
 0x1c1   : > { %3052 = vmatpush1.bf16.msra.mxu1 %v4405_v0  ;;  %3012 = vmatprep.subr.bf16.mxu0 %v4410_v1  ;;  %v4480_v0 = vld [vmem:[#allocation8 + $0x788] ss:$24 sps:$4 sm:$0xff]  }
 0x1c2   : > { %3053 = vmatprep.subr.bf16.mxu1 %v4413_v2  ;;  %v4483_v1 = vld [vmem:[#allocation8 + $0x190] ss:$24 sps:$4 sm:$0xff]   ;;  %v4488_v2 = vld [vmem:[#allocation8 + $0x7bc] ss:$24 sps:$4 sm:$0xff]  }
 0x1c4   : > { %3013 = vmatpush1.bf16.msra.mxu0 %v4408_v3  ;;  %v4491_v3 = vld [vmem:[#allocation8 + $0x1c4] ss:$24 sps:$4 sm:$0xff]  }
 0x1c5   : > { %3054 = vmatpush1.bf16.msra.mxu1 %v4411_v5  ;;  %3014 = vmatprep.subr.bf16.mxu0 %v4416_v6  ;;  %v4486_v5 = vld [vmem:[#allocation8 + $0x7b8] ss:$24 sps:$4 sm:$0xff]  }
 0x1c6   : > { %3055 = vmatprep.subr.bf16.mxu1 %v4419_v7  ;;  %v4489_v6 = vld [vmem:[#allocation8 + $0x1c0] ss:$24 sps:$4 sm:$0xff]   ;;  %v4494_v7 = vld [vmem:[#allocation8 + $0x7ec] ss:$24 sps:$4 sm:$0xff]  }
 0x1c8   : > { %3015 = vmatpush1.bf16.msra.mxu0 %v4414_v8  ;;  %v4497_v8 = vld [vmem:[#allocation8 + $0x1f4] ss:$24 sps:$4 sm:$0xff]  }
 0x1c9   : > { %3056 = vmatpush1.bf16.msra.mxu1 %v4417_v10  ;;  %3016 = vmatprep.subr.bf16.mxu0 %v4422_v11  ;;  %v4492_v10 = vld [vmem:[#allocation8 + $0x7e8] ss:$24 sps:$4 sm:$0xff]  }
 0x1ca   : > { %3057 = vmatprep.subr.bf16.mxu1 %v4425_v12  ;;  %v4495_v11 = vld [vmem:[#allocation8 + $0x1f0] ss:$24 sps:$4 sm:$0xff]   ;;  %v4500_v12 = vld [vmem:[#allocation8 + $0x81c] ss:$24 sps:$4 sm:$0xff]  }
 0x1cc   : > { %3017 = vmatpush1.bf16.msra.mxu0 %v4420_v17  ;;  %v4503_v17 = vld [vmem:[#allocation8 + $0x224] ss:$24 sps:$4 sm:$0xff]  }
 0x1cd   : > { %3058 = vmatpush1.bf16.msra.mxu1 %v4423_v18  ;;  %3018 = vmatprep.subr.bf16.mxu0 %v4428_v21  ;;  %v4498_v18 = vld [vmem:[#allocation8 + $0x818] ss:$24 sps:$4 sm:$0xff]  }
 0x1ce   : > { %3059 = vmatprep.subr.bf16.mxu1 %v4431_v22  ;;  %v4501_v21 = vld [vmem:[#allocation8 + $0x220] ss:$24 sps:$4 sm:$0xff]   ;;  %v4506_v22 = vld [vmem:[#allocation8 + $0x84c] ss:$24 sps:$4 sm:$0xff]  }
 0x1d0   : > { %3019 = vmatpush1.bf16.msra.mxu0 %v4426_v23  ;;  %v4509_v23 = vld [vmem:[#allocation8 + $0x254] ss:$24 sps:$4 sm:$0xff]  }
 0x1d1   : > { %3060 = vmatpush1.bf16.msra.mxu1 %v4429_v4  ;;  %3070 = vmatprep.subr.bf16.mxu0 %v4434_v13  ;;  %v4504_v4 = vld [vmem:[#allocation8 + $0x848] ss:$24 sps:$4 sm:$0xff]  }
 0x1d2   : > { %3111 = vmatprep.subr.bf16.mxu1 %v4437_v24  ;;  %v4507_v13 = vld [vmem:[#allocation8 + $0x250] ss:$24 sps:$4 sm:$0xff]   ;;  %v4512_v24 = vld [vmem:[#allocation8 + $0x87c] ss:$24 sps:$4 sm:$0xff]  }
 0x1d3   : > { %3021 = vmatmul.mubr.bf16.vlgmr.msra.gmra.mrb[12].mxu0 %v5239_v9 }
 0x1d4   : > { %3062 = vmatmul.mubr.bf16.vlgmr.msra.gmra.mrb[12].mxu1 %v5261_v19  ;;  %3071 = vmatpush1.bf16.msra.mxu0 %v4432_v14  ;;  %v4515_v14 = vld [vmem:[#allocation8 + $0x284] ss:$24 sps:$4 sm:$0xff]  }
 0x1d5   : > { %3112 = vmatpush1.bf16.msra.mxu1 %v4435_v25  ;;  %3072 = vmatprep.subr.bf16.mxu0 %v4440_v26  ;;  %v4510_v25 = vld [vmem:[#allocation8 + $0x878] ss:$24 sps:$4 sm:$0xff]  }
 0x1d6   : > { %3113 = vmatprep.subr.bf16.mxu1 %v4443_v27  ;;  %3102 = vmatprep.mubr.bf16.mxu0 %v5253_v16  ;;  %v4513_v26 = vld [vmem:[#allocation8 + $0x280] ss:$24 sps:$4 sm:$0xff]   ;;  %v4518_v27 = vld [vmem:[#allocation8 + $0x8ac] ss:$24 sps:$4 sm:$0xff]  }
 0x1d7   : > { %3143 = vmatprep.mubr.bf16.mxu1 %v5234_v30  ;;  %v4459_v30 = vld [vmem:[#allocation8 + $0xd0] ss:$24 sps:$4 sm:$0xff]  }
 0x1d8   : > { %3073 = vmatpush1.bf16.msra.mxu0 %v4438_v28  ;;  %v4521_v28 = vld [vmem:[#allocation8 + $0x2b4] ss:$24 sps:$4 sm:$0xff]  }
 0x1d9   : > { %3114 = vmatpush1.bf16.msra.mxu1 %v4441_v29  ;;  %3074 = vmatprep.subr.bf16.mxu0 %v4446_v31  ;;  %v4516_v29 = vld [vmem:[#allocation8 + $0x8a8] ss:$24 sps:$4 sm:$0xff]  }
 0x1da   : > { %3115 = vmatprep.subr.bf16.mxu1 %v4449_v32  ;;  %v4519_v31 = vld [vmem:[#allocation8 + $0x2b0] ss:$24 sps:$4 sm:$0xff]   ;;  %v4524_v32 = vld [vmem:[#allocation8 + $0x8dc] ss:$24 sps:$4 sm:$0xff]  }
 0x1dc   : > { %3075 = vmatpush1.bf16.msra.mxu0 %v4444_v33  ;;  %v4527_v33 = vld [vmem:[#allocation8 + $0x2e4] ss:$24 sps:$4 sm:$0xff]  }
 0x1dd   : > { %3116 = vmatpush1.bf16.msra.mxu1 %v4447_v34  ;;  %3076 = vmatprep.subr.bf16.mxu0 %v4452_v35  ;;  %v4522_v34 = vld [vmem:[#allocation8 + $0x8d8] ss:$24 sps:$4 sm:$0xff]  }
 0x1de   : > { %3117 = vmatprep.subr.bf16.mxu1 %v4455_v36  ;;  %v4525_v35 = vld [vmem:[#allocation8 + $0x2e0] ss:$24 sps:$4 sm:$0xff]   ;;  %v4530_v36 = vld [vmem:[#allocation8 + $0x314] ss:$24 sps:$4 sm:$0xff]  }
 0x1e0   : > { %3077 = vmatpush1.bf16.msra.mxu0 %v4450_v37  ;;  %v4533_v37 = vld [vmem:[#allocation8 + $0x614] ss:$24 sps:$4 sm:$0xff]  }
 0x1e1   : > { %3118 = vmatpush1.bf16.msra.mxu1 %v4453_v38  ;;  %3078 = vmatprep.subr.bf16.mxu0 %v4458_v39  ;;  %v4528_v38 = vld [vmem:[#allocation8 + $0x310] ss:$24 sps:$4 sm:$0xff]  }
 0x1e2   : > { %3119 = vmatprep.subr.bf16.mxu1 %v4461_v40  ;;  %v4531_v39 = vld [vmem:[#allocation8 + $0x610] ss:$24 sps:$4 sm:$0xff]   ;;  %v4536_v40 = vld [vmem:[#allocation8 + $0x344] ss:$24 sps:$4 sm:$0xff]  }
 0x1e4   : > { %3079 = vmatpush1.bf16.msra.mxu0 %v4456_v41  ;;  %v4539_v41 = vld [vmem:[#allocation8 + $0x644] ss:$24 sps:$4 sm:$0xff]  }
 0x1e5   : > { %3120 = vmatpush1.bf16.msra.mxu1 %v4459_v30  ;;  %3080 = vmatprep.subr.bf16.mxu0 %v4464_v42  ;;  %v4534_v30 = vld [vmem:[#allocation8 + $0x340] ss:$24 sps:$4 sm:$0xff]  }
 0x1e6   : > { %3121 = vmatprep.subr.bf16.mxu1 %v4467_v43  ;;  %v5275_v48 = vpop.f32.mrb[0].mxu0  ;;  %v4537_v42 = vld [vmem:[#allocation8 + $0x640] ss:$24 sps:$4 sm:$0xff]   ;;  %v4542_v43 = vld [vmem:[#allocation8 + $0x374] ss:$24 sps:$4 sm:$0xff]  }
 0x1e7   : > { %v5277_v49 = vpop.f32.mrb[0].mxu1  ;;  %v5279_v50 = vpop.f32.mrb[1].mxu0 }
 0x1e8   : > { %v5281_v51 = vpop.f32.mrb[1].mxu1  ;;  %v1028_v52 = vpop.f32.mrb[2].mxu0  ;;  %3081 = vmatpush1.bf16.msra.mxu0 %v4462_v44  ;;  %v4545_v44 = vld [vmem:[#allocation8 + $0x674] ss:$24 sps:$4 sm:$0xff]  }
 0x1e9   : > { %v1069_v53 = vpop.f32.mrb[2].mxu1  ;;  %3122 = vmatpush1.bf16.msra.mxu1 %v4465_v45  ;;  %v1029_v56 = vpop.f32.mrb[3].mxu0  ;;  %3082 = vmatprep.subr.bf16.mxu0 %v4470_v46  ;;  %v4540_v45 = vld [vmem:[#allocation8 + $0x370] ss:$24 sps:$4 sm:$0xff]   ;;  %v4546_v52 = vld [vmem:[#allocation8 + $0x3a0] ss:$24 sps:$4 sm:$0xff]  }
 0x1ea   : > { %v1070_v57 = vpop.f32.mrb[3].mxu1  ;;  %3123 = vmatprep.subr.bf16.mxu1 %v4473_v47  ;;  %v4543_v46 = vld [vmem:[#allocation8 + $0x670] ss:$24 sps:$4 sm:$0xff]   ;;  %v4548_v47 = vld [vmem:[#allocation8 + $0x3a4] ss:$24 sps:$4 sm:$0xff]  }
 0x1eb   : > { %v4549_v53 = vld [vmem:[#allocation8 + $0x6a0] ss:$24 sps:$4 sm:$0xff]   ;;  %v4560_v56 = vld [vmem:[#allocation8 + $0x404] ss:$24 sps:$4 sm:$0xff]  }
 0x1ec   : > { %3083 = vmatpush1.bf16.msra.mxu0 %v4468_v54  ;;  %v4554_v54 = vld [vmem:[#allocation8 + $0x3d4] ss:$24 sps:$4 sm:$0xff]   ;;  %v4563_v57 = vld [vmem:[#allocation8 + $0x704] ss:$24 sps:$4 sm:$0xff]  }
 0x1ed   : > { %3124 = vmatpush1.bf16.msra.mxu1 %v4471_v55  ;;  %3084 = vmatprep.subr.bf16.mxu0 %v4476_v58  ;;  %v4557_v55 = vld [vmem:[#allocation8 + $0x6d4] ss:$24 sps:$4 sm:$0xff]   ;;  %v4558_v58 = vld [vmem:[#allocation8 + $0x400] ss:$24 sps:$4 sm:$0xff]  }
 0x1ee   : > { %3125 = vmatprep.subr.bf16.mxu1 %v4479_v59  ;;  %v4561_v59 = vld [vmem:[#allocation8 + $0x700] ss:$24 sps:$4 sm:$0xff]  }
 0x1f0   : > { %3085 = vmatpush1.bf16.msra.mxu0 %v4474_v60  ;;  %v4566_v60 = vld [vmem:[#allocation8 + $0x434] ss:$24 sps:$4 sm:$0xff]  }
 0x1f1   : > { %3126 = vmatpush1.bf16.msra.mxu1 %v4477_v61  ;;  %3086 = vmatprep.subr.bf16.mxu0 %v4482_v62  ;;  %v4569_v61 = vld [vmem:[#allocation8 + $0x734] ss:$24 sps:$4 sm:$0xff]  }
 0x1f2   : > { %3127 = vmatprep.subr.bf16.mxu1 %v4485_v63 }
 0x1f4   : > { %3087 = vmatpush1.bf16.msra.mxu0 %v4480_v0 }
 0x1f5   : > { %3128 = vmatpush1.bf16.msra.mxu1 %v4483_v1  ;;  %3088 = vmatprep.subr.bf16.mxu0 %v4488_v2 }
 0x1f6   : > { %3129 = vmatprep.subr.bf16.mxu1 %v4491_v3 }
 0x1f8   : > { %3089 = vmatpush1.bf16.msra.mxu0 %v4486_v5 }
 0x1f9   : > { %3130 = vmatpush1.bf16.msra.mxu1 %v4489_v6  ;;  %3090 = vmatprep.subr.bf16.mxu0 %v4494_v7  ;;  %v4564_v7 = vld [vmem:[#allocation8 + $0x430] ss:$24 sps:$4 sm:$0xff]  }
 0x1fa   : > { %3131 = vmatprep.subr.bf16.mxu1 %v4497_v8  ;;  %v4567_v8 = vld [vmem:[#allocation8 + $0x730] ss:$24 sps:$4 sm:$0xff]  }
 0x1fc   : > { %3091 = vmatpush1.bf16.msra.mxu0 %v4492_v10 }
 0x1fd   : > { %3132 = vmatpush1.bf16.msra.mxu1 %v4495_v11  ;;  %3092 = vmatprep.subr.bf16.mxu0 %v4500_v12  ;;  %v4572_v12 = vld [vmem:[#allocation8 + $0x464] ss:$24 sps:$4 sm:$0xff]  }
 0x1fe   : > { %3133 = vmatprep.subr.bf16.mxu1 %v4503_v17  ;;  %v4575_v17 = vld [vmem:[#allocation8 + $0x764] ss:$24 sps:$4 sm:$0xff]  }
 0x200   : > { %3093 = vmatpush1.bf16.msra.mxu0 %v4498_v18  ;;  %v4570_v18 = vld [vmem:[#allocation8 + $0x460] ss:$24 sps:$4 sm:$0xff]  }
 0x201   : > { %3134 = vmatpush1.bf16.msra.mxu1 %v4501_v21  ;;  %3094 = vmatprep.subr.bf16.mxu0 %v4506_v22  ;;  %v4573_v21 = vld [vmem:[#allocation8 + $0x760] ss:$24 sps:$4 sm:$0xff]   ;;  %v4578_v22 = vld [vmem:[#allocation8 + $0x494] ss:$24 sps:$4 sm:$0xff]  }
 0x202   : > { %3135 = vmatprep.subr.bf16.mxu1 %v4509_v23  ;;  %v4581_v23 = vld [vmem:[#allocation8 + $0x794] ss:$24 sps:$4 sm:$0xff]  }
 0x204   : > { %3095 = vmatpush1.bf16.msra.mxu0 %v4504_v4  ;;  %v4576_v4 = vld [vmem:[#allocation8 + $0x490] ss:$24 sps:$4 sm:$0xff]  }
 0x205   : > { %3136 = vmatpush1.bf16.msra.mxu1 %v4507_v13  ;;  %3096 = vmatprep.subr.bf16.mxu0 %v4512_v24  ;;  %v4579_v13 = vld [vmem:[#allocation8 + $0x790] ss:$24 sps:$4 sm:$0xff]   ;;  %v4584_v24 = vld [vmem:[#allocation8 + $0x4c4] ss:$24 sps:$4 sm:$0xff]  }
 0x206   : > { %3137 = vmatprep.subr.bf16.mxu1 %v4515_v14  ;;  %v4587_v14 = vld [vmem:[#allocation8 + $0x7c4] ss:$24 sps:$4 sm:$0xff]  }
 0x208   : > { %3097 = vmatpush1.bf16.msra.mxu0 %v4510_v25  ;;  %v4582_v25 = vld [vmem:[#allocation8 + $0x4c0] ss:$24 sps:$4 sm:$0xff]  }
 0x209   : > { %3138 = vmatpush1.bf16.msra.mxu1 %v4513_v26  ;;  %3098 = vmatprep.subr.bf16.mxu0 %v4518_v27  ;;  %v4585_v26 = vld [vmem:[#allocation8 + $0x7c0] ss:$24 sps:$4 sm:$0xff]   ;;  %v4590_v27 = vld [vmem:[#allocation8 + $0x4f4] ss:$24 sps:$4 sm:$0xff]  }
 0x20a   : > { %3139 = vmatprep.subr.bf16.mxu1 %v4521_v28  ;;  %v4593_v28 = vld [vmem:[#allocation8 + $0x7f4] ss:$24 sps:$4 sm:$0xff]  }
 0x20c   : > { %3099 = vmatpush1.bf16.msra.mxu0 %v4516_v29  ;;  %v4588_v29 = vld [vmem:[#allocation8 + $0x4f0] ss:$24 sps:$4 sm:$0xff]  }
 0x20d   : > { %3140 = vmatpush1.bf16.msra.mxu1 %v4519_v31  ;;  %3100 = vmatprep.subr.bf16.mxu0 %v4524_v32  ;;  %v4591_v31 = vld [vmem:[#allocation8 + $0x7f0] ss:$24 sps:$4 sm:$0xff]   ;;  %v4596_v32 = vld [vmem:[#allocation8 + $0x524] ss:$24 sps:$4 sm:$0xff]  }
 0x20e   : > { %3141 = vmatprep.subr.bf16.mxu1 %v4527_v33  ;;  %v4599_v33 = vld [vmem:[#allocation8 + $0x824] ss:$24 sps:$4 sm:$0xff]  }
 0x210   : > { %3101 = vmatpush1.bf16.msra.mxu0 %v4522_v34  ;;  %v4594_v34 = vld [vmem:[#allocation8 + $0x520] ss:$24 sps:$4 sm:$0xff]  }
 0x211   : > { %3142 = vmatpush1.bf16.msra.mxu1 %v4525_v35  ;;  %3152 = vmatprep.subr.bf16.mxu0 %v4530_v36  ;;  %v4597_v35 = vld [vmem:[#allocation8 + $0x820] ss:$24 sps:$4 sm:$0xff]   ;;  %v4602_v36 = vld [vmem:[#allocation8 + $0x554] ss:$24 sps:$4 sm:$0xff]  }
 0x212   : > { %3193 = vmatprep.subr.bf16.mxu1 %v4533_v37  ;;  %v4605_v37 = vld [vmem:[#allocation8 + $0x854] ss:$24 sps:$4 sm:$0xff]  }
 0x213   : > { %3103 = vmatmul.mubr.bf16.vlgmr.msra.gmra.mrb[16].mxu0 %v5265_v20 }
 0x214   : > { %3144 = vmatmul.mubr.bf16.vlgmr.msra.gmra.mrb[16].mxu1 %v5239_v9  ;;  %3153 = vmatpush1.bf16.msra.mxu0 %v4528_v38  ;;  %v4551_v9 = vld [vmem:[#allocation8 + $0x6a4] ss:$24 sps:$4 sm:$0xff]   ;;  %v4600_v38 = vld [vmem:[#allocation8 + $0x550] ss:$24 sps:$4 sm:$0xff]  }
 0x215   : > { %3194 = vmatpush1.bf16.msra.mxu1 %v4531_v39  ;;  %3154 = vmatprep.subr.bf16.mxu0 %v4536_v40  ;;  %v4603_v39 = vld [vmem:[#allocation8 + $0x850] ss:$24 sps:$4 sm:$0xff]   ;;  %v4608_v40 = vld [vmem:[#allocation8 + $0x584] ss:$24 sps:$4 sm:$0xff]  }
 0x216   : > { %3195 = vmatprep.subr.bf16.mxu1 %v4539_v41  ;;  %3184 = vmatprep.mubr.bf16.mxu0 %v5249_v15  ;;  %v4552_v15 = vld [vmem:[#allocation8 + $0x3d0] ss:$24 sps:$4 sm:$0xff]   ;;  %v4611_v41 = vld [vmem:[#allocation8 + $0x884] ss:$24 sps:$4 sm:$0xff]  }
 0x217   : > { %3225 = vmatprep.mubr.bf16.mxu1 %v5253_v16  ;;  %v4555_v16 = vld [vmem:[#allocation8 + $0x6d0] ss:$24 sps:$4 sm:$0xff]  }
 0x218   : > { %3155 = vmatpush1.bf16.msra.mxu0 %v4534_v30  ;;  %v4606_v30 = vld [vmem:[#allocation8 + $0x580] ss:$24 sps:$4 sm:$0xff]  }
 0x219   : > { %3196 = vmatpush1.bf16.msra.mxu1 %v4537_v42  ;;  %3156 = vmatprep.subr.bf16.mxu0 %v4542_v43  ;;  %v4609_v42 = vld [vmem:[#allocation8 + $0x880] ss:$24 sps:$4 sm:$0xff]   ;;  %v4614_v43 = vld [vmem:[#allocation8 + $0x5b4] ss:$24 sps:$4 sm:$0xff]  }
 0x21a   : > { %3197 = vmatprep.subr.bf16.mxu1 %v4545_v44  ;;  %v4617_v44 = vld [vmem:[#allocation8 + $0x8b4] ss:$24 sps:$4 sm:$0xff]  }
 0x21c   : > { %3157 = vmatpush1.bf16.msra.mxu0 %v4540_v45  ;;  %v4612_v45 = vld [vmem:[#allocation8 + $0x5b0] ss:$24 sps:$4 sm:$0xff]  }
 0x21d   : > { %3198 = vmatpush1.bf16.msra.mxu1 %v4543_v46  ;;  %3158 = vmatprep.subr.bf16.mxu0 %v4548_v47  ;;  %v4615_v46 = vld [vmem:[#allocation8 + $0x8b0] ss:$24 sps:$4 sm:$0xff]   ;;  %v4620_v47 = vld [vmem:[#allocation8 + $0x5e4] ss:$24 sps:$4 sm:$0xff]  }
 0x21e   : > { %3199 = vmatprep.subr.bf16.mxu1 %v4551_v9  ;;  %v4623_v9 = vld [vmem:[#allocation8 + $0x8e4] ss:$24 sps:$4 sm:$0xff]  }
 0x220   : > { %3159 = vmatpush1.bf16.msra.mxu0 %v4546_v52  ;;  %v4618_v52 = vld [vmem:[#allocation8 + $0x5e0] ss:$24 sps:$4 sm:$0xff]  }
 0x221   : > { %3200 = vmatpush1.bf16.msra.mxu1 %v4549_v53  ;;  %3160 = vmatprep.subr.bf16.mxu0 %v4554_v54  ;;  %v4621_v53 = vld [vmem:[#allocation8 + $0x8e0] ss:$24 sps:$4 sm:$0xff]   ;;  %v3235_v54 = vlaneseq }
 0x222   : > { %3201 = vmatprep.subr.bf16.mxu1 %v4557_v55 }
 0x223   : > { %v5300_v55 = vshrl.u32 %v3235_v54, 7 }
 0x224   : > { %3161 = vmatpush1.bf16.msra.mxu0 %v4552_v15 }
 0x225   : > { %3202 = vmatpush1.bf16.msra.mxu1 %v4555_v16  ;;  %3162 = vmatprep.subr.bf16.mxu0 %v4560_v56  ;;  %v3237_v15 = vsub.s32 0, %v5300_v55  ;;  %v5304_v16 = vld [vmem:[%s5199_s12] sm:$0x3f]  ;;  %v3241_v56 = vsub.s32 1, %v5300_v55 }
 0x226   : > { %3203 = vmatprep.subr.bf16.mxu1 %v4563_v57  ;;  %v5287_v62 = vpop.f32.mrb[4].mxu0 }
 0x227   : > { %v2899_v63 = vpop.f32.mrb[4].mxu1  ;;  %v5292_v1 = vpop.f32.mrb[5].mxu0  ;;  %v3281_v57 = vrot.slane %v5304_v16, %v3237_v15 }
 0x228   : > { %v5290_v0 = vadd.f32 %v2899_v63, %v5275_v48  ;;  %v2901_v2 = vpop.f32.mrb[5].mxu1  ;;  %v1110_v5 = vpop.f32.mrb[6].mxu0  ;;  %3163 = vmatpush1.bf16.msra.mxu0 %v4558_v58  ;;  %v5308_v58 = vld [vmem:[#allocation11] sm:$0x3f] }
 0x229   : > { %v5295_v3 = vadd.f32 %v2901_v2, %v5279_v50  ;;  %v2903_v6 = vpop.f32.mrb[6].mxu1  ;;  %3204 = vmatpush1.bf16.msra.mxu1 %v4561_v59  ;;  %v1111_v10 = vpop.f32.mrb[7].mxu0  ;;  %3164 = vmatprep.subr.bf16.mxu0 %v4566_v60  ;;  %v3285_v59 = vrot.slane %v5304_v16, %v3241_v56  ;;  %v3242_v60 = vrot.slane %v5308_v58, %v3241_v56 }
 0x22a   : > { %v2904_v11 = vpop.f32.mrb[7].mxu1  ;;  %3205 = vmatprep.subr.bf16.mxu1 %v4569_v61 }
 0x22b   : > { %v3309_v61 = vadd.f32 %v3285_v59, %v5279_v50 }
 0x22c   : > { %3165 = vmatpush1.bf16.msra.mxu0 %v4564_v7 }
 0x22d   : > { %3206 = vmatpush1.bf16.msra.mxu1 %v4567_v8  ;;  %3166 = vmatprep.subr.bf16.mxu0 %v4572_v12 }
 0x22e   : > { %3207 = vmatprep.subr.bf16.mxu1 %v4575_v17 }
 0x230   : > { %3167 = vmatpush1.bf16.msra.mxu0 %v4570_v18 }
 0x231   : > { %3208 = vmatpush1.bf16.msra.mxu1 %v4573_v21  ;;  %3168 = vmatprep.subr.bf16.mxu0 %v4578_v22  ;;  %v3315_v22 = vadd.f32 %v3309_v61, %v3242_v60 }
 0x232   : > { %3209 = vmatprep.subr.bf16.mxu1 %v4581_v23 }
 0x234   : > { %3169 = vmatpush1.bf16.msra.mxu0 %v4576_v4 }
 0x235   : > { %3210 = vmatpush1.bf16.msra.mxu1 %v4579_v13  ;;  %3170 = vmatprep.subr.bf16.mxu0 %v4584_v24  ;;  %v3321_v24 = vmax.f32 %v3315_v22, 0.0 }
 0x236   : > { %3211 = vmatprep.subr.bf16.mxu1 %v4587_v14 }
 0x238   : > { %3171 = vmatpush1.bf16.msra.mxu0 %v4582_v25 }
 0x239   : > { %3212 = vmatpush1.bf16.msra.mxu1 %v4585_v26  ;;  %3172 = vmatprep.subr.bf16.mxu0 %v4590_v27 }
 0x23a   : > { %3213 = vmatprep.subr.bf16.mxu1 %v4593_v28 }
 0x23c   : > { %3173 = vmatpush1.bf16.msra.mxu0 %v4588_v29 }
 0x23d   : > { %3214 = vmatpush1.bf16.msra.mxu1 %v4591_v31  ;;  %3174 = vmatprep.subr.bf16.mxu0 %v4596_v32 }
 0x23e   : > { %3215 = vmatprep.subr.bf16.mxu1 %v4599_v33 }
 0x240   : > { %3175 = vmatpush1.bf16.msra.mxu0 %v4594_v34 }
 0x241   : > { %3216 = vmatpush1.bf16.msra.mxu1 %v4597_v35  ;;  %3176 = vmatprep.subr.bf16.mxu0 %v4602_v36 }
 0x242   : > { %3217 = vmatprep.subr.bf16.mxu1 %v4605_v37 }
 0x244   : > { %3177 = vmatpush1.bf16.msra.mxu0 %v4600_v38 }
 0x245   : > { %3218 = vmatpush1.bf16.msra.mxu1 %v4603_v39  ;;  %3178 = vmatprep.subr.bf16.mxu0 %v4608_v40  ;;  %v3245_v39 = vsub.s32 2, %v5300_v55  ;;  %v3249_v40 = vsub.s32 3, %v5300_v55 }
 0x246   : > { %3219 = vmatprep.subr.bf16.mxu1 %v4611_v41 }
 0x247   : > { %v3289_v41 = vrot.slane %v5304_v16, %v3245_v39 }
 0x248   : > { %3179 = vmatpush1.bf16.msra.mxu0 %v4606_v30  ;;  %v3293_v30 = vrot.slane %v5304_v16, %v3249_v40 }
 0x249   : > { %3220 = vmatpush1.bf16.msra.mxu1 %v4609_v42  ;;  %3180 = vmatprep.subr.bf16.mxu0 %v4614_v43  ;;  %v3246_v42 = vrot.slane %v5308_v58, %v3245_v39  ;;  %v3310_v43 = vadd.f32 %v3289_v41, %v5277_v49  ;;  %v3341_v41 = vand.u32 127, %v3235_v54 }
 0x24a   : > { %3221 = vmatprep.subr.bf16.mxu1 %v4617_v44  ;;  %v3250_v44 = vrot.slane %v5308_v58, %v3249_v40 }
 0x24c   : > { %3181 = vmatpush1.bf16.msra.mxu0 %v4612_v45  ;;  %v3311_v45 = vadd.f32 %v3293_v30, %v5281_v51  ;;  %v3344_v30 = vsub.s32 %v3341_v41, %v5300_v55 }
 0x24d   : > { %3222 = vmatpush1.bf16.msra.mxu1 %v4615_v46  ;;  %3182 = vmatprep.subr.bf16.mxu0 %v4620_v47 }
 0x24e   : > { %3223 = vmatprep.subr.bf16.mxu1 %v4623_v9  ;;  %v3316_v9 = vadd.f32 %v3310_v43, %v3246_v42 }
 0x250   : > { %3183 = vmatpush1.bf16.msra.mxu0 %v4618_v52 }
 0x251   : > { %3224 = vmatpush1.bf16.msra.mxu1 %v4621_v53 }
 0x253   : > { %3185 = vmatmul.mubr.bf16.vlgmr.msra.gmra.mrb[20].mxu0 %v5261_v19  ;;  %v3238_v19 = vrot.slane %v5308_v58, %v3237_v15 }
 0x254   : > { %3226 = vmatmul.mubr.bf16.vlgmr.msra.gmra.mrb[20].mxu1 %v5265_v20  ;;  %v3308_v20 = vadd.f32 %v3281_v57, %v5275_v48  ;;  %v3317_v57 = vadd.f32 %v3311_v45, %v3250_v44 }
 0x256   : > { %v3314_v12 = vadd.f32 %v3308_v20, %v3238_v19 }
 0x258   : > { %v3320_v13 = vmax.f32 %v3314_v12, 0.0 }
 0x266   : > { %v2940_v63 = vpop.f32.mrb[8].mxu0 }
 0x267   : > { %v2981_v2 = vpop.f32.mrb[8].mxu1  ;;  %v2941_v5 = vadd.f32 %v2940_v63, %v5290_v0  ;;  %v2942_v6 = vpop.f32.mrb[9].mxu0 }
 0x268   : > { %v2983_v7 = vpop.f32.mrb[9].mxu1  ;;  %v2943_v8 = vadd.f32 %v2942_v6, %v5295_v3  ;;  %v2944_v10 = vpop.f32.mrb[10].mxu0  ;;  %v3323_v6 = vmax.f32 %v3317_v57, 0.0 }
 0x269   : > { %v2985_v11 = vpop.f32.mrb[10].mxu1  ;;  %v2982_v17 = vadd.f32 %v2981_v2, %v2941_v5  ;;  %v2945_v18 = vpop.f32.mrb[11].mxu0  ;;  %v3322_v5 = vmax.f32 %v3316_v9, 0.0 }
 0x26a   : > { %v2986_v21 = vpop.f32.mrb[11].mxu1  ;;  %v2984_v48 = vadd.f32 %v2983_v7, %v2943_v8  ;;  %v3257_v18 = vsub.s32 5, %v5300_v55 }
 0x26b   : > { %v3265_v23 = vadd.f32 %v3238_v19, %v2982_v17  ;;  %v3253_v17 = vsub.s32 4, %v5300_v55 }
 0x26c   : > { %v3266_v4 = vadd.f32 %v3242_v60, %v2984_v48  ;;  %v3301_v22 = vrot.slane %v5304_v16, %v3257_v18 }
 0x26d   : > { %v3271_v50 = vmax.f32 %v3265_v23, 0.0  ;;  %v3297_v21 = vrot.slane %v5304_v16, %v3253_v17  ;;  %v3254_v48 = vrot.slane %v5308_v58, %v3253_v17 }
 0x26e   : > { %v3272_v14 = vmax.f32 %v3266_v4, 0.0  ;;  %v3258_v4 = vrot.slane %v5308_v58, %v3257_v18 }
 0x26f   : > { %v3326_v25 = vmul.f32 %v3320_v13, %v3271_v50  ;;  %v3312_v23 = vadd.f32 %v3297_v21, %v5287_v62  ;;  %v3313_v13 = vadd.f32 %v3301_v22, %v5292_v1 }
 0x270   : > { %v3327_v0 = vmul.f32 %v3321_v24, %v3272_v14 }
 0x272   : > { %v3332_v26 = vadd.f32 %v3327_v0, %v3326_v25 }
 0x2a6   : > { %v3022_v27 = vpop.f32.mrb[12].mxu0 }
 0x2a7   : > { %v3063_v28 = vpop.f32.mrb[12].mxu1  ;;  %v3023_v3 = vadd.f32 %v3022_v27, %v5277_v49  ;;  %v3024_v29 = vpop.f32.mrb[13].mxu0 }
 0x2a8   : > { %v3065_v31 = vpop.f32.mrb[13].mxu1  ;;  %v3025_v32 = vadd.f32 %v3024_v29, %v5281_v51  ;;  %v3026_v33 = vpop.f32.mrb[14].mxu0 }
 0x2a9   : > { %v3067_v34 = vpop.f32.mrb[14].mxu1  ;;  %v3064_v35 = vadd.f32 %v3063_v28, %v3023_v3  ;;  %v3027_v36 = vpop.f32.mrb[15].mxu0  ;;  %v3318_v3 = vadd.f32 %v3312_v23, %v3254_v48 }
 0x2aa   : > { %v3068_v37 = vpop.f32.mrb[15].mxu1  ;;  %v3066_v38 = vadd.f32 %v3065_v31, %v3025_v32  ;;  %v3319_v32 = vadd.f32 %v3313_v13, %v3258_v4 }
 0x2ab   : > { %v3324_v34 = vmax.f32 %v3318_v3, 0.0 }
 0x2ac   : > { %v3325_v36 = vmax.f32 %v3319_v32, 0.0 }
 0x2e6   : > { %v3104_v46 = vpop.f32.mrb[16].mxu0 }
 0x2e7   : > { %v3145_v47 = vpop.f32.mrb[16].mxu1  ;;  %v3105_v52 = vadd.f32 %v3104_v46, %v3064_v35  ;;  %v3106_v15 = vpop.f32.mrb[17].mxu0 }
 0x2e8   : > { %v3146_v53 = vadd.f32 %v3145_v47, %v5287_v62  ;;  %v3147_v56 = vpop.f32.mrb[17].mxu1  ;;  %v3107_v59 = vadd.f32 %v3106_v15, %v3066_v38  ;;  %v3108_v20 = vpop.f32.mrb[18].mxu0 }
 0x2e9   : > { %v3148_v19 = vadd.f32 %v3147_v56, %v5292_v1  ;;  %v3149_v60 = vpop.f32.mrb[18].mxu1  ;;  %v3267_v61 = vadd.f32 %v3246_v42, %v3105_v52  ;;  %v3109_v49 = vpop.f32.mrb[19].mxu0 }
 0x2ea   : > { %v3150_v63 = vpop.f32.mrb[19].mxu1  ;;  %v3268_v2 = vadd.f32 %v3250_v44, %v3107_v59 }
 0x2eb   : > { %v3273_v51 = vmax.f32 %v3267_v61, 0.0 }
 0x2ec   : > { %v3274_v7 = vmax.f32 %v3268_v2, 0.0 }
 0x2ed   : > { %v3328_v8 = vmul.f32 %v3322_v5, %v3273_v51 }
 0x2ee   : > { %v3329_v10 = vmul.f32 %v3323_v6, %v3274_v7 }
 0x2ef   : > { %v3333_v11 = vadd.f32 %v3332_v26, %v3328_v8 }
 0x2f1   : > { %v3334_v12 = vadd.f32 %v3333_v11, %v3329_v10 }
 0x326   : > { %v3186_v50 = vpop.f32.mrb[20].mxu0 }
 0x327   : > { %v3227_v24 = vpop.f32.mrb[20].mxu1  ;;  %v3187_v14 = vadd.f32 %v3186_v50, %v3146_v53  ;;  %v3188_v25 = vpop.f32.mrb[21].mxu0 }
 0x328   : > { %v3229_v0 = vpop.f32.mrb[21].mxu1  ;;  %v3189_v26 = vadd.f32 %v3188_v25, %v3148_v19  ;;  %v3190_v27 = vpop.f32.mrb[22].mxu0 }
 0x329   : > { %v3231_v28 = vpop.f32.mrb[22].mxu1  ;;  %v3228_v29 = vadd.f32 %v3227_v24, %v3187_v14  ;;  %v3191_v31 = vpop.f32.mrb[23].mxu0 }
 0x32a   : > { %v3232_v16 = vpop.f32.mrb[23].mxu1  ;;  %v3230_v62 = vadd.f32 %v3229_v0, %v3189_v26 }
 0x32b   : > { %v3269_v33 = vadd.f32 %v3254_v48, %v3228_v29 }
 0x32c   : > { %v3270_v58 = vadd.f32 %v3258_v4, %v3230_v62 }
 0x32d   : > { %v3275_v1 = vmax.f32 %v3269_v33, 0.0 }
 0x32e   : > { %v3276_v35 = vmax.f32 %v3270_v58, 0.0 }
 0x32f   : > { %v3330_v37 = vmul.f32 %v3324_v34, %v3275_v1 }
 0x330   : > { %v3331_v38 = vmul.f32 %v3325_v36, %v3276_v35 }
 0x331   : > { %v3335_v39 = vadd.f32 %v3334_v12, %v3330_v37 }
 0x333   : > { %v3336_v40 = vadd.f32 %v3335_v39, %v3331_v38 }
 0x335   : > { %3337 = vadd.xlane.f32.xlu0 %v3336_v40 }
 0x3c2   : > { %v3338_v42 = vpop.xlane.xlu0 %3337 }
 0x3c3   : > { %v3345_v43 = vrot.slane %v3338_v42, %v3344_v30 }
 0x3c5   : > { %3348 = vst.msk [vmem:[%s403_s29] sm:$0x1] %vm3347_vm0, %v3345_v43 }
 0x3c6   : > { %4811 = shalt.err (!%p4808_p5)
}
 0x3c7   : > { %s4812_s26 = scalar_lea.hbm %s5344_s10, 16  ;;  %s4816_s1 = scalar_lea.hbm %s5454_s19, 32 }
 0x3c8   : > { %p4813_p12 = scmp.ne.s32.totalorder %s5344_s10, %s4812_s26  ;;  %p4817_p9 = scmp.lt.u32.totalorder %s5344_s10, %s5454_s19 }
 0x3c9   : > { %p4818_p2 = scmp.lt.u32.totalorder %s4816_s1, %s4812_s26  ;;  %p4820_p1 = scmp.lt.u32.totalorder %s4812_s26, %s5344_s10 }
 0x3ca   : > { %p4814_p7 = pnand %p4813_p12, %p5455_p3 }
 0x3cb   : > { %p4819_p4 = por %p4818_p2, %p4817_p9 }
 0x3cc   : > { %p4815_p13 = pneg %p4814_p7 }
 0x3cd   : > { %p4821_p6 = por %p4820_p1, %p4819_p4 }
 0x3cf   : > { %p4822_p11 = pnand %p4821_p6, %p4815_p13 }
 0x3d1   : > { %4825 = shalt.err (!%p4822_p11)
}
 0x3d2   : > { %3953 = dma.vmem_to_hbm [thread:$0]  (%p5455_p3), %s5346_s21, 16, %s5344_s10, %s3350_s8  }
 0x3d3 PF: > { %s5456_s7 = sld [smem:[#allocation19_spill]]  ;;  %s5457_s9 = sld [smem:[#allocation22_spill]] }
 0x3d4   : > { %s5458_s14 = sld [smem:[#allocation21_spill]] }
 0x3d9   : > { %s3375_s11 = sand.u32 1, %s5456_s7   ;;  %p5459_p8 = scmp.ne.s32.totalorder %s5457_s9, 0 }
 0x3da   : > { %p5460_p10 = scmp.ge.s32.totalorder %s5458_s14, 2  ;;  %s3376_s13 = scalar_lea.sflag [#allocation4], %s3375_s11 }
 0x3dc   : > { %p3976_p0 = pnand %p5460_p10, %p5459_p8 }
 0x3de   : > { %4867 = dma.done.wait (!%p3976_p0), %s3376_s13, 16  }
 0x3df   : > { %4869 = vsyncadd (!%p3976_p0), %s3376_s13, 4294967280  ;;  %s27_s26 = sadd.s32 1, %s5458_s14   ;;  %s5461_s3 = sld [smem:[#allocation20_spill]] }
 0x3e0   : > { %p24_p5 = scmp.ge.s32.totalorder %s27_s26, 4   ;;  %s5462_s23 = sld [smem:[#allocation24_spill]] }
 0x3e1   : > { %s5463_s15 = sld [smem:[#allocation23_spill]]  ;;  %s5464_s21 = smov %s4876_s22 }
 0x3e2   : > { %s5466_s24 = smov %s4888_s25  ;;  %26 = sbr.rel (!%p24_p5) target bundleno = 14 (0xe), region = 125 }
 0x3e5   : > { %s5465_s22 = smov %s5461_s3 }
 0x3e7   : > { %s5467_s25 = smov %s5463_s15 }
 0x3e9   :  { %3380 = vsyncpa [#allocation3], 1 }
 0x3ea   :  { %3382 = vsyncpa [#allocation3 + $0x1], 1 }
 0x3eb   :  { %3383 = vsyncpa [#allocation6], 1 }
 0x3ec   :  { %3385 = vsyncpa [#allocation6 + $0x1], 1 }
 0x3ed   :  { %3386 = vsyncpa [#allocation9], 1 }
 0x3ee   :  { %3387 = vsyncpa [#allocation12], 1 }
 0x3ef   :  { %3388 = vsyncpa [#allocation4], 1 }
 0x3f0   :  { %3390 = vsyncpa [#allocation4 + $0x1], 1 }

// kernel: tpu_custom_call.1
= control target key start
LH: loop header
LB: loop body
LE: loop exit
PB: predicated region body
PF: predicated region fallthrough
CT: control target
= control target key end

     0   :  { %s5393_s0 = inlined_call_operand.hbm [shape: f32[2,1,768], index: 0, kind: input, shape index: {}]   ;;  %s5394_s1 = inlined_call_operand.hbm [shape: bf16[2,8,768], index: 1, kind: input, shape index: {}]   ;;  %s5395_s2 = inlined_call_operand.hbm [shape: bf16[2,8,256], index: 2, kind: input, shape index: {}]   ;;  %s5396_s3 = inlined_call_operand.hbm [shape: bf16[768,768], index: 3, kind: input, shape index: {}]   ;;  %s5397_s4 = inlined_call_operand.hbm [shape: bf16[256,768], index: 4, kind: input, shape index: {}]   ;;  %s5398_s5 = inlined_call_operand.hbm [shape: f32[1,768], index: 5, kind: input, shape index: {}]   ;;  %s5399_s6 = inlined_call_operand.hbm [shape: f32[2,1,8], index: 6, kind: output, shape index: {}]  }
   0x1   :  { %5421 = sst [smem:[#allocation25_spill]] %s5394_s1 }
   0x2   :  { %5422 = sst [smem:[#allocation26_spill]] %s5396_s3 }
   0x3   :  { %5423 = sst [smem:[#allocation27_spill]] %s5399_s6 }
   0x4   :  { %11 = vsyncpa [#allocation3], 0 }
   0x5   :  { %13 = vsyncpa [#allocation3 + $0x1], 0 }
   0x6   :  { %14 = vsyncpa [#allocation6], 0 }
   0x7   :  { %16 = vsyncpa [#allocation6 + $0x1], 0 }
   0x8   :  { %17 = vsyncpa [#allocation9], 0 }
   0x9   :  { %18 = vsyncpa [#allocation12], 0 }
   0xa   :  { %19 = vsyncpa [#allocation4], 0 }
   0xb   :  { %21 = vsyncpa [#allocation4 + $0x1], 0  ;;  %s4938_s21 = smov 0   ;;  %s4940_s22 = smov 0  }
   0xc   :  { %s4942_s23 = smov 0   ;;  %s4944_s24 = smov 0  }
   0xd   :  { %s4946_s25 = smov 0   ;;  %s4948_s26 = smov 0  }
   0xe LB: > { %5424 = sst [smem:[#allocation19_spill]] %s4872_s21  ;;  %s4969_s27 = sadd.s32 4294967295, %s4892_s26   ;;  %s4892_s26 = sphi %s4948_s26, %s27_s26   ;;  %s4888_s25 = sphi %s4946_s25, %s5467_s25   ;;  %s4884_s24 = sphi %s4944_s24, %s5466_s24   ;;  %s4880_s23 = sphi %s4942_s23, %s5462_s23   ;;  %s4876_s22 = sphi %s4940_s22, %s5465_s22   ;;  %s4872_s21 = sphi %s4938_s21, %s5464_s21  }
   0xf   : > { %5425 = sst [smem:[#allocation20_spill]] %s4880_s23  ;;  %s3517_s28 = sadd.s32 4294967294, %s4892_s26  }
  0x10   : > { %5426 = sst [smem:[#allocation21_spill]] %s4892_s26  ;;  %p59_p0 = scmp.ne.s32.totalorder %s4876_s22, %s4872_s21 }
  0x11   : > { %p5400_p1 = scmp.eq.s32.totalorder %s4969_s27, 0  ;;  %p210_p3 = scmp.eq.s32.totalorder %s3517_s28, 1 }
  0x12   : > { %p3518_p5 = scmp.ge.s32.totalorder %s4892_s26, 1  ;;  %p217_p7 = scmp.lt.s32.totalorder %s4892_s26, 3 }
  0x13   : > { %p4978_p4 = por %p5400_p1, %p59_p0  ;;  %p4983_p6 = por %p210_p3, %p59_p0 }
  0x14   : > { %p4988_p8 = pnand %p3518_p5, %p217_p7  ;;  %s4894_s8 = smov [#allocation8]  }
  0x15   : > { %s5427_s29 = scalar_select %p4978_p4, 1, 0 }
  0x16   : > { %s5428_s30 = scalar_select %p4983_p6, 1, 0 }
  0x17   : > { %s5430_s7 = scalar_select %p4988_p8, 1, 0 }
  0x18   : > { %5429 = sst [smem:[#allocation22_spill]] %s5428_s30  ;;  %s229_s9 = sshll.u32 %s4894_s8, 4  ;;  %s230_s9 = int_to_ptr.vmem [resolvable:$true] %s229_s9 }
  0x19   : > { %p3955_p9 = pneg %p4988_p8  ;;  %s39_s11 = sadd.s32 1, %s4888_s25 }
  0x1a   : > { %s5432_s3 = sld [smem:[#allocation26_spill]] }
  0x1b   : > { %p4997_p11 = pnand %p3955_p9, %p5400_p1 }
  0x1d   : > { %s5431_s10 = scalar_select %p4997_p11, 1, 0 }
  0x1e   : > { %p5010_p13 = pneg %p4997_p11 }
  0x20   : > { %s4624_s14 = scalar_lea.hbm %s5432_s3, 36864 }
  0x21   : > { %p4625_p12 = scmp.ne.s32.totalorder %s5432_s3, %s4624_s14  ;;  %p4631_p5 = scmp.lt.u32.totalorder %s4624_s14, %s5432_s3 }
  0x22   : > { %s5433_s17 = scalar_select %p5010_p13, 1, 0 }
  0x23   : > { %p4627_p0 = pnand %p5010_p13, %p4625_p12 }
  0x25   : > { %p4628_p3 = pneg %p4627_p0 }
  0x27   : > { %p4633_p7 = pnand %p4631_p5, %p4628_p3 }
  0x29   : > { %4636 = shalt.err (!%p4633_p7)
}
  0x2a   : > { %s4637_s20 = scalar_lea.vmem %s230_s9, 36864  ;;  %p4645_p2 = scmp.lt.s32.totalorder %s230_s9, %s230_s9 }
  0x2b   : > { %p4638_p9 = scmp.ne.s32.totalorder %s230_s9, %s4637_s20  ;;  %p4646_p6 = scmp.lt.s32.totalorder %s4637_s20, %s4637_s20 }
  0x2d   : > { %p4640_p10 = pnand %p4638_p9, %p5010_p13  ;;  %p4647_p4 = por %p4646_p6, %p4645_p2 }
  0x2f   : > { %p4641_p1 = pneg %p4640_p10 }
  0x31   : > { %p4648_p8 = pnand %p4647_p4, %p4641_p1 }
  0x33   : > { %4651 = shalt.err (!%p4648_p8)
}
  0x34   : > { %s5403_s28 = smov 384   ;;  %s5404_s8 = smov 24  }
  0x35   : > { %3958 = dma.hbm_to_vmem [thread:$0]  (!%p4997_p11), %s5432_s3, 36864, %s230_s9, [#allocation9], %s5403_s28, %s5403_s28, %s5404_s8  }
  0x36   : > { %p41_p1 = scmp.ge.s32.totalorder %s39_s11, 2  ;;  %s46_s14 = sadd.s32 1, %s4880_s23 }
  0x37   : > { %p53_p2 = scmp.ne.s32.totalorder %s4880_s23, %s4876_s22  ;;  %p54_p4 = scmp.eq.s32.totalorder %s4892_s26, 0 }
  0x38   : > { %s5469_s11 = smov (%p41_p1, %s39_s11), 0  ;;  %p5435_p8 = scmp.eq.s32.totalorder %s4969_s27, 1 }
  0x39   : > { %5434 = sst [smem:[#allocation23_spill]] %s5469_s11  ;;  %p55_p6 = por %p54_p4, %p53_p2 }
  0x3a   : > { %p5037_p10 = por %p5435_p8, %p53_p2  ;;  %s43_s16 = ssub.s32 %s4888_s25, %s5469_s11 }
  0x3b   : > { %p3982_p12 = scmp.lt.s32.totalorder %s4892_s26, 2  ;;  %p44_p0 = scmp.eq.s32.totalorder %s43_s16, 0 }
  0x3c   : > { %s5436_s15 = scalar_select %p5037_p10, 1, 0 }
  0x3d   : > { %s5045_s18 = sand.u32 1, %s4880_s23   ;;  %p5047_p3 = pnand %p3982_p12, %p55_p6 }
  0x3e   : > { %s286_s19 = sand.u32 1, %s4892_s26   ;;  %s3931_s12 = smul.u32 24, %s5045_s18 }
  0x3f   : > { %s5437_s9 = scalar_select %p5047_p3, 1, 0 }
  0x40   : > { %s5053_s20 = scalar_select %p44_p0, %s4880_s23, %s46_s14  }
  0x41   : > { %s3932_s13 = smul.u32 384, %s4888_s25  ;;  %s4897_s28 = smov [#allocation10]  }
  0x42   : > { %5438 = sst [smem:[#allocation24_spill]] %s5053_s20  ;;  %s242_s8 = sshll.u32 %s4897_s28, 4  ;;  %s5057_s8 = int_to_ptr.vmem [resolvable:$true] %s242_s8 }
  0x43   : > { %s5439_s1 = sld [smem:[#allocation25_spill]]  ;;  %s290_s30 = scalar_lea.vmem [#allocation5], %s3931_s12 }
  0x44   : > { %s300_s21 = sshll.u32 %s290_s30, 4  ;;  %s5066_s14 = scalar_lea.sflag [#allocation6], %s286_s19  ;;  %s5064_s21 = int_to_ptr.vmem [resolvable:$true] %s300_s21 }
  0x45   : > { %p5072_p7 = pneg %p5047_p3 }
  0x47   : > { %s5440_s28 = scalar_select %p5072_p7, 1, 0 }
  0x49   : > { %s5062_s16 = scalar_lea.hbm %s5439_s1, %s3932_s13  ;;  %s4657_s12 = scalar_lea.hbm %s5439_s1, 768 }
  0x4a   : > { %s4652_s20 = scalar_lea.hbm %s5062_s16, 384  ;;  %p4658_p2 = scmp.lt.u32.totalorder %s5062_s16, %s5439_s1 }
  0x4b   : > { %p4653_p5 = scmp.ne.s32.totalorder %s5062_s16, %s4652_s20  ;;  %p4659_p4 = scmp.lt.u32.totalorder %s4657_s12, %s4652_s20 }
  0x4c   : > { %p4661_p8 = scmp.lt.u32.totalorder %s4652_s20, %s5062_s16 }
  0x4d   : > { %p4655_p9 = pnand %p5072_p7, %p4653_p5  ;;  %p4660_p6 = por %p4659_p4, %p4658_p2 }
  0x4f   : > { %p4656_p1 = pneg %p4655_p9  ;;  %p4662_p12 = por %p4661_p8, %p4660_p6 }
  0x51   : > { %p4663_p0 = pnand %p4662_p12, %p4656_p1 }
  0x53   : > { %4666 = shalt.err (!%p4663_p0)
}
  0x54   : > { %s4667_s19 = scalar_lea.vmem %s5064_s21, 384  ;;  %s4898_s3 = smov [#allocation5]  }
  0x55   : > { %p4668_p5 = scmp.ne.s32.totalorder %s5064_s21, %s4667_s19  ;;  %s4672_s11 = sshll.u32 %s4898_s3, 4  ;;  %s4673_s11 = int_to_ptr.vmem [resolvable:$false] %s4672_s11 }
  0x56   : > { %s4674_s30 = scalar_lea.vmem %s4673_s11, 768  ;;  %p4675_p11 = scmp.lt.s32.totalorder %s5064_s21, %s4673_s11 }
  0x57   : > { %p4670_p9 = pnand %p4668_p5, %p5072_p7  ;;  %p4676_p13 = scmp.lt.s32.totalorder %s4674_s30, %s4667_s19 }
  0x59   : > { %p4671_p10 = pneg %p4670_p9  ;;  %p4677_p2 = por %p4676_p13, %p4675_p11 }
  0x5b   : > { %p4678_p4 = pnand %p4677_p2, %p4671_p10 }
  0x5d   : > { %4681 = shalt.err (!%p4678_p4)
}
  0x5e   : > { %3971 = dma.hbm_to_vmem [thread:$0]  (!%p5047_p3), %s5062_s16, 384, %s5064_s21, %s5066_s14  }
  0x5f   : > { %s4682_s13 = scalar_lea.hbm %s5397_s4, 12288  ;;  %p5441_p6 = scmp.ne.s32.totalorder %s5433_s17, 0 }
  0x60   : > { %p4683_p1 = scmp.ne.s32.totalorder %s5397_s4, %s4682_s13  ;;  %p4689_p13 = scmp.lt.u32.totalorder %s4682_s13, %s5397_s4 }
  0x62   : > { %p4685_p8 = pnand %p4683_p1, %p5441_p6 }
  0x64   : > { %p4686_p11 = pneg %p4685_p8 }
  0x66   : > { %p4691_p10 = pnand %p4689_p13, %p4686_p11 }
  0x68   : > { %4694 = shalt.err (!%p4691_p10)
}
  0x69   : > { %s4695_s21 = scalar_lea.vmem %s5057_s8, 12288  ;;  %p4703_p9 = scmp.lt.s32.totalorder %s5057_s8, %s5057_s8 }
  0x6a   : > { %p4696_p12 = scmp.ne.s32.totalorder %s5057_s8, %s4695_s21  ;;  %p4704_p2 = scmp.lt.s32.totalorder %s4695_s21, %s4695_s21 }
  0x6c   : > { %p4698_p0 = pnand %p4696_p12, %p5441_p6  ;;  %p4705_p4 = por %p4704_p2, %p4703_p9 }
  0x6e   : > { %p4699_p5 = pneg %p4698_p0 }
  0x70   : > { %p4706_p1 = pnand %p4705_p4, %p4699_p5 }
  0x72   : > { %4709 = shalt.err (!%p4706_p1)
}
  0x73   : > { %p5442_p8 = scmp.ne.s32.totalorder %s5431_s10, 0  ;;  %s5443_s1 = smov 24  }
  0x74   : > { %s5444_s16 = smov 384   ;;  %s4899_s12 = smov [#allocation11]  }
  0x75   : > { %3961 = dma.hbm_to_vmem [thread:$0]  (!%p5442_p8), %s5397_s4, 12288, %s5057_s8, [#allocation9], %s5444_s16, %s5444_s16, %s5443_s1  }
  0x76   : > { %s256_s13 = sshll.u32 %s4899_s12, 4  ;;  %s3929_s3 = smul.u32 6, %s5045_s18  ;;  %s257_s13 = int_to_ptr.vmem [resolvable:$true] %s256_s13 }
  0x77   : > { %s4710_s21 = scalar_lea.hbm %s5398_s5, 96 }
  0x78   : > { %p4711_p11 = scmp.ne.s32.totalorder %s5398_s5, %s4710_s21  ;;  %p4717_p12 = scmp.lt.u32.totalorder %s4710_s21, %s5398_s5 }
  0x7a   : > { %p4713_p13 = pnand %p4711_p11, %p5441_p6 }
  0x7c   : > { %p4714_p10 = pneg %p4713_p13 }
  0x7e   : > { %p4719_p0 = pnand %p4717_p12, %p4714_p10 }
  0x80   : > { %4722 = shalt.err (!%p4719_p0)
}
  0x81   : > { %s4723_s8 = scalar_lea.vmem %s257_s13, 96  ;;  %p4731_p4 = scmp.lt.s32.totalorder %s257_s13, %s257_s13 }
  0x82   : > { %p4724_p5 = scmp.ne.s32.totalorder %s257_s13, %s4723_s8  ;;  %p4732_p1 = scmp.lt.s32.totalorder %s4723_s8, %s4723_s8 }
  0x84   : > { %p4726_p9 = pnand %p4724_p5, %p5441_p6  ;;  %p4733_p3 = por %p4732_p1, %p4731_p4 }
  0x86   : > { %p4727_p2 = pneg %p4726_p9 }
  0x88   : > { %p4734_p7 = pnand %p4733_p3, %p4727_p2 }
  0x8a   : > { %4737 = shalt.err (!%p4734_p7)
}
  0x8b   : > { %3964 = dma.hbm_to_vmem [thread:$0]  (!%p5442_p8), %s5398_s5, 96, %s257_s13, [#allocation12]  }
  0x8c   : > { %s3930_s6 = smul.u32 96, %s4888_s25  ;;  %s271_s1 = scalar_lea.vmem [#allocation2], %s3929_s3 }
  0x8d   : > { %s279_s17 = sshll.u32 %s271_s1, 4  ;;  %s3525_s16 = sshll.u32 %s5045_s18, 3  ;;  %s280_s17 = int_to_ptr.vmem [resolvable:$true] %s279_s17 }
  0x8e   : > { %s5146_s19 = scalar_lea.hbm %s5393_s0, %s3930_s6  ;;  %s268_s10 = scalar_lea.sflag [#allocation3], %s5045_s18 }
  0x8f   : > { %s4738_s11 = scalar_lea.hbm %s5146_s19, 96  ;;  %p5445_p7 = scmp.ne.s32.totalorder %s5440_s28, 0 }
  0x90   : > { %p4739_p3 = scmp.ne.s32.totalorder %s5146_s19, %s4738_s11  ;;  %s4743_s21 = scalar_lea.hbm %s5393_s0, 192 }
  0x91   : > { %p4744_p11 = scmp.lt.u32.totalorder %s5146_s19, %s5393_s0  ;;  %p4745_p13 = scmp.lt.u32.totalorder %s4743_s21, %s4738_s11 }
  0x92   : > { %p4741_p6 = pnand %p4739_p3, %p5445_p7  ;;  %p4747_p12 = scmp.lt.u32.totalorder %s4738_s11, %s5146_s19 }
  0x93   : > { %p4746_p10 = por %p4745_p13, %p4744_p11 }
  0x94   : > { %p4742_p8 = pneg %p4741_p6 }
  0x95   : > { %p4748_p0 = por %p4747_p12, %p4746_p10 }
  0x97   : > { %p4749_p5 = pnand %p4748_p0, %p4742_p8 }
  0x99   : > { %4752 = shalt.err (!%p4749_p5)
}
  0x9a   : > { %s4753_s23 = scalar_lea.vmem %s280_s17, 96  ;;  %s4900_s26 = smov [#allocation2]  }
  0x9b   : > { %p4754_p9 = scmp.ne.s32.totalorder %s280_s17, %s4753_s23  ;;  %s4758_s6 = sshll.u32 %s4900_s26, 4  ;;  %s4759_s6 = int_to_ptr.vmem [resolvable:$false] %s4758_s6 }
  0x9c   : > { %s4760_s1 = scalar_lea.vmem %s4759_s6, 192  ;;  %p4761_p1 = scmp.lt.s32.totalorder %s280_s17, %s4759_s6 }
  0x9d   : > { %p4756_p2 = pnand %p4754_p9, %p5445_p7  ;;  %p4762_p3 = scmp.lt.s32.totalorder %s4760_s1, %s4753_s23 }
  0x9f   : > { %p4757_p4 = pneg %p4756_p2  ;;  %p4763_p6 = por %p4762_p3, %p4761_p1 }
  0xa1   : > { %p4764_p11 = pnand %p4763_p6, %p4757_p4 }
  0xa3   : > { %4767 = shalt.err (!%p4764_p11)
}
  0xa4   : > { %p5446_p13 = scmp.ne.s32.totalorder %s5437_s9, 0  ;;  %s3928_s20 = sshll.u32 %s4888_s25, 7 }
  0xa5   : > { %s5170_s13 = scalar_lea.hbm %s5395_s2, %s3928_s20  ;;  %s311_s3 = scalar_lea.vmem [#allocation7], %s3525_s16 }
  0xa6   : > { %3968 = dma.hbm_to_vmem [thread:$0]  (!%p5446_p13), %s5146_s19, 96, %s280_s17, %s268_s10  }
  0xa7   : > { %s321_s21 = sshll.u32 %s311_s3, 4  ;;  %s4768_s30 = scalar_lea.hbm %s5170_s13, 128  ;;  %s322_s21 = int_to_ptr.vmem [resolvable:$true] %s321_s21 }
  0xa8   : > { %p4769_p8 = scmp.ne.s32.totalorder %s5170_s13, %s4768_s30  ;;  %s4773_s10 = scalar_lea.hbm %s5395_s2, 256 }
  0xa9   : > { %p4774_p0 = scmp.lt.u32.totalorder %s5170_s13, %s5395_s2  ;;  %p4775_p5 = scmp.lt.u32.totalorder %s4773_s10, %s4768_s30 }
  0xaa   : > { %p4771_p10 = pnand %p4769_p8, %p5445_p7  ;;  %p4777_p2 = scmp.lt.u32.totalorder %s4768_s30, %s5170_s13 }
  0xab   : > { %p4776_p9 = por %p4775_p5, %p4774_p0 }
  0xac   : > { %p4772_p12 = pneg %p4771_p10 }
  0xad   : > { %p4778_p4 = por %p4777_p2, %p4776_p9 }
  0xaf   : > { %p4779_p1 = pnand %p4778_p4, %p4772_p12 }
  0xb1   : > { %4782 = shalt.err (!%p4779_p1)
}
  0xb2   : > { %s4783_s18 = scalar_lea.vmem %s322_s21, 128  ;;  %s4901_s16 = smov [#allocation7]  }
  0xb3   : > { %p4784_p3 = scmp.ne.s32.totalorder %s322_s21, %s4783_s18  ;;  %s4788_s26 = sshll.u32 %s4901_s16, 4  ;;  %s4789_s26 = int_to_ptr.vmem [resolvable:$false] %s4788_s26 }
  0xb4   : > { %s4790_s6 = scalar_lea.vmem %s4789_s26, 256  ;;  %p4791_p8 = scmp.lt.s32.totalorder %s322_s21, %s4789_s26 }
  0xb5   : > { %p4786_p6 = pnand %p4784_p3, %p5445_p7  ;;  %p4792_p10 = scmp.lt.s32.totalorder %s4790_s6, %s4783_s18 }
  0xb7   : > { %p4787_p11 = pneg %p4786_p6  ;;  %p4793_p13 = por %p4792_p10, %p4791_p8 }
  0xb9   : > { %p4794_p0 = pnand %p4793_p13, %p4787_p11 }
  0xbb   : > { %4797 = shalt.err (!%p4794_p0)
}
  0xbc   : > { %p5447_p5 = scmp.ne.s32.totalorder %s5437_s9, 0  ;;  %p5448_p12 = scmp.ne.s32.totalorder %s5430_s7, 0 }
  0xbd   : > { %s5195_s28 = sand.u32 (!%p5448_p12), 1, %s4876_s22   ;;  %p5449_p7 = scmp.ne.s32.totalorder (!%p5448_p12), %s5427_s29, 0 }
  0xbe   : > { %3974 = dma.hbm_to_vmem [thread:$0]  (!%p5447_p5), %s5170_s13, 128, %s322_s21, %s5066_s14  }
  0xbf   : > { %330 = sbr.rel (%p5448_p12) target bundleno = 979 (0x3d3), region = 44  ;;  %s333_s20 = scalar_lea.sflag (!%p5448_p12), [#allocation3], %s5195_s28 }
  0xc0   : > { %s3933_s1 = smul.u32 (!%p5448_p12), 6, %s5195_s28 }
  0xc2   : > { %s5199_s12 = scalar_lea.vmem (!%p5448_p12), [#allocation2], %s3933_s1 }
  0xc6   : > { %4851 = dma.done.wait (%p5449_p7), %s333_s20, 96  }
  0xc7   : > { %4853 = vsyncadd (%p5449_p7), %s333_s20, 4294967200  ;;  %s341_s7 = sand.u32 1, %s4969_s27   ;;  %s3934_s9 = smul.u32 24, %s5195_s28 }
  0xc8   : > { %s342_s14 = scalar_lea.sflag [#allocation6], %s341_s7 }
  0xc9   : > { %s5207_s11 = scalar_lea.vmem [#allocation5], %s3934_s9 }
  0xca   : > { %4855 = dma.done.wait (%p5449_p7), %s342_s14, 512  }
  0xcb   : > { %4857 = vsyncadd (%p5449_p7), %s342_s14, 4294966784  ;;  %s3529_s13 = sshll.u32 %s5195_s28, 3  ;;  %p5450_p13 = scmp.eq.s32.totalorder %s4969_s27, 0 }
  0xcc   : > { %s5214_s3 = scalar_lea.vmem [#allocation7], %s3529_s13 }
  0xcd   : > { %4859 = dma.done.wait (%p5450_p13), [#allocation9], 49152   ;;  %p5451_p9 = pmov %p5450_p13 }
  0xcf   : > { %4861 = vsyncadd (%p5451_p9), [#allocation9], 4294918144  ;;  %p5452_p2 = pmov %p5451_p9 }
  0xd1   : > { %4863 = dma.done.wait (%p5452_p2), [#allocation12], 96   ;;  %p5453_p4 = pmov %p5452_p2 }
  0xd2   : > { %v4040_v0 = vld [vmem:[#allocation10 + $0x4] ss:$24 sps:$4 sm:$0xff]   ;;  %v4044_v2 = vld [vmem:[#allocation10] ss:$24 sps:$4 sm:$0xff]   ;;  %v4046_v4 = vld [vmem:[#allocation10 + $0x34] ss:$24 sps:$4 sm:$0xff]  }
  0xd3   : > { %4865 = vsyncadd (%p5453_p4), [#allocation12], 4294967200  ;;  %v4042_v1 = vld [vmem:[#allocation10 + $0xc] ss:$24 sps:$4 sm:$0xff]   ;;  %990 = vmatprep.subr.bf16.mxu0 %v4040_v0  ;;  %v4045_v3 = vld [vmem:[#allocation10 + $0x8] ss:$24 sps:$4 sm:$0xff]  }
  0xd4   : > { %1031 = vmatprep.subr.bf16.mxu1 %v4042_v1  ;;  %991 = vmatpush1.bf16.msra.mxu0 %v4044_v2  ;;  %v4048_v5 = vld [vmem:[#allocation10 + $0x3c] ss:$24 sps:$4 sm:$0xff]   ;;  %v4050_v6 = vld [vmem:[#allocation10 + $0x30] ss:$24 sps:$4 sm:$0xff]   ;;  %v4054_v9 = vld [vmem:[#allocation10 + $0x6c] ss:$24 sps:$4 sm:$0xff]  }
  0xd5   : > { %1032 = vmatpush1.bf16.msra.mxu1 %v4045_v3  ;;  %992 = vmatprep.subr.bf16.mxu0 %v4046_v4  ;;  %v4051_v7 = vld [vmem:[#allocation10 + $0x38] ss:$24 sps:$4 sm:$0xff]   ;;  %v4052_v8 = vld [vmem:[#allocation10 + $0x64] ss:$24 sps:$4 sm:$0xff]   ;;  %v4057_v11 = vld [vmem:[#allocation10 + $0x68] ss:$24 sps:$4 sm:$0xff]  }
  0xd6   : > { %1033 = vmatprep.subr.bf16.mxu1 %v4048_v5  ;;  %v4056_v10 = vld [vmem:[#allocation10 + $0x60] ss:$24 sps:$4 sm:$0xff]   ;;  %v4058_v12 = vld [vmem:[#allocation10 + $0x94] ss:$24 sps:$4 sm:$0xff]   ;;  %v4062_v14 = vld [vmem:[#allocation10 + $0x90] ss:$24 sps:$4 sm:$0xff]  }
  0xd7   : > { %v4060_v13 = vld [vmem:[#allocation10 + $0x9c] ss:$24 sps:$4 sm:$0xff]   ;;  %v4063_v15 = vld [vmem:[#allocation10 + $0x98] ss:$24 sps:$4 sm:$0xff]   ;;  %v4066_v17 = vld [vmem:[#allocation10 + $0xcc] ss:$24 sps:$4 sm:$0xff]  }
  0xd8   : > { %993 = vmatpush1.bf16.msra.mxu0 %v4050_v6  ;;  %v4064_v16 = vld [vmem:[#allocation10 + $0xc4] ss:$24 sps:$4 sm:$0xff]   ;;  %v4068_v18 = vld [vmem:[#allocation10 + $0xc0] ss:$24 sps:$4 sm:$0xff]   ;;  %v4070_v20 = vld [vmem:[#allocation10 + $0xf4] ss:$24 sps:$4 sm:$0xff]  }
  0xd9   : > { %1034 = vmatpush1.bf16.msra.mxu1 %v4051_v7  ;;  %994 = vmatprep.subr.bf16.mxu0 %v4052_v8  ;;  %v4069_v19 = vld [vmem:[#allocation10 + $0xc8] ss:$24 sps:$4 sm:$0xff]   ;;  %v4072_v21 = vld [vmem:[#allocation10 + $0xfc] ss:$24 sps:$4 sm:$0xff]   ;;  %v4075_v23 = vld [vmem:[#allocation10 + $0xf8] ss:$24 sps:$4 sm:$0xff]  }
  0xda   : > { %1035 = vmatprep.subr.bf16.mxu1 %v4054_v9  ;;  %v4074_v22 = vld [vmem:[#allocation10 + $0xf0] ss:$24 sps:$4 sm:$0xff]   ;;  %v4076_v24 = vld [vmem:[#allocation10 + $0x124] ss:$24 sps:$4 sm:$0xff]   ;;  %v4080_v26 = vld [vmem:[#allocation10 + $0x120] ss:$24 sps:$4 sm:$0xff]  }
  0xdb   : > { %v4078_v25 = vld [vmem:[#allocation10 + $0x12c] ss:$24 sps:$4 sm:$0xff]   ;;  %v4081_v27 = vld [vmem:[#allocation10 + $0x128] ss:$24 sps:$4 sm:$0xff]   ;;  %v4084_v29 = vld [vmem:[#allocation10 + $0x15c] ss:$24 sps:$4 sm:$0xff]  }
  0xdc   : > { %995 = vmatpush1.bf16.msra.mxu0 %v4056_v10  ;;  %v4082_v28 = vld [vmem:[#allocation10 + $0x154] ss:$24 sps:$4 sm:$0xff]   ;;  %v4086_v30 = vld [vmem:[#allocation10 + $0x150] ss:$24 sps:$4 sm:$0xff]   ;;  %v4088_v32 = vld [vmem:[#allocation10 + $0x184] ss:$24 sps:$4 sm:$0xff]  }
  0xdd   : > { %1036 = vmatpush1.bf16.msra.mxu1 %v4057_v11  ;;  %996 = vmatprep.subr.bf16.mxu0 %v4058_v12  ;;  %v4087_v31 = vld [vmem:[#allocation10 + $0x158] ss:$24 sps:$4 sm:$0xff]   ;;  %v4090_v33 = vld [vmem:[#allocation10 + $0x18c] ss:$24 sps:$4 sm:$0xff]   ;;  %v4093_v35 = vld [vmem:[#allocation10 + $0x188] ss:$24 sps:$4 sm:$0xff]  }
  0xde   : > { %1037 = vmatprep.subr.bf16.mxu1 %v4060_v13  ;;  %v4092_v34 = vld [vmem:[#allocation10 + $0x180] ss:$24 sps:$4 sm:$0xff]   ;;  %v4094_v36 = vld [vmem:[#allocation10 + $0x1b4] ss:$24 sps:$4 sm:$0xff]   ;;  %v4098_v38 = vld [vmem:[#allocation10 + $0x1b0] ss:$24 sps:$4 sm:$0xff]  }
  0xdf   : > { %v4096_v37 = vld [vmem:[#allocation10 + $0x1bc] ss:$24 sps:$4 sm:$0xff]   ;;  %v4099_v39 = vld [vmem:[#allocation10 + $0x1b8] ss:$24 sps:$4 sm:$0xff]   ;;  %v4102_v41 = vld [vmem:[#allocation10 + $0x1ec] ss:$24 sps:$4 sm:$0xff]  }
  0xe0   : > { %997 = vmatpush1.bf16.msra.mxu0 %v4062_v14  ;;  %v4100_v40 = vld [vmem:[#allocation10 + $0x1e4] ss:$24 sps:$4 sm:$0xff]   ;;  %v4104_v42 = vld [vmem:[#allocation10 + $0x1e0] ss:$24 sps:$4 sm:$0xff]   ;;  %v4106_v44 = vld [vmem:[#allocation10 + $0x214] ss:$24 sps:$4 sm:$0xff]  }
  0xe1   : > { %1038 = vmatpush1.bf16.msra.mxu1 %v4063_v15  ;;  %998 = vmatprep.subr.bf16.mxu0 %v4064_v16  ;;  %v4105_v43 = vld [vmem:[#allocation10 + $0x1e8] ss:$24 sps:$4 sm:$0xff]   ;;  %v4108_v45 = vld [vmem:[#allocation10 + $0x21c] ss:$24 sps:$4 sm:$0xff]   ;;  %v4111_v49 = vld [vmem:[#allocation10 + $0x218] ss:$24 sps:$4 sm:$0xff]  }
  0xe2   : > { %1039 = vmatprep.subr.bf16.mxu1 %v4066_v17  ;;  %v406_v46 = vld [vmem:[%s5214_s3] sm:$0xff]  ;;  %v4114_v51 = vld [vmem:[#allocation10 + $0x24c] ss:$24 sps:$4 sm:$0xff]   ;;  %v4117_v53 = vld [vmem:[#allocation10 + $0x248] ss:$24 sps:$4 sm:$0xff]   ;;  %s3925_s27 = sshll.u32 %s4884_s24, 4 }
  0xe3   : > { %v4110_v47 = vld [vmem:[#allocation10 + $0x210] ss:$24 sps:$4 sm:$0xff]   ;;  %v3534_v48 = vcombine.high %v406_v46, %v406_v46  ;;  %v4112_v50 = vld [vmem:[#allocation10 + $0x244] ss:$24 sps:$4 sm:$0xff]   ;;  %v4116_v52 = vld [vmem:[#allocation10 + $0x240] ss:$24 sps:$4 sm:$0xff]   ;;  %v5225_v4 = vcombine.low %v406_v46, %v406_v46 }
  0xe4   : > { %999 = vmatpush1.bf16.msra.mxu0 %v4068_v18  ;;  %v4118_v54 = vld [vmem:[#allocation10 + $0x274] ss:$24 sps:$4 sm:$0xff]   ;;  %v4122_v56 = vld [vmem:[#allocation10 + $0x270] ss:$24 sps:$4 sm:$0xff]   ;;  %v4124_v58 = vld [vmem:[#allocation10 + $0x2a4] ss:$24 sps:$4 sm:$0xff]  }
  0xe5   : > { %1040 = vmatpush1.bf16.msra.mxu1 %v4069_v19  ;;  %1000 = vmatprep.subr.bf16.mxu0 %v4070_v20  ;;  %v4120_v55 = vld [vmem:[#allocation10 + $0x27c] ss:$24 sps:$4 sm:$0xff]   ;;  %v4123_v57 = vld [vmem:[#allocation10 + $0x278] ss:$24 sps:$4 sm:$0xff]   ;;  %v4126_v59 = vld [vmem:[#allocation10 + $0x2ac] ss:$24 sps:$4 sm:$0xff]  }
  0xe6   : > { %1041 = vmatprep.subr.bf16.mxu1 %v4072_v21  ;;  %1022 = vmatprep.mubr.bf16.mxu0 %v3534_v48  ;;  %v4128_v60 = vld [vmem:[#allocation10 + $0x2a0] ss:$24 sps:$4 sm:$0xff]   ;;  %v4130_v62 = vld [vmem:[#allocation10 + $0x2d4] ss:$24 sps:$4 sm:$0xff]   ;;  %v4134_v0 = vld [vmem:[#allocation10 + $0x2d0] ss:$24 sps:$4 sm:$0xff]  }
  0xe7   : > { %1063 = vmatprep.mubr.bf16.mxu1 %v3534_v48  ;;  %v4129_v61 = vld [vmem:[#allocation10 + $0x2a8] ss:$24 sps:$4 sm:$0xff]   ;;  %v4132_v63 = vld [vmem:[#allocation10 + $0x2dc] ss:$24 sps:$4 sm:$0xff]   ;;  %v4135_v1 = vld [vmem:[#allocation10 + $0x2d8] ss:$24 sps:$4 sm:$0xff]  }
  0xe8   : > { %1001 = vmatpush1.bf16.msra.mxu0 %v4074_v22  ;;  %v4140_v2 = vld [vmem:[#allocation10 + $0x14] ss:$24 sps:$4 sm:$0xff]   ;;  %v4143_v3 = vld [vmem:[#allocation8 + $0x4] ss:$24 sps:$4 sm:$0xff]   ;;  %v4138_v5 = vld [vmem:[#allocation10 + $0x10] ss:$24 sps:$4 sm:$0xff]  }
  0xe9   : > { %1042 = vmatpush1.bf16.msra.mxu1 %v4075_v23  ;;  %1002 = vmatprep.subr.bf16.mxu0 %v4076_v24  ;;  %v4141_v6 = vld [vmem:[#allocation8] ss:$24 sps:$4 sm:$0xff]   ;;  %v4146_v7 = vld [vmem:[#allocation10 + $0x44] ss:$24 sps:$4 sm:$0xff]   ;;  %v4149_v8 = vld [vmem:[#allocation8 + $0x34] ss:$24 sps:$4 sm:$0xff]  }
  0xea   : > { %1043 = vmatprep.subr.bf16.mxu1 %v4078_v25  ;;  %v4144_v9 = vld [vmem:[#allocation10 + $0x40] ss:$24 sps:$4 sm:$0xff]   ;;  %v4147_v10 = vld [vmem:[#allocation8 + $0x30] ss:$24 sps:$4 sm:$0xff]   ;;  %v4152_v11 = vld [vmem:[#allocation10 + $0x74] ss:$24 sps:$4 sm:$0xff]  }
  0xeb   : > { %v4155_v12 = vld [vmem:[#allocation8 + $0x64] ss:$24 sps:$4 sm:$0xff]   ;;  %v4150_v13 = vld [vmem:[#allocation10 + $0x70] ss:$24 sps:$4 sm:$0xff]   ;;  %v4153_v14 = vld [vmem:[#allocation8 + $0x60] ss:$24 sps:$4 sm:$0xff]  }
  0xec   : > { %1003 = vmatpush1.bf16.msra.mxu0 %v4080_v26  ;;  %v4158_v15 = vld [vmem:[#allocation10 + $0xa4] ss:$24 sps:$4 sm:$0xff]   ;;  %v4161_v16 = vld [vmem:[#allocation8 + $0x94] ss:$24 sps:$4 sm:$0xff]   ;;  %v4156_v17 = vld [vmem:[#allocation10 + $0xa0] ss:$24 sps:$4 sm:$0xff]  }
  0xed   : > { %1044 = vmatpush1.bf16.msra.mxu1 %v4081_v27  ;;  %1004 = vmatprep.subr.bf16.mxu0 %v4082_v28  ;;  %v4159_v18 = vld [vmem:[#allocation8 + $0x90] ss:$24 sps:$4 sm:$0xff]   ;;  %v4164_v19 = vld [vmem:[#allocation10 + $0xd4] ss:$24 sps:$4 sm:$0xff]   ;;  %v4167_v20 = vld [vmem:[#allocation8 + $0xc4] ss:$24 sps:$4 sm:$0xff]  }
  0xee   : > { %1045 = vmatprep.subr.bf16.mxu1 %v4084_v29  ;;  %v4162_v21 = vld [vmem:[#allocation10 + $0xd0] ss:$24 sps:$4 sm:$0xff]   ;;  %v4165_v22 = vld [vmem:[#allocation8 + $0xc0] ss:$24 sps:$4 sm:$0xff]   ;;  %v4170_v23 = vld [vmem:[#allocation10 + $0x104] ss:$24 sps:$4 sm:$0xff]  }
  0xef   : > { %v4173_v24 = vld [vmem:[#allocation8 + $0xf4] ss:$24 sps:$4 sm:$0xff]   ;;  %v4168_v25 = vld [vmem:[#allocation10 + $0x100] ss:$24 sps:$4 sm:$0xff]   ;;  %v4171_v26 = vld [vmem:[#allocation8 + $0xf0] ss:$24 sps:$4 sm:$0xff]  }
  0xf0   : > { %1005 = vmatpush1.bf16.msra.mxu0 %v4086_v30  ;;  %v4176_v27 = vld [vmem:[#allocation10 + $0x134] ss:$24 sps:$4 sm:$0xff]   ;;  %v4179_v28 = vld [vmem:[#allocation8 + $0x124] ss:$24 sps:$4 sm:$0xff]   ;;  %s403_s29 = scalar_lea.vmem [#allocation13], %s5195_s28  ;;  %vm3347_vm0 = vcmask 57344  }
  0xf1   : > { %1046 = vmatpush1.bf16.msra.mxu1 %v4087_v31  ;;  %1006 = vmatprep.subr.bf16.mxu0 %v4088_v32  ;;  %v5230_v29 = vld [vmem:[%s5207_s11] sm:$0xff]  ;;  %v4174_v31 = vld [vmem:[#allocation10 + $0x130] ss:$24 sps:$4 sm:$0xff]   ;;  %s3363_s21 = sshll.u32 %s403_s29, 4  ;;  %s5454_s19 = sld [smem:[#allocation27_spill]]  ;;  %s5346_s21 = int_to_ptr.vmem [resolvable:$true] %s3363_s21 }
  0xf2   : > { %1047 = vmatprep.subr.bf16.mxu1 %v4090_v33  ;;  %v5234_v30 = vcombine.high %v5230_v29, %v5230_v29  ;;  %v4177_v32 = vld [vmem:[#allocation8 + $0x120] ss:$24 sps:$4 sm:$0xff]   ;;  %v4182_v33 = vld [vmem:[#allocation10 + $0x164] ss:$24 sps:$4 sm:$0xff]   ;;  %s3350_s8 = scalar_lea.sflag [#allocation4], %s5195_s28  ;;  %s4798_s23 = scalar_lea.vmem %s5346_s21, 16 }
  0xf3   : > { %v4203_v46 = vld [vmem:[#allocation8 + $0x1e4] ss:$24 sps:$4 sm:$0xff]   ;;  %p4799_p1 = scmp.ne.s32.totalorder %s5346_s21, %s4798_s23  ;;  %p5455_p3 = scmp.ne.s32.totalorder %s5436_s15, 0 }
  0xf4   : > { %1007 = vmatpush1.bf16.msra.mxu0 %v4092_v34  ;;  %v4185_v34 = vld [vmem:[#allocation8 + $0x154] ss:$24 sps:$4 sm:$0xff]   ;;  %s4902_s24 = smov [#allocation13]  }
  0xf5   : > { %1048 = vmatpush1.bf16.msra.mxu1 %v4093_v35  ;;  %1008 = vmatprep.subr.bf16.mxu0 %v4094_v36  ;;  %v4180_v35 = vld [vmem:[#allocation10 + $0x160] ss:$24 sps:$4 sm:$0xff]   ;;  %v4183_v36 = vld [vmem:[#allocation8 + $0x150] ss:$24 sps:$4 sm:$0xff]   ;;  %p4800_p6 = pnand %p4799_p1, %p5455_p3  ;;  %s4802_s18 = sshll.u32 %s4902_s24, 4  ;;  %s4803_s18 = int_to_ptr.vmem [resolvable:$false] %s4802_s18 }
  0xf6   : > { %1049 = vmatprep.subr.bf16.mxu1 %v4096_v37  ;;  %v4188_v37 = vld [vmem:[#allocation10 + $0x194] ss:$24 sps:$4 sm:$0xff]   ;;  %s4804_s16 = scalar_lea.vmem %s4803_s18, 32  ;;  %p4805_p8 = scmp.lt.s32.totalorder %s5346_s21, %s4803_s18 }
  0xf7   : > { %s5344_s10 = scalar_lea.hbm %s5454_s19, %s3925_s27  ;;  %p4801_p11 = pneg %p4800_p6 }
  0xf8   : > { %1009 = vmatpush1.bf16.msra.mxu0 %v4098_v38  ;;  %v4191_v38 = vld [vmem:[#allocation8 + $0x184] ss:$24 sps:$4 sm:$0xff]   ;;  %p4806_p10 = scmp.lt.s32.totalorder %s4804_s16, %s4798_s23 }
  0xf9   : > { %1050 = vmatpush1.bf16.msra.mxu1 %v4099_v39  ;;  %1010 = vmatprep.subr.bf16.mxu0 %v4100_v40  ;;  %v4186_v39 = vld [vmem:[#allocation10 + $0x190] ss:$24 sps:$4 sm:$0xff]   ;;  %v4189_v40 = vld [vmem:[#allocation8 + $0x180] ss:$24 sps:$4 sm:$0xff]  }
  0xfa   : > { %1051 = vmatprep.subr.bf16.mxu1 %v4102_v41  ;;  %v4194_v41 = vld [vmem:[#allocation10 + $0x1c4] ss:$24 sps:$4 sm:$0xff]   ;;  %p4807_p0 = por %p4806_p10, %p4805_p8 }
  0xfc   : > { %1011 = vmatpush1.bf16.msra.mxu0 %v4104_v42  ;;  %v4197_v42 = vld [vmem:[#allocation8 + $0x1b4] ss:$24 sps:$4 sm:$0xff]   ;;  %p4808_p5 = pnand %p4807_p0, %p4801_p11 }
  0xfd   : > { %1052 = vmatpush1.bf16.msra.mxu1 %v4105_v43  ;;  %1012 = vmatprep.subr.bf16.mxu0 %v4106_v44  ;;  %v4192_v43 = vld [vmem:[#allocation10 + $0x1c0] ss:$24 sps:$4 sm:$0xff]   ;;  %v4195_v44 = vld [vmem:[#allocation8 + $0x1b0] ss:$24 sps:$4 sm:$0xff]  }
  0xfe   : > { %1053 = vmatprep.subr.bf16.mxu1 %v4108_v45  ;;  %v4200_v45 = vld [vmem:[#allocation10 + $0x1f4] ss:$24 sps:$4 sm:$0xff]  }
 0x100   : > { %1013 = vmatpush1.bf16.msra.mxu0 %v4110_v47  ;;  %v4198_v47 = vld [vmem:[#allocation10 + $0x1f0] ss:$24 sps:$4 sm:$0xff]  }
 0x101   : > { %1054 = vmatpush1.bf16.msra.mxu1 %v4111_v49  ;;  %1014 = vmatprep.subr.bf16.mxu0 %v4112_v50  ;;  %v4206_v49 = vld [vmem:[#allocation10 + $0x224] ss:$24 sps:$4 sm:$0xff]   ;;  %v4209_v50 = vld [vmem:[#allocation8 + $0x214] ss:$24 sps:$4 sm:$0xff]  }
 0x102   : > { %1055 = vmatprep.subr.bf16.mxu1 %v4114_v51  ;;  %v4204_v51 = vld [vmem:[#allocation10 + $0x220] ss:$24 sps:$4 sm:$0xff]  }
 0x104   : > { %1015 = vmatpush1.bf16.msra.mxu0 %v4116_v52  ;;  %v4207_v52 = vld [vmem:[#allocation8 + $0x210] ss:$24 sps:$4 sm:$0xff]  }
 0x105   : > { %1056 = vmatpush1.bf16.msra.mxu1 %v4117_v53  ;;  %1016 = vmatprep.subr.bf16.mxu0 %v4118_v54  ;;  %v4212_v53 = vld [vmem:[#allocation10 + $0x254] ss:$24 sps:$4 sm:$0xff]   ;;  %v4215_v54 = vld [vmem:[#allocation8 + $0x244] ss:$24 sps:$4 sm:$0xff]  }
 0x106   : > { %1057 = vmatprep.subr.bf16.mxu1 %v4120_v55  ;;  %v4210_v55 = vld [vmem:[#allocation10 + $0x250] ss:$24 sps:$4 sm:$0xff]  }
 0x108   : > { %1017 = vmatpush1.bf16.msra.mxu0 %v4122_v56  ;;  %v4213_v56 = vld [vmem:[#allocation8 + $0x240] ss:$24 sps:$4 sm:$0xff]  }
 0x109   : > { %1058 = vmatpush1.bf16.msra.mxu1 %v4123_v57  ;;  %1018 = vmatprep.subr.bf16.mxu0 %v4124_v58  ;;  %v4218_v57 = vld [vmem:[#allocation10 + $0x284] ss:$24 sps:$4 sm:$0xff]   ;;  %v4221_v58 = vld [vmem:[#allocation8 + $0x274] ss:$24 sps:$4 sm:$0xff]  }
 0x10a   : > { %1059 = vmatprep.subr.bf16.mxu1 %v4126_v59  ;;  %v4216_v59 = vld [vmem:[#allocation10 + $0x280] ss:$24 sps:$4 sm:$0xff]  }
 0x10c   : > { %1019 = vmatpush1.bf16.msra.mxu0 %v4128_v60  ;;  %v4219_v60 = vld [vmem:[#allocation8 + $0x270] ss:$24 sps:$4 sm:$0xff]  }
 0x10d   : > { %1060 = vmatpush1.bf16.msra.mxu1 %v4129_v61  ;;  %1020 = vmatprep.subr.bf16.mxu0 %v4130_v62  ;;  %v4224_v61 = vld [vmem:[#allocation10 + $0x2b4] ss:$24 sps:$4 sm:$0xff]   ;;  %v4227_v62 = vld [vmem:[#allocation8 + $0x2a4] ss:$24 sps:$4 sm:$0xff]  }
 0x10e   : > { %1061 = vmatprep.subr.bf16.mxu1 %v4132_v63  ;;  %v4222_v63 = vld [vmem:[#allocation10 + $0x2b0] ss:$24 sps:$4 sm:$0xff]  }
 0x110   : > { %1021 = vmatpush1.bf16.msra.mxu0 %v4134_v0  ;;  %v4225_v0 = vld [vmem:[#allocation8 + $0x2a0] ss:$24 sps:$4 sm:$0xff]  }
 0x111   : > { %1062 = vmatpush1.bf16.msra.mxu1 %v4135_v1  ;;  %1072 = vmatprep.subr.bf16.mxu0 %v4140_v2  ;;  %v4230_v1 = vld [vmem:[#allocation10 + $0x2e4] ss:$24 sps:$4 sm:$0xff]   ;;  %v4233_v2 = vld [vmem:[#allocation8 + $0x2d4] ss:$24 sps:$4 sm:$0xff]  }
 0x112   : > { %2865 = vmatprep.subr.bf16.mxu1 %v4143_v3  ;;  %v4228_v3 = vld [vmem:[#allocation10 + $0x2e0] ss:$24 sps:$4 sm:$0xff]  }
 0x113   : > { %1023 = vmatmul.mubr.bf16.vlgmr.msra.gmra.mrb[0].mxu0 %v5225_v4 }
 0x114   : > { %1064 = vmatmul.mubr.bf16.vlgmr.msra.gmra.mrb[0].mxu1 %v5225_v4  ;;  %1073 = vmatpush1.bf16.msra.mxu0 %v4138_v5  ;;  %v4231_v5 = vld [vmem:[#allocation8 + $0x2d0] ss:$24 sps:$4 sm:$0xff]  }
 0x115   : > { %2866 = vmatpush1.bf16.msra.mxu1 %v4141_v6  ;;  %1074 = vmatprep.subr.bf16.mxu0 %v4146_v7  ;;  %v4238_v6 = vld [vmem:[#allocation8 + $0x304] ss:$24 sps:$4 sm:$0xff]  }
 0x116   : > { %2867 = vmatprep.subr.bf16.mxu1 %v4149_v8  ;;  %1104 = vmatprep.mubr.bf16.mxu0 %v3534_v48  ;;  %v4201_v48 = vld [vmem:[#allocation8 + $0x1e0] ss:$24 sps:$4 sm:$0xff]   ;;  %v4241_v7 = vld [vmem:[#allocation8 + $0x604] ss:$24 sps:$4 sm:$0xff]  }
 0x117   : > { %2897 = vmatprep.mubr.bf16.mxu1 %v5234_v30  ;;  %v4236_v8 = vld [vmem:[#allocation8 + $0x300] ss:$24 sps:$4 sm:$0xff]  }
 0x118   : > { %1075 = vmatpush1.bf16.msra.mxu0 %v4144_v9  ;;  %v5239_v9 = vcombine.low %v5230_v29, %v5230_v29  ;;  %v4263_v29 = vld [vmem:[#allocation8 + $0x6c0] ss:$24 sps:$4 sm:$0xff]  }
 0x119   : > { %2868 = vmatpush1.bf16.msra.mxu1 %v4147_v10  ;;  %1076 = vmatprep.subr.bf16.mxu0 %v4152_v11  ;;  %v4239_v10 = vld [vmem:[#allocation8 + $0x600] ss:$24 sps:$4 sm:$0xff]   ;;  %v4244_v11 = vld [vmem:[#allocation8 + $0x334] ss:$24 sps:$4 sm:$0xff]  }
 0x11a   : > { %2869 = vmatprep.subr.bf16.mxu1 %v4155_v12  ;;  %v4247_v12 = vld [vmem:[#allocation8 + $0x634] ss:$24 sps:$4 sm:$0xff]  }
 0x11c   : > { %1077 = vmatpush1.bf16.msra.mxu0 %v4150_v13  ;;  %v5242_v13 = vld [vmem:[%s5207_s11 + $0x8] sm:$0xff] }
 0x11d   : > { %2870 = vmatpush1.bf16.msra.mxu1 %v4153_v14  ;;  %1078 = vmatprep.subr.bf16.mxu0 %v4158_v15  ;;  %v5245_v14 = vld [vmem:[%s5207_s11 + $0x10] sm:$0xff]  ;;  %v5249_v15 = vcombine.high %v5242_v13, %v5242_v13 }
 0x11e   : > { %2871 = vmatprep.subr.bf16.mxu1 %v4161_v16  ;;  %v5253_v16 = vcombine.high %v5245_v14, %v5245_v14 }
 0x120   : > { %1079 = vmatpush1.bf16.msra.mxu0 %v4156_v17  ;;  %v4242_v17 = vld [vmem:[#allocation8 + $0x330] ss:$24 sps:$4 sm:$0xff]  }
 0x121   : > { %2872 = vmatpush1.bf16.msra.mxu1 %v4159_v18  ;;  %1080 = vmatprep.subr.bf16.mxu0 %v4164_v19  ;;  %v4245_v18 = vld [vmem:[#allocation8 + $0x630] ss:$24 sps:$4 sm:$0xff]   ;;  %v4250_v19 = vld [vmem:[#allocation8 + $0x364] ss:$24 sps:$4 sm:$0xff]  }
 0x122   : > { %2873 = vmatprep.subr.bf16.mxu1 %v4167_v20  ;;  %v4253_v20 = vld [vmem:[#allocation8 + $0x664] ss:$24 sps:$4 sm:$0xff]  }
 0x124   : > { %1081 = vmatpush1.bf16.msra.mxu0 %v4162_v21  ;;  %v4248_v21 = vld [vmem:[#allocation8 + $0x360] ss:$24 sps:$4 sm:$0xff]  }
 0x125   : > { %2874 = vmatpush1.bf16.msra.mxu1 %v4165_v22  ;;  %1082 = vmatprep.subr.bf16.mxu0 %v4170_v23  ;;  %v4251_v22 = vld [vmem:[#allocation8 + $0x660] ss:$24 sps:$4 sm:$0xff]   ;;  %v4256_v23 = vld [vmem:[#allocation8 + $0x394] ss:$24 sps:$4 sm:$0xff]  }
 0x126   : > { %2875 = vmatprep.subr.bf16.mxu1 %v4173_v24  ;;  %v4254_v24 = vld [vmem:[#allocation8 + $0x390] ss:$24 sps:$4 sm:$0xff]  }
 0x128   : > { %1083 = vmatpush1.bf16.msra.mxu0 %v4168_v25  ;;  %v4257_v25 = vld [vmem:[#allocation8 + $0x690] ss:$24 sps:$4 sm:$0xff]  }
 0x129   : > { %2876 = vmatpush1.bf16.msra.mxu1 %v4171_v26  ;;  %1084 = vmatprep.subr.bf16.mxu0 %v4176_v27  ;;  %v4262_v26 = vld [vmem:[#allocation8 + $0x3c4] ss:$24 sps:$4 sm:$0xff]  }
 0x12a   : > { %2877 = vmatprep.subr.bf16.mxu1 %v4179_v28  ;;  %v4265_v27 = vld [vmem:[#allocation8 + $0x6c4] ss:$24 sps:$4 sm:$0xff]   ;;  %v4260_v28 = vld [vmem:[#allocation8 + $0x3c0] ss:$24 sps:$4 sm:$0xff]  }
 0x12c   : > { %1085 = vmatpush1.bf16.msra.mxu0 %v4174_v31  ;;  %v4268_v31 = vld [vmem:[#allocation8 + $0x3f4] ss:$24 sps:$4 sm:$0xff]  }
 0x12d   : > { %2878 = vmatpush1.bf16.msra.mxu1 %v4177_v32  ;;  %1086 = vmatprep.subr.bf16.mxu0 %v4182_v33  ;;  %v4271_v32 = vld [vmem:[#allocation8 + $0x6f4] ss:$24 sps:$4 sm:$0xff]   ;;  %v4266_v33 = vld [vmem:[#allocation8 + $0x3f0] ss:$24 sps:$4 sm:$0xff]  }
 0x12e   : > { %2879 = vmatprep.subr.bf16.mxu1 %v4185_v34  ;;  %v4269_v34 = vld [vmem:[#allocation8 + $0x6f0] ss:$24 sps:$4 sm:$0xff]  }
 0x130   : > { %1087 = vmatpush1.bf16.msra.mxu0 %v4180_v35  ;;  %v4274_v35 = vld [vmem:[#allocation8 + $0x424] ss:$24 sps:$4 sm:$0xff]  }
 0x131   : > { %2880 = vmatpush1.bf16.msra.mxu1 %v4183_v36  ;;  %1088 = vmatprep.subr.bf16.mxu0 %v4188_v37  ;;  %v4277_v36 = vld [vmem:[#allocation8 + $0x724] ss:$24 sps:$4 sm:$0xff]   ;;  %v4272_v37 = vld [vmem:[#allocation8 + $0x420] ss:$24 sps:$4 sm:$0xff]  }
 0x132   : > { %2881 = vmatprep.subr.bf16.mxu1 %v4191_v38  ;;  %v4275_v38 = vld [vmem:[#allocation8 + $0x720] ss:$24 sps:$4 sm:$0xff]  }
 0x134   : > { %1089 = vmatpush1.bf16.msra.mxu0 %v4186_v39  ;;  %v4280_v39 = vld [vmem:[#allocation8 + $0x454] ss:$24 sps:$4 sm:$0xff]  }
 0x135   : > { %2882 = vmatpush1.bf16.msra.mxu1 %v4189_v40  ;;  %1090 = vmatprep.subr.bf16.mxu0 %v4194_v41  ;;  %v4283_v40 = vld [vmem:[#allocation8 + $0x754] ss:$24 sps:$4 sm:$0xff]   ;;  %v4278_v41 = vld [vmem:[#allocation8 + $0x450] ss:$24 sps:$4 sm:$0xff]  }
 0x136   : > { %2883 = vmatprep.subr.bf16.mxu1 %v4197_v42  ;;  %v4281_v42 = vld [vmem:[#allocation8 + $0x750] ss:$24 sps:$4 sm:$0xff]  }
 0x138   : > { %1091 = vmatpush1.bf16.msra.mxu0 %v4192_v43  ;;  %v4286_v43 = vld [vmem:[#allocation8 + $0x484] ss:$24 sps:$4 sm:$0xff]  }
 0x139   : > { %2884 = vmatpush1.bf16.msra.mxu1 %v4195_v44  ;;  %1092 = vmatprep.subr.bf16.mxu0 %v4200_v45  ;;  %v4289_v44 = vld [vmem:[#allocation8 + $0x784] ss:$24 sps:$4 sm:$0xff]   ;;  %v4284_v45 = vld [vmem:[#allocation8 + $0x480] ss:$24 sps:$4 sm:$0xff]  }
 0x13a   : > { %2885 = vmatprep.subr.bf16.mxu1 %v4203_v46  ;;  %v4287_v46 = vld [vmem:[#allocation8 + $0x780] ss:$24 sps:$4 sm:$0xff]  }
 0x13c   : > { %1093 = vmatpush1.bf16.msra.mxu0 %v4198_v47  ;;  %v4292_v47 = vld [vmem:[#allocation8 + $0x4b4] ss:$24 sps:$4 sm:$0xff]  }
 0x13d   : > { %2886 = vmatpush1.bf16.msra.mxu1 %v4201_v48  ;;  %1094 = vmatprep.subr.bf16.mxu0 %v4206_v49  ;;  %v4295_v48 = vld [vmem:[#allocation8 + $0x7b4] ss:$24 sps:$4 sm:$0xff]   ;;  %v4290_v49 = vld [vmem:[#allocation8 + $0x4b0] ss:$24 sps:$4 sm:$0xff]  }
 0x13e   : > { %2887 = vmatprep.subr.bf16.mxu1 %v4209_v50  ;;  %v4293_v50 = vld [vmem:[#allocation8 + $0x7b0] ss:$24 sps:$4 sm:$0xff]  }
 0x140   : > { %1095 = vmatpush1.bf16.msra.mxu0 %v4204_v51  ;;  %v4298_v51 = vld [vmem:[#allocation8 + $0x4e4] ss:$24 sps:$4 sm:$0xff]  }
 0x141   : > { %2888 = vmatpush1.bf16.msra.mxu1 %v4207_v52  ;;  %1096 = vmatprep.subr.bf16.mxu0 %v4212_v53  ;;  %v4301_v52 = vld [vmem:[#allocation8 + $0x7e4] ss:$24 sps:$4 sm:$0xff]   ;;  %v4296_v53 = vld [vmem:[#allocation8 + $0x4e0] ss:$24 sps:$4 sm:$0xff]  }
 0x142   : > { %2889 = vmatprep.subr.bf16.mxu1 %v4215_v54  ;;  %v4299_v54 = vld [vmem:[#allocation8 + $0x7e0] ss:$24 sps:$4 sm:$0xff]  }
 0x144   : > { %1097 = vmatpush1.bf16.msra.mxu0 %v4210_v55  ;;  %v4304_v55 = vld [vmem:[#allocation8 + $0x514] ss:$24 sps:$4 sm:$0xff]  }
 0x145   : > { %2890 = vmatpush1.bf16.msra.mxu1 %v4213_v56  ;;  %1098 = vmatprep.subr.bf16.mxu0 %v4218_v57  ;;  %v4307_v56 = vld [vmem:[#allocation8 + $0x814] ss:$24 sps:$4 sm:$0xff]   ;;  %v4302_v57 = vld [vmem:[#allocation8 + $0x510] ss:$24 sps:$4 sm:$0xff]  }
 0x146   : > { %2891 = vmatprep.subr.bf16.mxu1 %v4221_v58  ;;  %v4305_v58 = vld [vmem:[#allocation8 + $0x810] ss:$24 sps:$4 sm:$0xff]  }
 0x148   : > { %1099 = vmatpush1.bf16.msra.mxu0 %v4216_v59  ;;  %v4310_v59 = vld [vmem:[#allocation8 + $0x544] ss:$24 sps:$4 sm:$0xff]  }
 0x149   : > { %2892 = vmatpush1.bf16.msra.mxu1 %v4219_v60  ;;  %1100 = vmatprep.subr.bf16.mxu0 %v4224_v61  ;;  %v4313_v60 = vld [vmem:[#allocation8 + $0x844] ss:$24 sps:$4 sm:$0xff]   ;;  %v4308_v61 = vld [vmem:[#allocation8 + $0x540] ss:$24 sps:$4 sm:$0xff]  }
 0x14a   : > { %2893 = vmatprep.subr.bf16.mxu1 %v4227_v62  ;;  %v4311_v62 = vld [vmem:[#allocation8 + $0x840] ss:$24 sps:$4 sm:$0xff]  }
 0x14c   : > { %1101 = vmatpush1.bf16.msra.mxu0 %v4222_v63  ;;  %v4316_v63 = vld [vmem:[#allocation8 + $0x574] ss:$24 sps:$4 sm:$0xff]  }
 0x14d   : > { %2894 = vmatpush1.bf16.msra.mxu1 %v4225_v0  ;;  %1102 = vmatprep.subr.bf16.mxu0 %v4230_v1  ;;  %v4319_v0 = vld [vmem:[#allocation8 + $0x874] ss:$24 sps:$4 sm:$0xff]   ;;  %v4314_v1 = vld [vmem:[#allocation8 + $0x570] ss:$24 sps:$4 sm:$0xff]  }
 0x14e   : > { %2895 = vmatprep.subr.bf16.mxu1 %v4233_v2  ;;  %v4317_v2 = vld [vmem:[#allocation8 + $0x870] ss:$24 sps:$4 sm:$0xff]  }
 0x150   : > { %1103 = vmatpush1.bf16.msra.mxu0 %v4228_v3  ;;  %v4322_v3 = vld [vmem:[#allocation8 + $0x5a4] ss:$24 sps:$4 sm:$0xff]  }
 0x151   : > { %2896 = vmatpush1.bf16.msra.mxu1 %v4231_v5  ;;  %2906 = vmatprep.subr.bf16.mxu0 %v4238_v6  ;;  %v4325_v5 = vld [vmem:[#allocation8 + $0x8a4] ss:$24 sps:$4 sm:$0xff]   ;;  %v4320_v6 = vld [vmem:[#allocation8 + $0x5a0] ss:$24 sps:$4 sm:$0xff]  }
 0x152   : > { %2947 = vmatprep.subr.bf16.mxu1 %v4241_v7  ;;  %v4323_v7 = vld [vmem:[#allocation8 + $0x8a0] ss:$24 sps:$4 sm:$0xff]  }
 0x153   : > { %1105 = vmatmul.mubr.bf16.vlgmr.msra.gmra.mrb[4].mxu0 %v5225_v4  ;;  %v4259_v4 = vld [vmem:[#allocation8 + $0x694] ss:$24 sps:$4 sm:$0xff]  }
 0x154   : > { %2898 = vmatmul.mubr.bf16.vlgmr.msra.gmra.mrb[4].mxu1 %v5239_v9  ;;  %2907 = vmatpush1.bf16.msra.mxu0 %v4236_v8  ;;  %v4328_v8 = vld [vmem:[#allocation8 + $0x5d4] ss:$24 sps:$4 sm:$0xff]  }
 0x155   : > { %2948 = vmatpush1.bf16.msra.mxu1 %v4239_v10  ;;  %2908 = vmatprep.subr.bf16.mxu0 %v4244_v11  ;;  %v4331_v10 = vld [vmem:[#allocation8 + $0x8d4] ss:$24 sps:$4 sm:$0xff]   ;;  %v4326_v11 = vld [vmem:[#allocation8 + $0x5d0] ss:$24 sps:$4 sm:$0xff]  }
 0x156   : > { %2949 = vmatprep.subr.bf16.mxu1 %v4247_v12  ;;  %2938 = vmatprep.mubr.bf16.mxu0 %v5249_v15  ;;  %v4329_v12 = vld [vmem:[#allocation8 + $0x8d0] ss:$24 sps:$4 sm:$0xff]  }
 0x157   : > { %2979 = vmatprep.mubr.bf16.mxu1 %v5253_v16 }
 0x158   : > { %2909 = vmatpush1.bf16.msra.mxu0 %v4242_v17  ;;  %v4338_v17 = vld [vmem:[#allocation8 + $0xc] ss:$24 sps:$4 sm:$0xff]  }
 0x159   : > { %2950 = vmatpush1.bf16.msra.mxu1 %v4245_v18  ;;  %2910 = vmatprep.subr.bf16.mxu0 %v4250_v19  ;;  %v4341_v18 = vld [vmem:[#allocation8 + $0x30c] ss:$24 sps:$4 sm:$0xff]   ;;  %v5261_v19 = vcombine.low %v5242_v13, %v5242_v13  ;;  %v4342_v13 = vld [vmem:[#allocation8 + $0x38] ss:$24 sps:$4 sm:$0xff]  }
 0x15a   : > { %2951 = vmatprep.subr.bf16.mxu1 %v4253_v20  ;;  %v5265_v20 = vcombine.low %v5245_v14, %v5245_v14  ;;  %v4350_v14 = vld [vmem:[#allocation8 + $0x6c] ss:$24 sps:$4 sm:$0xff]  }
 0x15c   : > { %2911 = vmatpush1.bf16.msra.mxu0 %v4248_v21  ;;  %v4336_v21 = vld [vmem:[#allocation8 + $0x8] ss:$24 sps:$4 sm:$0xff]  }
 0x15d   : > { %2952 = vmatpush1.bf16.msra.mxu1 %v4251_v22  ;;  %2912 = vmatprep.subr.bf16.mxu0 %v4256_v23  ;;  %v4339_v22 = vld [vmem:[#allocation8 + $0x308] ss:$24 sps:$4 sm:$0xff]   ;;  %v4344_v23 = vld [vmem:[#allocation8 + $0x3c] ss:$24 sps:$4 sm:$0xff]  }
 0x15e   : > { %2953 = vmatprep.subr.bf16.mxu1 %v4259_v4  ;;  %v4347_v4 = vld [vmem:[#allocation8 + $0x33c] ss:$24 sps:$4 sm:$0xff]  }
 0x160   : > { %2913 = vmatpush1.bf16.msra.mxu0 %v4254_v24  ;;  %v4345_v24 = vld [vmem:[#allocation8 + $0x338] ss:$24 sps:$4 sm:$0xff]  }
 0x161   : > { %2954 = vmatpush1.bf16.msra.mxu1 %v4257_v25  ;;  %2914 = vmatprep.subr.bf16.mxu0 %v4262_v26  ;;  %v4353_v25 = vld [vmem:[#allocation8 + $0x36c] ss:$24 sps:$4 sm:$0xff]   ;;  %v4348_v26 = vld [vmem:[#allocation8 + $0x68] ss:$24 sps:$4 sm:$0xff]  }
 0x162   : > { %2955 = vmatprep.subr.bf16.mxu1 %v4265_v27  ;;  %v4351_v27 = vld [vmem:[#allocation8 + $0x368] ss:$24 sps:$4 sm:$0xff]  }
 0x164   : > { %2915 = vmatpush1.bf16.msra.mxu0 %v4260_v28  ;;  %v4356_v28 = vld [vmem:[#allocation8 + $0x9c] ss:$24 sps:$4 sm:$0xff]  }
 0x165   : > { %2956 = vmatpush1.bf16.msra.mxu1 %v4263_v29  ;;  %2916 = vmatprep.subr.bf16.mxu0 %v4268_v31  ;;  %v4359_v29 = vld [vmem:[#allocation8 + $0x39c] ss:$24 sps:$4 sm:$0xff]   ;;  %v4354_v31 = vld [vmem:[#allocation8 + $0x98] ss:$24 sps:$4 sm:$0xff]  }
 0x166   : > { %2957 = vmatprep.subr.bf16.mxu1 %v4271_v32  ;;  %v4357_v32 = vld [vmem:[#allocation8 + $0x398] ss:$24 sps:$4 sm:$0xff]  }
 0x168   : > { %2917 = vmatpush1.bf16.msra.mxu0 %v4266_v33  ;;  %v4362_v33 = vld [vmem:[#allocation8 + $0xcc] ss:$24 sps:$4 sm:$0xff]  }
 0x169   : > { %2958 = vmatpush1.bf16.msra.mxu1 %v4269_v34  ;;  %2918 = vmatprep.subr.bf16.mxu0 %v4274_v35  ;;  %v4365_v34 = vld [vmem:[#allocation8 + $0x3cc] ss:$24 sps:$4 sm:$0xff]   ;;  %v4360_v35 = vld [vmem:[#allocation8 + $0xc8] ss:$24 sps:$4 sm:$0xff]  }
 0x16a   : > { %2959 = vmatprep.subr.bf16.mxu1 %v4277_v36  ;;  %v4363_v36 = vld [vmem:[#allocation8 + $0x3c8] ss:$24 sps:$4 sm:$0xff]  }
 0x16c   : > { %2919 = vmatpush1.bf16.msra.mxu0 %v4272_v37  ;;  %v4368_v37 = vld [vmem:[#allocation8 + $0xfc] ss:$24 sps:$4 sm:$0xff]  }
 0x16d   : > { %2960 = vmatpush1.bf16.msra.mxu1 %v4275_v38  ;;  %2920 = vmatprep.subr.bf16.mxu0 %v4280_v39  ;;  %v4371_v38 = vld [vmem:[#allocation8 + $0x3fc] ss:$24 sps:$4 sm:$0xff]   ;;  %v4366_v39 = vld [vmem:[#allocation8 + $0xf8] ss:$24 sps:$4 sm:$0xff]  }
 0x16e   : > { %2961 = vmatprep.subr.bf16.mxu1 %v4283_v40  ;;  %v4369_v40 = vld [vmem:[#allocation8 + $0x3f8] ss:$24 sps:$4 sm:$0xff]  }
 0x170   : > { %2921 = vmatpush1.bf16.msra.mxu0 %v4278_v41  ;;  %v4374_v41 = vld [vmem:[#allocation8 + $0x12c] ss:$24 sps:$4 sm:$0xff]  }
 0x171   : > { %2962 = vmatpush1.bf16.msra.mxu1 %v4281_v42  ;;  %2922 = vmatprep.subr.bf16.mxu0 %v4286_v43  ;;  %v4377_v42 = vld [vmem:[#allocation8 + $0x42c] ss:$24 sps:$4 sm:$0xff]   ;;  %v4372_v43 = vld [vmem:[#allocation8 + $0x128] ss:$24 sps:$4 sm:$0xff]  }
 0x172   : > { %2963 = vmatprep.subr.bf16.mxu1 %v4289_v44  ;;  %v4375_v44 = vld [vmem:[#allocation8 + $0x428] ss:$24 sps:$4 sm:$0xff]  }
 0x174   : > { %2923 = vmatpush1.bf16.msra.mxu0 %v4284_v45  ;;  %v4380_v45 = vld [vmem:[#allocation8 + $0x15c] ss:$24 sps:$4 sm:$0xff]  }
 0x175   : > { %2964 = vmatpush1.bf16.msra.mxu1 %v4287_v46  ;;  %2924 = vmatprep.subr.bf16.mxu0 %v4292_v47  ;;  %v4383_v46 = vld [vmem:[#allocation8 + $0x45c] ss:$24 sps:$4 sm:$0xff]   ;;  %v4378_v47 = vld [vmem:[#allocation8 + $0x158] ss:$24 sps:$4 sm:$0xff]  }
 0x176   : > { %2965 = vmatprep.subr.bf16.mxu1 %v4295_v48  ;;  %v4381_v48 = vld [vmem:[#allocation8 + $0x458] ss:$24 sps:$4 sm:$0xff]  }
 0x178   : > { %2925 = vmatpush1.bf16.msra.mxu0 %v4290_v49  ;;  %v4386_v49 = vld [vmem:[#allocation8 + $0x18c] ss:$24 sps:$4 sm:$0xff]  }
 0x179   : > { %2966 = vmatpush1.bf16.msra.mxu1 %v4293_v50  ;;  %2926 = vmatprep.subr.bf16.mxu0 %v4298_v51  ;;  %v4389_v50 = vld [vmem:[#allocation8 + $0x48c] ss:$24 sps:$4 sm:$0xff]   ;;  %v4384_v51 = vld [vmem:[#allocation8 + $0x188] ss:$24 sps:$4 sm:$0xff]  }
 0x17a   : > { %2967 = vmatprep.subr.bf16.mxu1 %v4301_v52  ;;  %v4387_v52 = vld [vmem:[#allocation8 + $0x488] ss:$24 sps:$4 sm:$0xff]  }
 0x17c   : > { %2927 = vmatpush1.bf16.msra.mxu0 %v4296_v53  ;;  %v4392_v53 = vld [vmem:[#allocation8 + $0x1bc] ss:$24 sps:$4 sm:$0xff]  }
 0x17d   : > { %2968 = vmatpush1.bf16.msra.mxu1 %v4299_v54  ;;  %2928 = vmatprep.subr.bf16.mxu0 %v4304_v55  ;;  %v4395_v54 = vld [vmem:[#allocation8 + $0x4bc] ss:$24 sps:$4 sm:$0xff]   ;;  %v4390_v55 = vld [vmem:[#allocation8 + $0x1b8] ss:$24 sps:$4 sm:$0xff]  }
 0x17e   : > { %2969 = vmatprep.subr.bf16.mxu1 %v4307_v56  ;;  %v4393_v56 = vld [vmem:[#allocation8 + $0x4b8] ss:$24 sps:$4 sm:$0xff]  }
 0x180   : > { %2929 = vmatpush1.bf16.msra.mxu0 %v4302_v57  ;;  %v4398_v57 = vld [vmem:[#allocation8 + $0x1ec] ss:$24 sps:$4 sm:$0xff]  }
 0x181   : > { %2970 = vmatpush1.bf16.msra.mxu1 %v4305_v58  ;;  %2930 = vmatprep.subr.bf16.mxu0 %v4310_v59  ;;  %v4401_v58 = vld [vmem:[#allocation8 + $0x4ec] ss:$24 sps:$4 sm:$0xff]   ;;  %v4396_v59 = vld [vmem:[#allocation8 + $0x1e8] ss:$24 sps:$4 sm:$0xff]  }
 0x182   : > { %2971 = vmatprep.subr.bf16.mxu1 %v4313_v60  ;;  %v4399_v60 = vld [vmem:[#allocation8 + $0x4e8] ss:$24 sps:$4 sm:$0xff]  }
 0x184   : > { %2931 = vmatpush1.bf16.msra.mxu0 %v4308_v61  ;;  %v4404_v61 = vld [vmem:[#allocation8 + $0x21c] ss:$24 sps:$4 sm:$0xff]  }
 0x185   : > { %2972 = vmatpush1.bf16.msra.mxu1 %v4311_v62  ;;  %2932 = vmatprep.subr.bf16.mxu0 %v4316_v63  ;;  %v4407_v62 = vld [vmem:[#allocation8 + $0x51c] ss:$24 sps:$4 sm:$0xff]   ;;  %v4402_v63 = vld [vmem:[#allocation8 + $0x218] ss:$24 sps:$4 sm:$0xff]  }
 0x186   : > { %2973 = vmatprep.subr.bf16.mxu1 %v4319_v0  ;;  %v4405_v0 = vld [vmem:[#allocation8 + $0x518] ss:$24 sps:$4 sm:$0xff]  }
 0x188   : > { %2933 = vmatpush1.bf16.msra.mxu0 %v4314_v1  ;;  %v4410_v1 = vld [vmem:[#allocation8 + $0x24c] ss:$24 sps:$4 sm:$0xff]  }
 0x189   : > { %2974 = vmatpush1.bf16.msra.mxu1 %v4317_v2  ;;  %2934 = vmatprep.subr.bf16.mxu0 %v4322_v3  ;;  %v4413_v2 = vld [vmem:[#allocation8 + $0x54c] ss:$24 sps:$4 sm:$0xff]   ;;  %v4408_v3 = vld [vmem:[#allocation8 + $0x248] ss:$24 sps:$4 sm:$0xff]  }
 0x18a   : > { %2975 = vmatprep.subr.bf16.mxu1 %v4325_v5  ;;  %v4411_v5 = vld [vmem:[#allocation8 + $0x548] ss:$24 sps:$4 sm:$0xff]  }
 0x18c   : > { %2935 = vmatpush1.bf16.msra.mxu0 %v4320_v6  ;;  %v4416_v6 = vld [vmem:[#allocation8 + $0x27c] ss:$24 sps:$4 sm:$0xff]  }
 0x18d   : > { %2976 = vmatpush1.bf16.msra.mxu1 %v4323_v7  ;;  %2936 = vmatprep.subr.bf16.mxu0 %v4328_v8  ;;  %v4419_v7 = vld [vmem:[#allocation8 + $0x57c] ss:$24 sps:$4 sm:$0xff]   ;;  %v4414_v8 = vld [vmem:[#allocation8 + $0x278] ss:$24 sps:$4 sm:$0xff]  }
 0x18e   : > { %2977 = vmatprep.subr.bf16.mxu1 %v4331_v10  ;;  %v4417_v10 = vld [vmem:[#allocation8 + $0x578] ss:$24 sps:$4 sm:$0xff]  }
 0x190   : > { %2937 = vmatpush1.bf16.msra.mxu0 %v4326_v11  ;;  %v4422_v11 = vld [vmem:[#allocation8 + $0x2ac] ss:$24 sps:$4 sm:$0xff]  }
 0x191   : > { %2978 = vmatpush1.bf16.msra.mxu1 %v4329_v12  ;;  %2988 = vmatprep.subr.bf16.mxu0 %v4338_v17  ;;  %v4425_v12 = vld [vmem:[#allocation8 + $0x5ac] ss:$24 sps:$4 sm:$0xff]   ;;  %v4420_v17 = vld [vmem:[#allocation8 + $0x2a8] ss:$24 sps:$4 sm:$0xff]  }
 0x192   : > { %3029 = vmatprep.subr.bf16.mxu1 %v4341_v18  ;;  %v4423_v18 = vld [vmem:[#allocation8 + $0x5a8] ss:$24 sps:$4 sm:$0xff]  }
 0x193   : > { %2939 = vmatmul.mubr.bf16.vlgmr.msra.gmra.mrb[8].mxu0 %v5261_v19 }
 0x194   : > { %2980 = vmatmul.mubr.bf16.vlgmr.msra.gmra.mrb[8].mxu1 %v5265_v20  ;;  %2989 = vmatpush1.bf16.msra.mxu0 %v4336_v21  ;;  %v4428_v21 = vld [vmem:[#allocation8 + $0x2dc] ss:$24 sps:$4 sm:$0xff]  }
 0x195   : > { %3030 = vmatpush1.bf16.msra.mxu1 %v4339_v22  ;;  %2990 = vmatprep.subr.bf16.mxu0 %v4344_v23  ;;  %v4431_v22 = vld [vmem:[#allocation8 + $0x5dc] ss:$24 sps:$4 sm:$0xff]   ;;  %v4426_v23 = vld [vmem:[#allocation8 + $0x2d8] ss:$24 sps:$4 sm:$0xff]  }
 0x196   : > { %3031 = vmatprep.subr.bf16.mxu1 %v4347_v4  ;;  %3020 = vmatprep.mubr.bf16.mxu0 %v5234_v30  ;;  %v4429_v4 = vld [vmem:[#allocation8 + $0x5d8] ss:$24 sps:$4 sm:$0xff]  }
 0x197   : > { %3061 = vmatprep.mubr.bf16.mxu1 %v5249_v15 }
 0x198   : > { %2991 = vmatpush1.bf16.msra.mxu0 %v4342_v13  ;;  %v4434_v13 = vld [vmem:[#allocation8 + $0x60c] ss:$24 sps:$4 sm:$0xff]  }
 0x199   : > { %3032 = vmatpush1.bf16.msra.mxu1 %v4345_v24  ;;  %2992 = vmatprep.subr.bf16.mxu0 %v4350_v14  ;;  %v4437_v24 = vld [vmem:[#allocation8 + $0x14] ss:$24 sps:$4 sm:$0xff]   ;;  %v4432_v14 = vld [vmem:[#allocation8 + $0x608] ss:$24 sps:$4 sm:$0xff]  }
 0x19a   : > { %3033 = vmatprep.subr.bf16.mxu1 %v4353_v25  ;;  %v4435_v25 = vld [vmem:[#allocation8 + $0x10] ss:$24 sps:$4 sm:$0xff]  }
 0x19c   : > { %2993 = vmatpush1.bf16.msra.mxu0 %v4348_v26  ;;  %v4440_v26 = vld [vmem:[#allocation8 + $0x63c] ss:$24 sps:$4 sm:$0xff]  }
 0x19d   : > { %3034 = vmatpush1.bf16.msra.mxu1 %v4351_v27  ;;  %2994 = vmatprep.subr.bf16.mxu0 %v4356_v28  ;;  %v4443_v27 = vld [vmem:[#allocation8 + $0x44] ss:$24 sps:$4 sm:$0xff]   ;;  %v4438_v28 = vld [vmem:[#allocation8 + $0x638] ss:$24 sps:$4 sm:$0xff]  }
 0x19e   : > { %3035 = vmatprep.subr.bf16.mxu1 %v4359_v29  ;;  %v4441_v29 = vld [vmem:[#allocation8 + $0x40] ss:$24 sps:$4 sm:$0xff]  }
 0x1a0   : > { %2995 = vmatpush1.bf16.msra.mxu0 %v4354_v31  ;;  %v4446_v31 = vld [vmem:[#allocation8 + $0x66c] ss:$24 sps:$4 sm:$0xff]  }
 0x1a1   : > { %3036 = vmatpush1.bf16.msra.mxu1 %v4357_v32  ;;  %2996 = vmatprep.subr.bf16.mxu0 %v4362_v33  ;;  %v4449_v32 = vld [vmem:[#allocation8 + $0x74] ss:$24 sps:$4 sm:$0xff]   ;;  %v4444_v33 = vld [vmem:[#allocation8 + $0x668] ss:$24 sps:$4 sm:$0xff]  }
 0x1a2   : > { %3037 = vmatprep.subr.bf16.mxu1 %v4365_v34  ;;  %v4447_v34 = vld [vmem:[#allocation8 + $0x70] ss:$24 sps:$4 sm:$0xff]  }
 0x1a4   : > { %2997 = vmatpush1.bf16.msra.mxu0 %v4360_v35  ;;  %v4452_v35 = vld [vmem:[#allocation8 + $0x69c] ss:$24 sps:$4 sm:$0xff]  }
 0x1a5   : > { %3038 = vmatpush1.bf16.msra.mxu1 %v4363_v36  ;;  %2998 = vmatprep.subr.bf16.mxu0 %v4368_v37  ;;  %v4455_v36 = vld [vmem:[#allocation8 + $0xa4] ss:$24 sps:$4 sm:$0xff]   ;;  %v4450_v37 = vld [vmem:[#allocation8 + $0x698] ss:$24 sps:$4 sm:$0xff]  }
 0x1a6   : > { %3039 = vmatprep.subr.bf16.mxu1 %v4371_v38  ;;  %v4453_v38 = vld [vmem:[#allocation8 + $0xa0] ss:$24 sps:$4 sm:$0xff]  }
 0x1a8   : > { %2999 = vmatpush1.bf16.msra.mxu0 %v4366_v39  ;;  %v4458_v39 = vld [vmem:[#allocation8 + $0x6cc] ss:$24 sps:$4 sm:$0xff]  }
 0x1a9   : > { %3040 = vmatpush1.bf16.msra.mxu1 %v4369_v40  ;;  %3000 = vmatprep.subr.bf16.mxu0 %v4374_v41  ;;  %v4461_v40 = vld [vmem:[#allocation8 + $0xd4] ss:$24 sps:$4 sm:$0xff]   ;;  %v4456_v41 = vld [vmem:[#allocation8 + $0x6c8] ss:$24 sps:$4 sm:$0xff]  }
 0x1aa   : > { %3041 = vmatprep.subr.bf16.mxu1 %v4377_v42  ;;  %v4464_v42 = vld [vmem:[#allocation8 + $0x6fc] ss:$24 sps:$4 sm:$0xff]  }
 0x1ac   : > { %3001 = vmatpush1.bf16.msra.mxu0 %v4372_v43  ;;  %v4467_v43 = vld [vmem:[#allocation8 + $0x104] ss:$24 sps:$4 sm:$0xff]  }
 0x1ad   : > { %3042 = vmatpush1.bf16.msra.mxu1 %v4375_v44  ;;  %3002 = vmatprep.subr.bf16.mxu0 %v4380_v45  ;;  %v4462_v44 = vld [vmem:[#allocation8 + $0x6f8] ss:$24 sps:$4 sm:$0xff]  }
 0x1ae   : > { %3043 = vmatprep.subr.bf16.mxu1 %v4383_v46  ;;  %v4465_v45 = vld [vmem:[#allocation8 + $0x100] ss:$24 sps:$4 sm:$0xff]   ;;  %v4470_v46 = vld [vmem:[#allocation8 + $0x72c] ss:$24 sps:$4 sm:$0xff]  }
 0x1b0   : > { %3003 = vmatpush1.bf16.msra.mxu0 %v4378_v47  ;;  %v4473_v47 = vld [vmem:[#allocation8 + $0x134] ss:$24 sps:$4 sm:$0xff]  }
 0x1b1   : > { %3044 = vmatpush1.bf16.msra.mxu1 %v4381_v48  ;;  %3004 = vmatprep.subr.bf16.mxu0 %v4386_v49 }
 0x1b2   : > { %3045 = vmatprep.subr.bf16.mxu1 %v4389_v50 }
 0x1b4   : > { %3005 = vmatpush1.bf16.msra.mxu0 %v4384_v51 }
 0x1b5   : > { %3046 = vmatpush1.bf16.msra.mxu1 %v4387_v52  ;;  %3006 = vmatprep.subr.bf16.mxu0 %v4392_v53 }
 0x1b6   : > { %3047 = vmatprep.subr.bf16.mxu1 %v4395_v54  ;;  %v4468_v54 = vld [vmem:[#allocation8 + $0x728] ss:$24 sps:$4 sm:$0xff]  }
 0x1b8   : > { %3007 = vmatpush1.bf16.msra.mxu0 %v4390_v55  ;;  %v4471_v55 = vld [vmem:[#allocation8 + $0x130] ss:$24 sps:$4 sm:$0xff]  }
 0x1b9   : > { %3048 = vmatpush1.bf16.msra.mxu1 %v4393_v56  ;;  %3008 = vmatprep.subr.bf16.mxu0 %v4398_v57 }
 0x1ba   : > { %3049 = vmatprep.subr.bf16.mxu1 %v4401_v58  ;;  %v4476_v58 = vld [vmem:[#allocation8 + $0x75c] ss:$24 sps:$4 sm:$0xff]  }
 0x1bc   : > { %3009 = vmatpush1.bf16.msra.mxu0 %v4396_v59  ;;  %v4479_v59 = vld [vmem:[#allocation8 + $0x164] ss:$24 sps:$4 sm:$0xff]  }
 0x1bd   : > { %3050 = vmatpush1.bf16.msra.mxu1 %v4399_v60  ;;  %3010 = vmatprep.subr.bf16.mxu0 %v4404_v61  ;;  %v4474_v60 = vld [vmem:[#allocation8 + $0x758] ss:$24 sps:$4 sm:$0xff]  }
 0x1be   : > { %3051 = vmatprep.subr.bf16.mxu1 %v4407_v62  ;;  %v4477_v61 = vld [vmem:[#allocation8 + $0x160] ss:$24 sps:$4 sm:$0xff]   ;;  %v4482_v62 = vld [vmem:[#allocation8 + $0x78c] ss:$24 sps:$4 sm:$0xff]  }
 0x1c0   : > { %3011 = vmatpush1.bf16.msra.mxu0 %v4402_v63  ;;  %v4485_v63 = vld [vmem:[#allocation8 + $0x194] ss:$24 sps:$4 sm:$0xff]  }
 0x1c1   : > { %3052 = vmatpush1.bf16.msra.mxu1 %v4405_v0  ;;  %3012 = vmatprep.subr.bf16.mxu0 %v4410_v1  ;;  %v4480_v0 = vld [vmem:[#allocation8 + $0x788] ss:$24 sps:$4 sm:$0xff]  }
 0x1c2   : > { %3053 = vmatprep.subr.bf16.mxu1 %v4413_v2  ;;  %v4483_v1 = vld [vmem:[#allocation8 + $0x190] ss:$24 sps:$4 sm:$0xff]   ;;  %v4488_v2 = vld [vmem:[#allocation8 + $0x7bc] ss:$24 sps:$4 sm:$0xff]  }
 0x1c4   : > { %3013 = vmatpush1.bf16.msra.mxu0 %v4408_v3  ;;  %v4491_v3 = vld [vmem:[#allocation8 + $0x1c4] ss:$24 sps:$4 sm:$0xff]  }
 0x1c5   : > { %3054 = vmatpush1.bf16.msra.mxu1 %v4411_v5  ;;  %3014 = vmatprep.subr.bf16.mxu0 %v4416_v6  ;;  %v4486_v5 = vld [vmem:[#allocation8 + $0x7b8] ss:$24 sps:$4 sm:$0xff]  }
 0x1c6   : > { %3055 = vmatprep.subr.bf16.mxu1 %v4419_v7  ;;  %v4489_v6 = vld [vmem:[#allocation8 + $0x1c0] ss:$24 sps:$4 sm:$0xff]   ;;  %v4494_v7 = vld [vmem:[#allocation8 + $0x7ec] ss:$24 sps:$4 sm:$0xff]  }
 0x1c8   : > { %3015 = vmatpush1.bf16.msra.mxu0 %v4414_v8  ;;  %v4497_v8 = vld [vmem:[#allocation8 + $0x1f4] ss:$24 sps:$4 sm:$0xff]  }
 0x1c9   : > { %3056 = vmatpush1.bf16.msra.mxu1 %v4417_v10  ;;  %3016 = vmatprep.subr.bf16.mxu0 %v4422_v11  ;;  %v4492_v10 = vld [vmem:[#allocation8 + $0x7e8] ss:$24 sps:$4 sm:$0xff]  }
 0x1ca   : > { %3057 = vmatprep.subr.bf16.mxu1 %v4425_v12  ;;  %v4495_v11 = vld [vmem:[#allocation8 + $0x1f0] ss:$24 sps:$4 sm:$0xff]   ;;  %v4500_v12 = vld [vmem:[#allocation8 + $0x81c] ss:$24 sps:$4 sm:$0xff]  }
 0x1cc   : > { %3017 = vmatpush1.bf16.msra.mxu0 %v4420_v17  ;;  %v4503_v17 = vld [vmem:[#allocation8 + $0x224] ss:$24 sps:$4 sm:$0xff]  }
 0x1cd   : > { %3058 = vmatpush1.bf16.msra.mxu1 %v4423_v18  ;;  %3018 = vmatprep.subr.bf16.mxu0 %v4428_v21  ;;  %v4498_v18 = vld [vmem:[#allocation8 + $0x818] ss:$24 sps:$4 sm:$0xff]  }
 0x1ce   : > { %3059 = vmatprep.subr.bf16.mxu1 %v4431_v22  ;;  %v4501_v21 = vld [vmem:[#allocation8 + $0x220] ss:$24 sps:$4 sm:$0xff]   ;;  %v4506_v22 = vld [vmem:[#allocation8 + $0x84c] ss:$24 sps:$4 sm:$0xff]  }
 0x1d0   : > { %3019 = vmatpush1.bf16.msra.mxu0 %v4426_v23  ;;  %v4509_v23 = vld [vmem:[#allocation8 + $0x254] ss:$24 sps:$4 sm:$0xff]  }
 0x1d1   : > { %3060 = vmatpush1.bf16.msra.mxu1 %v4429_v4  ;;  %3070 = vmatprep.subr.bf16.mxu0 %v4434_v13  ;;  %v4504_v4 = vld [vmem:[#allocation8 + $0x848] ss:$24 sps:$4 sm:$0xff]  }
 0x1d2   : > { %3111 = vmatprep.subr.bf16.mxu1 %v4437_v24  ;;  %v4507_v13 = vld [vmem:[#allocation8 + $0x250] ss:$24 sps:$4 sm:$0xff]   ;;  %v4512_v24 = vld [vmem:[#allocation8 + $0x87c] ss:$24 sps:$4 sm:$0xff]  }
 0x1d3   : > { %3021 = vmatmul.mubr.bf16.vlgmr.msra.gmra.mrb[12].mxu0 %v5239_v9 }
 0x1d4   : > { %3062 = vmatmul.mubr.bf16.vlgmr.msra.gmra.mrb[12].mxu1 %v5261_v19  ;;  %3071 = vmatpush1.bf16.msra.mxu0 %v4432_v14  ;;  %v4515_v14 = vld [vmem:[#allocation8 + $0x284] ss:$24 sps:$4 sm:$0xff]  }
 0x1d5   : > { %3112 = vmatpush1.bf16.msra.mxu1 %v4435_v25  ;;  %3072 = vmatprep.subr.bf16.mxu0 %v4440_v26  ;;  %v4510_v25 = vld [vmem:[#allocation8 + $0x878] ss:$24 sps:$4 sm:$0xff]  }
 0x1d6   : > { %3113 = vmatprep.subr.bf16.mxu1 %v4443_v27  ;;  %3102 = vmatprep.mubr.bf16.mxu0 %v5253_v16  ;;  %v4513_v26 = vld [vmem:[#allocation8 + $0x280] ss:$24 sps:$4 sm:$0xff]   ;;  %v4518_v27 = vld [vmem:[#allocation8 + $0x8ac] ss:$24 sps:$4 sm:$0xff]  }
 0x1d7   : > { %3143 = vmatprep.mubr.bf16.mxu1 %v5234_v30  ;;  %v4459_v30 = vld [vmem:[#allocation8 + $0xd0] ss:$24 sps:$4 sm:$0xff]  }
 0x1d8   : > { %3073 = vmatpush1.bf16.msra.mxu0 %v4438_v28  ;;  %v4521_v28 = vld [vmem:[#allocation8 + $0x2b4] ss:$24 sps:$4 sm:$0xff]  }
 0x1d9   : > { %3114 = vmatpush1.bf16.msra.mxu1 %v4441_v29  ;;  %3074 = vmatprep.subr.bf16.mxu0 %v4446_v31  ;;  %v4516_v29 = vld [vmem:[#allocation8 + $0x8a8] ss:$24 sps:$4 sm:$0xff]  }
 0x1da   : > { %3115 = vmatprep.subr.bf16.mxu1 %v4449_v32  ;;  %v4519_v31 = vld [vmem:[#allocation8 + $0x2b0] ss:$24 sps:$4 sm:$0xff]   ;;  %v4524_v32 = vld [vmem:[#allocation8 + $0x8dc] ss:$24 sps:$4 sm:$0xff]  }
 0x1dc   : > { %3075 = vmatpush1.bf16.msra.mxu0 %v4444_v33  ;;  %v4527_v33 = vld [vmem:[#allocation8 + $0x2e4] ss:$24 sps:$4 sm:$0xff]  }
 0x1dd   : > { %3116 = vmatpush1.bf16.msra.mxu1 %v4447_v34  ;;  %3076 = vmatprep.subr.bf16.mxu0 %v4452_v35  ;;  %v4522_v34 = vld [vmem:[#allocation8 + $0x8d8] ss:$24 sps:$4 sm:$0xff]  }
 0x1de   : > { %3117 = vmatprep.subr.bf16.mxu1 %v4455_v36  ;;  %v4525_v35 = vld [vmem:[#allocation8 + $0x2e0] ss:$24 sps:$4 sm:$0xff]   ;;  %v4530_v36 = vld [vmem:[#allocation8 + $0x314] ss:$24 sps:$4 sm:$0xff]  }
 0x1e0   : > { %3077 = vmatpush1.bf16.msra.mxu0 %v4450_v37  ;;  %v4533_v37 = vld [vmem:[#allocation8 + $0x614] ss:$24 sps:$4 sm:$0xff]  }
 0x1e1   : > { %3118 = vmatpush1.bf16.msra.mxu1 %v4453_v38  ;;  %3078 = vmatprep.subr.bf16.mxu0 %v4458_v39  ;;  %v4528_v38 = vld [vmem:[#allocation8 + $0x310] ss:$24 sps:$4 sm:$0xff]  }
 0x1e2   : > { %3119 = vmatprep.subr.bf16.mxu1 %v4461_v40  ;;  %v4531_v39 = vld [vmem:[#allocation8 + $0x610] ss:$24 sps:$4 sm:$0xff]   ;;  %v4536_v40 = vld [vmem:[#allocation8 + $0x344] ss:$24 sps:$4 sm:$0xff]  }
 0x1e4   : > { %3079 = vmatpush1.bf16.msra.mxu0 %v4456_v41  ;;  %v4539_v41 = vld [vmem:[#allocation8 + $0x644] ss:$24 sps:$4 sm:$0xff]  }
 0x1e5   : > { %3120 = vmatpush1.bf16.msra.mxu1 %v4459_v30  ;;  %3080 = vmatprep.subr.bf16.mxu0 %v4464_v42  ;;  %v4534_v30 = vld [vmem:[#allocation8 + $0x340] ss:$24 sps:$4 sm:$0xff]  }
 0x1e6   : > { %3121 = vmatprep.subr.bf16.mxu1 %v4467_v43  ;;  %v5275_v48 = vpop.f32.mrb[0].mxu0  ;;  %v4537_v42 = vld [vmem:[#allocation8 + $0x640] ss:$24 sps:$4 sm:$0xff]   ;;  %v4542_v43 = vld [vmem:[#allocation8 + $0x374] ss:$24 sps:$4 sm:$0xff]  }
 0x1e7   : > { %v5277_v49 = vpop.f32.mrb[0].mxu1  ;;  %v5279_v50 = vpop.f32.mrb[1].mxu0 }
 0x1e8   : > { %v5281_v51 = vpop.f32.mrb[1].mxu1  ;;  %v1028_v52 = vpop.f32.mrb[2].mxu0  ;;  %3081 = vmatpush1.bf16.msra.mxu0 %v4462_v44  ;;  %v4545_v44 = vld [vmem:[#allocation8 + $0x674] ss:$24 sps:$4 sm:$0xff]  }
 0x1e9   : > { %v1069_v53 = vpop.f32.mrb[2].mxu1  ;;  %3122 = vmatpush1.bf16.msra.mxu1 %v4465_v45  ;;  %v1029_v56 = vpop.f32.mrb[3].mxu0  ;;  %3082 = vmatprep.subr.bf16.mxu0 %v4470_v46  ;;  %v4540_v45 = vld [vmem:[#allocation8 + $0x370] ss:$24 sps:$4 sm:$0xff]   ;;  %v4546_v52 = vld [vmem:[#allocation8 + $0x3a0] ss:$24 sps:$4 sm:$0xff]  }
 0x1ea   : > { %v1070_v57 = vpop.f32.mrb[3].mxu1  ;;  %3123 = vmatprep.subr.bf16.mxu1 %v4473_v47  ;;  %v4543_v46 = vld [vmem:[#allocation8 + $0x670] ss:$24 sps:$4 sm:$0xff]   ;;  %v4548_v47 = vld [vmem:[#allocation8 + $0x3a4] ss:$24 sps:$4 sm:$0xff]  }
 0x1eb   : > { %v4549_v53 = vld [vmem:[#allocation8 + $0x6a0] ss:$24 sps:$4 sm:$0xff]   ;;  %v4560_v56 = vld [vmem:[#allocation8 + $0x404] ss:$24 sps:$4 sm:$0xff]  }
 0x1ec   : > { %3083 = vmatpush1.bf16.msra.mxu0 %v4468_v54  ;;  %v4554_v54 = vld [vmem:[#allocation8 + $0x3d4] ss:$24 sps:$4 sm:$0xff]   ;;  %v4563_v57 = vld [vmem:[#allocation8 + $0x704] ss:$24 sps:$4 sm:$0xff]  }
 0x1ed   : > { %3124 = vmatpush1.bf16.msra.mxu1 %v4471_v55  ;;  %3084 = vmatprep.subr.bf16.mxu0 %v4476_v58  ;;  %v4557_v55 = vld [vmem:[#allocation8 + $0x6d4] ss:$24 sps:$4 sm:$0xff]   ;;  %v4558_v58 = vld [vmem:[#allocation8 + $0x400] ss:$24 sps:$4 sm:$0xff]  }
 0x1ee   : > { %3125 = vmatprep.subr.bf16.mxu1 %v4479_v59  ;;  %v4561_v59 = vld [vmem:[#allocation8 + $0x700] ss:$24 sps:$4 sm:$0xff]  }
 0x1f0   : > { %3085 = vmatpush1.bf16.msra.mxu0 %v4474_v60  ;;  %v4566_v60 = vld [vmem:[#allocation8 + $0x434] ss:$24 sps:$4 sm:$0xff]  }
 0x1f1   : > { %3126 = vmatpush1.bf16.msra.mxu1 %v4477_v61  ;;  %3086 = vmatprep.subr.bf16.mxu0 %v4482_v62  ;;  %v4569_v61 = vld [vmem:[#allocation8 + $0x734] ss:$24 sps:$4 sm:$0xff]  }
 0x1f2   : > { %3127 = vmatprep.subr.bf16.mxu1 %v4485_v63 }
 0x1f4   : > { %3087 = vmatpush1.bf16.msra.mxu0 %v4480_v0 }
 0x1f5   : > { %3128 = vmatpush1.bf16.msra.mxu1 %v4483_v1  ;;  %3088 = vmatprep.subr.bf16.mxu0 %v4488_v2 }
 0x1f6   : > { %3129 = vmatprep.subr.bf16.mxu1 %v4491_v3 }
 0x1f8   : > { %3089 = vmatpush1.bf16.msra.mxu0 %v4486_v5 }
 0x1f9   : > { %3130 = vmatpush1.bf16.msra.mxu1 %v4489_v6  ;;  %3090 = vmatprep.subr.bf16.mxu0 %v4494_v7  ;;  %v4564_v7 = vld [vmem:[#allocation8 + $0x430] ss:$24 sps:$4 sm:$0xff]  }
 0x1fa   : > { %3131 = vmatprep.subr.bf16.mxu1 %v4497_v8  ;;  %v4567_v8 = vld [vmem:[#allocation8 + $0x730] ss:$24 sps:$4 sm:$0xff]  }
 0x1fc   : > { %3091 = vmatpush1.bf16.msra.mxu0 %v4492_v10 }
 0x1fd   : > { %3132 = vmatpush1.bf16.msra.mxu1 %v4495_v11  ;;  %3092 = vmatprep.subr.bf16.mxu0 %v4500_v12  ;;  %v4572_v12 = vld [vmem:[#allocation8 + $0x464] ss:$24 sps:$4 sm:$0xff]  }
 0x1fe   : > { %3133 = vmatprep.subr.bf16.mxu1 %v4503_v17  ;;  %v4575_v17 = vld [vmem:[#allocation8 + $0x764] ss:$24 sps:$4 sm:$0xff]  }
 0x200   : > { %3093 = vmatpush1.bf16.msra.mxu0 %v4498_v18  ;;  %v4570_v18 = vld [vmem:[#allocation8 + $0x460] ss:$24 sps:$4 sm:$0xff]  }
 0x201   : > { %3134 = vmatpush1.bf16.msra.mxu1 %v4501_v21  ;;  %3094 = vmatprep.subr.bf16.mxu0 %v4506_v22  ;;  %v4573_v21 = vld [vmem:[#allocation8 + $0x760] ss:$24 sps:$4 sm:$0xff]   ;;  %v4578_v22 = vld [vmem:[#allocation8 + $0x494] ss:$24 sps:$4 sm:$0xff]  }
 0x202   : > { %3135 = vmatprep.subr.bf16.mxu1 %v4509_v23  ;;  %v4581_v23 = vld [vmem:[#allocation8 + $0x794] ss:$24 sps:$4 sm:$0xff]  }
 0x204   : > { %3095 = vmatpush1.bf16.msra.mxu0 %v4504_v4  ;;  %v4576_v4 = vld [vmem:[#allocation8 + $0x490] ss:$24 sps:$4 sm:$0xff]  }
 0x205   : > { %3136 = vmatpush1.bf16.msra.mxu1 %v4507_v13  ;;  %3096 = vmatprep.subr.bf16.mxu0 %v4512_v24  ;;  %v4579_v13 = vld [vmem:[#allocation8 + $0x790] ss:$24 sps:$4 sm:$0xff]   ;;  %v4584_v24 = vld [vmem:[#allocation8 + $0x4c4] ss:$24 sps:$4 sm:$0xff]  }
 0x206   : > { %3137 = vmatprep.subr.bf16.mxu1 %v4515_v14  ;;  %v4587_v14 = vld [vmem:[#allocation8 + $0x7c4] ss:$24 sps:$4 sm:$0xff]  }
 0x208   : > { %3097 = vmatpush1.bf16.msra.mxu0 %v4510_v25  ;;  %v4582_v25 = vld [vmem:[#allocation8 + $0x4c0] ss:$24 sps:$4 sm:$0xff]  }
 0x209   : > { %3138 = vmatpush1.bf16.msra.mxu1 %v4513_v26  ;;  %3098 = vmatprep.subr.bf16.mxu0 %v4518_v27  ;;  %v4585_v26 = vld [vmem:[#allocation8 + $0x7c0] ss:$24 sps:$4 sm:$0xff]   ;;  %v4590_v27 = vld [vmem:[#allocation8 + $0x4f4] ss:$24 sps:$4 sm:$0xff]  }
 0x20a   : > { %3139 = vmatprep.subr.bf16.mxu1 %v4521_v28  ;;  %v4593_v28 = vld [vmem:[#allocation8 + $0x7f4] ss:$24 sps:$4 sm:$0xff]  }
 0x20c   : > { %3099 = vmatpush1.bf16.msra.mxu0 %v4516_v29  ;;  %v4588_v29 = vld [vmem:[#allocation8 + $0x4f0] ss:$24 sps:$4 sm:$0xff]  }
 0x20d   : > { %3140 = vmatpush1.bf16.msra.mxu1 %v4519_v31  ;;  %3100 = vmatprep.subr.bf16.mxu0 %v4524_v32  ;;  %v4591_v31 = vld [vmem:[#allocation8 + $0x7f0] ss:$24 sps:$4 sm:$0xff]   ;;  %v4596_v32 = vld [vmem:[#allocation8 + $0x524] ss:$24 sps:$4 sm:$0xff]  }
 0x20e   : > { %3141 = vmatprep.subr.bf16.mxu1 %v4527_v33  ;;  %v4599_v33 = vld [vmem:[#allocation8 + $0x824] ss:$24 sps:$4 sm:$0xff]  }
 0x210   : > { %3101 = vmatpush1.bf16.msra.mxu0 %v4522_v34  ;;  %v4594_v34 = vld [vmem:[#allocation8 + $0x520] ss:$24 sps:$4 sm:$0xff]  }
 0x211   : > { %3142 = vmatpush1.bf16.msra.mxu1 %v4525_v35  ;;  %3152 = vmatprep.subr.bf16.mxu0 %v4530_v36  ;;  %v4597_v35 = vld [vmem:[#allocation8 + $0x820] ss:$24 sps:$4 sm:$0xff]   ;;  %v4602_v36 = vld [vmem:[#allocation8 + $0x554] ss:$24 sps:$4 sm:$0xff]  }
 0x212   : > { %3193 = vmatprep.subr.bf16.mxu1 %v4533_v37  ;;  %v4605_v37 = vld [vmem:[#allocation8 + $0x854] ss:$24 sps:$4 sm:$0xff]  }
 0x213   : > { %3103 = vmatmul.mubr.bf16.vlgmr.msra.gmra.mrb[16].mxu0 %v5265_v20 }
 0x214   : > { %3144 = vmatmul.mubr.bf16.vlgmr.msra.gmra.mrb[16].mxu1 %v5239_v9  ;;  %3153 = vmatpush1.bf16.msra.mxu0 %v4528_v38  ;;  %v4551_v9 = vld [vmem:[#allocation8 + $0x6a4] ss:$24 sps:$4 sm:$0xff]   ;;  %v4600_v38 = vld [vmem:[#allocation8 + $0x550] ss:$24 sps:$4 sm:$0xff]  }
 0x215   : > { %3194 = vmatpush1.bf16.msra.mxu1 %v4531_v39  ;;  %3154 = vmatprep.subr.bf16.mxu0 %v4536_v40  ;;  %v4603_v39 = vld [vmem:[#allocation8 + $0x850] ss:$24 sps:$4 sm:$0xff]   ;;  %v4608_v40 = vld [vmem:[#allocation8 + $0x584] ss:$24 sps:$4 sm:$0xff]  }
 0x216   : > { %3195 = vmatprep.subr.bf16.mxu1 %v4539_v41  ;;  %3184 = vmatprep.mubr.bf16.mxu0 %v5249_v15  ;;  %v4552_v15 = vld [vmem:[#allocation8 + $0x3d0] ss:$24 sps:$4 sm:$0xff]   ;;  %v4611_v41 = vld [vmem:[#allocation8 + $0x884] ss:$24 sps:$4 sm:$0xff]  }
 0x217   : > { %3225 = vmatprep.mubr.bf16.mxu1 %v5253_v16  ;;  %v4555_v16 = vld [vmem:[#allocation8 + $0x6d0] ss:$24 sps:$4 sm:$0xff]  }
 0x218   : > { %3155 = vmatpush1.bf16.msra.mxu0 %v4534_v30  ;;  %v4606_v30 = vld [vmem:[#allocation8 + $0x580] ss:$24 sps:$4 sm:$0xff]  }
 0x219   : > { %3196 = vmatpush1.bf16.msra.mxu1 %v4537_v42  ;;  %3156 = vmatprep.subr.bf16.mxu0 %v4542_v43  ;;  %v4609_v42 = vld [vmem:[#allocation8 + $0x880] ss:$24 sps:$4 sm:$0xff]   ;;  %v4614_v43 = vld [vmem:[#allocation8 + $0x5b4] ss:$24 sps:$4 sm:$0xff]  }
 0x21a   : > { %3197 = vmatprep.subr.bf16.mxu1 %v4545_v44  ;;  %v4617_v44 = vld [vmem:[#allocation8 + $0x8b4] ss:$24 sps:$4 sm:$0xff]  }
 0x21c   : > { %3157 = vmatpush1.bf16.msra.mxu0 %v4540_v45  ;;  %v4612_v45 = vld [vmem:[#allocation8 + $0x5b0] ss:$24 sps:$4 sm:$0xff]  }
 0x21d   : > { %3198 = vmatpush1.bf16.msra.mxu1 %v4543_v46  ;;  %3158 = vmatprep.subr.bf16.mxu0 %v4548_v47  ;;  %v4615_v46 = vld [vmem:[#allocation8 + $0x8b0] ss:$24 sps:$4 sm:$0xff]   ;;  %v4620_v47 = vld [vmem:[#allocation8 + $0x5e4] ss:$24 sps:$4 sm:$0xff]  }
 0x21e   : > { %3199 = vmatprep.subr.bf16.mxu1 %v4551_v9  ;;  %v4623_v9 = vld [vmem:[#allocation8 + $0x8e4] ss:$24 sps:$4 sm:$0xff]  }
 0x220   : > { %3159 = vmatpush1.bf16.msra.mxu0 %v4546_v52  ;;  %v4618_v52 = vld [vmem:[#allocation8 + $0x5e0] ss:$24 sps:$4 sm:$0xff]  }
 0x221   : > { %3200 = vmatpush1.bf16.msra.mxu1 %v4549_v53  ;;  %3160 = vmatprep.subr.bf16.mxu0 %v4554_v54  ;;  %v4621_v53 = vld [vmem:[#allocation8 + $0x8e0] ss:$24 sps:$4 sm:$0xff]   ;;  %v3235_v54 = vlaneseq }
 0x222   : > { %3201 = vmatprep.subr.bf16.mxu1 %v4557_v55 }
 0x223   : > { %v5300_v55 = vshrl.u32 %v3235_v54, 7 }
 0x224   : > { %3161 = vmatpush1.bf16.msra.mxu0 %v4552_v15 }
 0x225   : > { %3202 = vmatpush1.bf16.msra.mxu1 %v4555_v16  ;;  %3162 = vmatprep.subr.bf16.mxu0 %v4560_v56  ;;  %v3237_v15 = vsub.s32 0, %v5300_v55  ;;  %v5304_v16 = vld [vmem:[%s5199_s12] sm:$0x3f]  ;;  %v3241_v56 = vsub.s32 1, %v5300_v55 }
 0x226   : > { %3203 = vmatprep.subr.bf16.mxu1 %v4563_v57  ;;  %v5287_v62 = vpop.f32.mrb[4].mxu0 }
 0x227   : > { %v2899_v63 = vpop.f32.mrb[4].mxu1  ;;  %v5292_v1 = vpop.f32.mrb[5].mxu0  ;;  %v3281_v57 = vrot.slane %v5304_v16, %v3237_v15 }
 0x228   : > { %v5290_v0 = vadd.f32 %v2899_v63, %v5275_v48  ;;  %v2901_v2 = vpop.f32.mrb[5].mxu1  ;;  %v1110_v5 = vpop.f32.mrb[6].mxu0  ;;  %3163 = vmatpush1.bf16.msra.mxu0 %v4558_v58  ;;  %v5308_v58 = vld [vmem:[#allocation11] sm:$0x3f] }
 0x229   : > { %v5295_v3 = vadd.f32 %v2901_v2, %v5279_v50  ;;  %v2903_v6 = vpop.f32.mrb[6].mxu1  ;;  %3204 = vmatpush1.bf16.msra.mxu1 %v4561_v59  ;;  %v1111_v10 = vpop.f32.mrb[7].mxu0  ;;  %3164 = vmatprep.subr.bf16.mxu0 %v4566_v60  ;;  %v3285_v59 = vrot.slane %v5304_v16, %v3241_v56  ;;  %v3242_v60 = vrot.slane %v5308_v58, %v3241_v56 }
 0x22a   : > { %v2904_v11 = vpop.f32.mrb[7].mxu1  ;;  %3205 = vmatprep.subr.bf16.mxu1 %v4569_v61 }
 0x22b   : > { %v3309_v61 = vadd.f32 %v3285_v59, %v5279_v50 }
 0x22c   : > { %3165 = vmatpush1.bf16.msra.mxu0 %v4564_v7 }
 0x22d   : > { %3206 = vmatpush1.bf16.msra.mxu1 %v4567_v8  ;;  %3166 = vmatprep.subr.bf16.mxu0 %v4572_v12 }
 0x22e   : > { %3207 = vmatprep.subr.bf16.mxu1 %v4575_v17 }
 0x230   : > { %3167 = vmatpush1.bf16.msra.mxu0 %v4570_v18 }
 0x231   : > { %3208 = vmatpush1.bf16.msra.mxu1 %v4573_v21  ;;  %3168 = vmatprep.subr.bf16.mxu0 %v4578_v22  ;;  %v3315_v22 = vadd.f32 %v3309_v61, %v3242_v60 }
 0x232   : > { %3209 = vmatprep.subr.bf16.mxu1 %v4581_v23 }
 0x234   : > { %3169 = vmatpush1.bf16.msra.mxu0 %v4576_v4 }
 0x235   : > { %3210 = vmatpush1.bf16.msra.mxu1 %v4579_v13  ;;  %3170 = vmatprep.subr.bf16.mxu0 %v4584_v24  ;;  %v3321_v24 = vmax.f32 %v3315_v22, 0.0 }
 0x236   : > { %3211 = vmatprep.subr.bf16.mxu1 %v4587_v14 }
 0x238   : > { %3171 = vmatpush1.bf16.msra.mxu0 %v4582_v25 }
 0x239   : > { %3212 = vmatpush1.bf16.msra.mxu1 %v4585_v26  ;;  %3172 = vmatprep.subr.bf16.mxu0 %v4590_v27 }
 0x23a   : > { %3213 = vmatprep.subr.bf16.mxu1 %v4593_v28 }
 0x23c   : > { %3173 = vmatpush1.bf16.msra.mxu0 %v4588_v29 }
 0x23d   : > { %3214 = vmatpush1.bf16.msra.mxu1 %v4591_v31  ;;  %3174 = vmatprep.subr.bf16.mxu0 %v4596_v32 }
 0x23e   : > { %3215 = vmatprep.subr.bf16.mxu1 %v4599_v33 }
 0x240   : > { %3175 = vmatpush1.bf16.msra.mxu0 %v4594_v34 }
 0x241   : > { %3216 = vmatpush1.bf16.msra.mxu1 %v4597_v35  ;;  %3176 = vmatprep.subr.bf16.mxu0 %v4602_v36 }
 0x242   : > { %3217 = vmatprep.subr.bf16.mxu1 %v4605_v37 }
 0x244   : > { %3177 = vmatpush1.bf16.msra.mxu0 %v4600_v38 }
 0x245   : > { %3218 = vmatpush1.bf16.msra.mxu1 %v4603_v39  ;;  %3178 = vmatprep.subr.bf16.mxu0 %v4608_v40  ;;  %v3245_v39 = vsub.s32 2, %v5300_v55  ;;  %v3249_v40 = vsub.s32 3, %v5300_v55 }
 0x246   : > { %3219 = vmatprep.subr.bf16.mxu1 %v4611_v41 }
 0x247   : > { %v3289_v41 = vrot.slane %v5304_v16, %v3245_v39 }
 0x248   : > { %3179 = vmatpush1.bf16.msra.mxu0 %v4606_v30  ;;  %v3293_v30 = vrot.slane %v5304_v16, %v3249_v40 }
 0x249   : > { %3220 = vmatpush1.bf16.msra.mxu1 %v4609_v42  ;;  %3180 = vmatprep.subr.bf16.mxu0 %v4614_v43  ;;  %v3246_v42 = vrot.slane %v5308_v58, %v3245_v39  ;;  %v3310_v43 = vadd.f32 %v3289_v41, %v5277_v49  ;;  %v3341_v41 = vand.u32 127, %v3235_v54 }
 0x24a   : > { %3221 = vmatprep.subr.bf16.mxu1 %v4617_v44  ;;  %v3250_v44 = vrot.slane %v5308_v58, %v3249_v40 }
 0x24c   : > { %3181 = vmatpush1.bf16.msra.mxu0 %v4612_v45  ;;  %v3311_v45 = vadd.f32 %v3293_v30, %v5281_v51  ;;  %v3344_v30 = vsub.s32 %v3341_v41, %v5300_v55 }
 0x24d   : > { %3222 = vmatpush1.bf16.msra.mxu1 %v4615_v46  ;;  %3182 = vmatprep.subr.bf16.mxu0 %v4620_v47 }
 0x24e   : > { %3223 = vmatprep.subr.bf16.mxu1 %v4623_v9  ;;  %v3316_v9 = vadd.f32 %v3310_v43, %v3246_v42 }
 0x250   : > { %3183 = vmatpush1.bf16.msra.mxu0 %v4618_v52 }
 0x251   : > { %3224 = vmatpush1.bf16.msra.mxu1 %v4621_v53 }
 0x253   : > { %3185 = vmatmul.mubr.bf16.vlgmr.msra.gmra.mrb[20].mxu0 %v5261_v19  ;;  %v3238_v19 = vrot.slane %v5308_v58, %v3237_v15 }
 0x254   : > { %3226 = vmatmul.mubr.bf16.vlgmr.msra.gmra.mrb[20].mxu1 %v5265_v20  ;;  %v3308_v20 = vadd.f32 %v3281_v57, %v5275_v48  ;;  %v3317_v57 = vadd.f32 %v3311_v45, %v3250_v44 }
 0x256   : > { %v3314_v12 = vadd.f32 %v3308_v20, %v3238_v19 }
 0x258   : > { %v3320_v13 = vmax.f32 %v3314_v12, 0.0 }
 0x266   : > { %v2940_v63 = vpop.f32.mrb[8].mxu0 }
 0x267   : > { %v2981_v2 = vpop.f32.mrb[8].mxu1  ;;  %v2941_v5 = vadd.f32 %v2940_v63, %v5290_v0  ;;  %v2942_v6 = vpop.f32.mrb[9].mxu0 }
 0x268   : > { %v2983_v7 = vpop.f32.mrb[9].mxu1  ;;  %v2943_v8 = vadd.f32 %v2942_v6, %v5295_v3  ;;  %v2944_v10 = vpop.f32.mrb[10].mxu0  ;;  %v3323_v6 = vmax.f32 %v3317_v57, 0.0 }
 0x269   : > { %v2985_v11 = vpop.f32.mrb[10].mxu1  ;;  %v2982_v17 = vadd.f32 %v2981_v2, %v2941_v5  ;;  %v2945_v18 = vpop.f32.mrb[11].mxu0  ;;  %v3322_v5 = vmax.f32 %v3316_v9, 0.0 }
 0x26a   : > { %v2986_v21 = vpop.f32.mrb[11].mxu1  ;;  %v2984_v48 = vadd.f32 %v2983_v7, %v2943_v8  ;;  %v3257_v18 = vsub.s32 5, %v5300_v55 }
 0x26b   : > { %v3265_v23 = vadd.f32 %v3238_v19, %v2982_v17  ;;  %v3253_v17 = vsub.s32 4, %v5300_v55 }
 0x26c   : > { %v3266_v4 = vadd.f32 %v3242_v60, %v2984_v48  ;;  %v3301_v22 = vrot.slane %v5304_v16, %v3257_v18 }
 0x26d   : > { %v3271_v50 = vmax.f32 %v3265_v23, 0.0  ;;  %v3297_v21 = vrot.slane %v5304_v16, %v3253_v17  ;;  %v3254_v48 = vrot.slane %v5308_v58, %v3253_v17 }
 0x26e   : > { %v3272_v14 = vmax.f32 %v3266_v4, 0.0  ;;  %v3258_v4 = vrot.slane %v5308_v58, %v3257_v18 }
 0x26f   : > { %v3326_v25 = vmul.f32 %v3320_v13, %v3271_v50  ;;  %v3312_v23 = vadd.f32 %v3297_v21, %v5287_v62  ;;  %v3313_v13 = vadd.f32 %v3301_v22, %v5292_v1 }
 0x270   : > { %v3327_v0 = vmul.f32 %v3321_v24, %v3272_v14 }
 0x272   : > { %v3332_v26 = vadd.f32 %v3327_v0, %v3326_v25 }
 0x2a6   : > { %v3022_v27 = vpop.f32.mrb[12].mxu0 }
 0x2a7   : > { %v3063_v28 = vpop.f32.mrb[12].mxu1  ;;  %v3023_v3 = vadd.f32 %v3022_v27, %v5277_v49  ;;  %v3024_v29 = vpop.f32.mrb[13].mxu0 }
 0x2a8   : > { %v3065_v31 = vpop.f32.mrb[13].mxu1  ;;  %v3025_v32 = vadd.f32 %v3024_v29, %v5281_v51  ;;  %v3026_v33 = vpop.f32.mrb[14].mxu0 }
 0x2a9   : > { %v3067_v34 = vpop.f32.mrb[14].mxu1  ;;  %v3064_v35 = vadd.f32 %v3063_v28, %v3023_v3  ;;  %v3027_v36 = vpop.f32.mrb[15].mxu0  ;;  %v3318_v3 = vadd.f32 %v3312_v23, %v3254_v48 }
 0x2aa   : > { %v3068_v37 = vpop.f32.mrb[15].mxu1  ;;  %v3066_v38 = vadd.f32 %v3065_v31, %v3025_v32  ;;  %v3319_v32 = vadd.f32 %v3313_v13, %v3258_v4 }
 0x2ab   : > { %v3324_v34 = vmax.f32 %v3318_v3, 0.0 }
 0x2ac   : > { %v3325_v36 = vmax.f32 %v3319_v32, 0.0 }
 0x2e6   : > { %v3104_v46 = vpop.f32.mrb[16].mxu0 }
 0x2e7   : > { %v3145_v47 = vpop.f32.mrb[16].mxu1  ;;  %v3105_v52 = vadd.f32 %v3104_v46, %v3064_v35  ;;  %v3106_v15 = vpop.f32.mrb[17].mxu0 }
 0x2e8   : > { %v3146_v53 = vadd.f32 %v3145_v47, %v5287_v62  ;;  %v3147_v56 = vpop.f32.mrb[17].mxu1  ;;  %v3107_v59 = vadd.f32 %v3106_v15, %v3066_v38  ;;  %v3108_v20 = vpop.f32.mrb[18].mxu0 }
 0x2e9   : > { %v3148_v19 = vadd.f32 %v3147_v56, %v5292_v1  ;;  %v3149_v60 = vpop.f32.mrb[18].mxu1  ;;  %v3267_v61 = vadd.f32 %v3246_v42, %v3105_v52  ;;  %v3109_v49 = vpop.f32.mrb[19].mxu0 }
 0x2ea   : > { %v3150_v63 = vpop.f32.mrb[19].mxu1  ;;  %v3268_v2 = vadd.f32 %v3250_v44, %v3107_v59 }
 0x2eb   : > { %v3273_v51 = vmax.f32 %v3267_v61, 0.0 }
 0x2ec   : > { %v3274_v7 = vmax.f32 %v3268_v2, 0.0 }
 0x2ed   : > { %v3328_v8 = vmul.f32 %v3322_v5, %v3273_v51 }
 0x2ee   : > { %v3329_v10 = vmul.f32 %v3323_v6, %v3274_v7 }
 0x2ef   : > { %v3333_v11 = vadd.f32 %v3332_v26, %v3328_v8 }
 0x2f1   : > { %v3334_v12 = vadd.f32 %v3333_v11, %v3329_v10 }
 0x326   : > { %v3186_v50 = vpop.f32.mrb[20].mxu0 }
 0x327   : > { %v3227_v24 = vpop.f32.mrb[20].mxu1  ;;  %v3187_v14 = vadd.f32 %v3186_v50, %v3146_v53  ;;  %v3188_v25 = vpop.f32.mrb[21].mxu0 }
 0x328   : > { %v3229_v0 = vpop.f32.mrb[21].mxu1  ;;  %v3189_v26 = vadd.f32 %v3188_v25, %v3148_v19  ;;  %v3190_v27 = vpop.f32.mrb[22].mxu0 }
 0x329   : > { %v3231_v28 = vpop.f32.mrb[22].mxu1  ;;  %v3228_v29 = vadd.f32 %v3227_v24, %v3187_v14  ;;  %v3191_v31 = vpop.f32.mrb[23].mxu0 }
 0x32a   : > { %v3232_v16 = vpop.f32.mrb[23].mxu1  ;;  %v3230_v62 = vadd.f32 %v3229_v0, %v3189_v26 }
 0x32b   : > { %v3269_v33 = vadd.f32 %v3254_v48, %v3228_v29 }
 0x32c   : > { %v3270_v58 = vadd.f32 %v3258_v4, %v3230_v62 }
 0x32d   : > { %v3275_v1 = vmax.f32 %v3269_v33, 0.0 }
 0x32e   : > { %v3276_v35 = vmax.f32 %v3270_v58, 0.0 }
 0x32f   : > { %v3330_v37 = vmul.f32 %v3324_v34, %v3275_v1 }
 0x330   : > { %v3331_v38 = vmul.f32 %v3325_v36, %v3276_v35 }
 0x331   : > { %v3335_v39 = vadd.f32 %v3334_v12, %v3330_v37 }
 0x333   : > { %v3336_v40 = vadd.f32 %v3335_v39, %v3331_v38 }
 0x335   : > { %3337 = vadd.xlane.f32.xlu0 %v3336_v40 }
 0x3c2   : > { %v3338_v42 = vpop.xlane.xlu0 %3337 }
 0x3c3   : > { %v3345_v43 = vrot.slane %v3338_v42, %v3344_v30 }
 0x3c5   : > { %3348 = vst.msk [vmem:[%s403_s29] sm:$0x1] %vm3347_vm0, %v3345_v43 }
 0x3c6   : > { %4811 = shalt.err (!%p4808_p5)
}
 0x3c7   : > { %s4812_s26 = scalar_lea.hbm %s5344_s10, 16  ;;  %s4816_s1 = scalar_lea.hbm %s5454_s19, 32 }
 0x3c8   : > { %p4813_p12 = scmp.ne.s32.totalorder %s5344_s10, %s4812_s26  ;;  %p4817_p9 = scmp.lt.u32.totalorder %s5344_s10, %s5454_s19 }
 0x3c9   : > { %p4818_p2 = scmp.lt.u32.totalorder %s4816_s1, %s4812_s26  ;;  %p4820_p1 = scmp.lt.u32.totalorder %s4812_s26, %s5344_s10 }
 0x3ca   : > { %p4814_p7 = pnand %p4813_p12, %p5455_p3 }
 0x3cb   : > { %p4819_p4 = por %p4818_p2, %p4817_p9 }
 0x3cc   : > { %p4815_p13 = pneg %p4814_p7 }
 0x3cd   : > { %p4821_p6 = por %p4820_p1, %p4819_p4 }
 0x3cf   : > { %p4822_p11 = pnand %p4821_p6, %p4815_p13 }
 0x3d1   : > { %4825 = shalt.err (!%p4822_p11)
}
 0x3d2   : > { %3953 = dma.vmem_to_hbm [thread:$0]  (%p5455_p3), %s5346_s21, 16, %s5344_s10, %s3350_s8  }
 0x3d3 PF: > { %s5456_s7 = sld [smem:[#allocation19_spill]]  ;;  %s5457_s9 = sld [smem:[#allocation22_spill]] }
 0x3d4   : > { %s5458_s14 = sld [smem:[#allocation21_spill]] }
 0x3d9   : > { %s3375_s11 = sand.u32 1, %s5456_s7   ;;  %p5459_p8 = scmp.ne.s32.totalorder %s5457_s9, 0 }
 0x3da   : > { %p5460_p10 = scmp.ge.s32.totalorder %s5458_s14, 2  ;;  %s3376_s13 = scalar_lea.sflag [#allocation4], %s3375_s11 }
 0x3dc   : > { %p3976_p0 = pnand %p5460_p10, %p5459_p8 }
 0x3de   : > { %4867 = dma.done.wait (!%p3976_p0), %s3376_s13, 16  }
 0x3df   : > { %4869 = vsyncadd (!%p3976_p0), %s3376_s13, 4294967280  ;;  %s27_s26 = sadd.s32 1, %s5458_s14   ;;  %s5461_s3 = sld [smem:[#allocation20_spill]] }
 0x3e0   : > { %p24_p5 = scmp.ge.s32.totalorder %s27_s26, 4   ;;  %s5462_s23 = sld [smem:[#allocation24_spill]] }
 0x3e1   : > { %s5463_s15 = sld [smem:[#allocation23_spill]]  ;;  %s5464_s21 = smov %s4876_s22 }
 0x3e2   : > { %s5466_s24 = smov %s4888_s25  ;;  %26 = sbr.rel (!%p24_p5) target bundleno = 14 (0xe), region = 125 }
 0x3e5   : > { %s5465_s22 = smov %s5461_s3 }
 0x3e7   : > { %s5467_s25 = smov %s5463_s15 }
 0x3e9   :  { %3380 = vsyncpa [#allocation3], 1 }
 0x3ea   :  { %3382 = vsyncpa [#allocation3 + $0x1], 1 }
 0x3eb   :  { %3383 = vsyncpa [#allocation6], 1 }
 0x3ec   :  { %3385 = vsyncpa [#allocation6 + $0x1], 1 }
 0x3ed   :  { %3386 = vsyncpa [#allocation9], 1 }
 0x3ee   :  { %3387 = vsyncpa [#allocation12], 1 }
 0x3ef   :  { %3388 = vsyncpa [#allocation4], 1 }
 0x3f0   :  { %3390 = vsyncpa [#allocation4 + $0x1], 1 }

</bundles_post_ra>
